<compile_context>
chip_gen: v5e
topology: v5e:2x2
jax: 0.10.0
libtpu: 0.0.40
codegen_flags: <defaults>
</compile_context>

<pallas_src>
import functools

import jax
import jax.numpy as jnp
from jax.experimental import pallas as pl
from jax.experimental.pallas import tpu as pltpu


# ----------------------- Kernel 1: directional recurrences -----------------------

def _directional_pair_kernel(xv_ref, xh_ref, wv_ref, wh_ref,
                             ov_ref, oh_ref,
                             padv_ref, gv_ref, padh_ref, gh_ref,
                             *, N, H, W, C):
    """Vertical + horizontal DirectionalConvLayer in one launch.

    Vertical operands are laid out (H, N*W, C): recurrence over rows, conv along W.
    Horizontal operands are laid out (W, N*H, C): recurrence over cols, conv along H.
    Conv bias is omitted: a per-channel constant is exactly cancelled by the
    InstanceNorm (affine=False) that immediately follows the conv.
    """

    def run_direction(x_ref, w_ref, o_ref, pad_ref, g_ref, S, L):
        # pad_ref: (N, L+16, C); row lives at sublane offset 8, borders stay zero
        pad_ref[...] = jnp.zeros_like(pad_ref)

        def apply_g(prev):                      # prev: (N*L, C) value -> writes g_ref
            for n in range(N):                  # static unroll over the small batch
                pad_ref[n, 8:8 + L, :] = prev[n * L:(n + 1) * L, :]
            for n in range(N):
                acc = jnp.zeros((L, C), jnp.float32)
                for t in range(9):              # 9-tap 1-D conv with channel mixing
                    acc = acc + jnp.dot(pad_ref[n, t + 4:t + 4 + L, :], w_ref[t],
                                        preferred_element_type=jnp.float32)
                # InstanceNorm2d (affine=False, eps=1e-5): stats over L per (n, c)
                mean = jnp.mean(acc, axis=0, keepdims=True)
                var = jnp.mean(jnp.square(acc - mean), axis=0, keepdims=True)
                y = (acc - mean) * jax.lax.rsqrt(var + 1e-5)
                # ELU (alpha = 1)
                g_ref[n * L:(n + 1) * L, :] = jnp.where(
                    y > 0, y, jnp.exp(jnp.minimum(y, 0.0)) - 1.0)

        # forward sweep: f[0] = x[0] ; f[i] = g(f[i-1]) + x[i]
        o_ref[0] = x_ref[0]

        def fwd(i, carry):
            apply_g(o_ref[i - 1])
            o_ref[i] = g_ref[...] + x_ref[i]
            return carry
        jax.lax.fori_loop(1, S, fwd, 0)

        # backward sweep: f[pos] = g(f[pos+1]) + f[pos] for pos = S-2 .. 0
        def bwd(k, carry):
            pos = S - 2 - k
            apply_g(o_ref[pos + 1])
            o_ref[pos] = g_ref[...] + o_ref[pos]
            return carry
        jax.lax.fori_loop(0, S - 1, bwd, 0)

    run_direction(xv_ref, wv_ref, ov_ref, padv_ref, gv_ref, H, W)
    run_direction(xh_ref, wh_ref, oh_ref, padh_ref, gh_ref, W, H)


def directional_pair(xv, xh, wv, wh, N, H, W, C):
    kern = functools.partial(_directional_pair_kernel, N=N, H=H, W=W, C=C)
    return pl.pallas_call(
        kern,
        out_shape=(jax.ShapeDtypeStruct((H, N * W, C), jnp.float32),
                   jax.ShapeDtypeStruct((W, N * H, C), jnp.float32)),
        grid=(1,),
        in_specs=[pl.BlockSpec((H, N * W, C), lambda i: (0, 0, 0)),
                  pl.BlockSpec((W, N * H, C), lambda i: (0, 0, 0)),
                  pl.BlockSpec((9, C, C), lambda i: (0, 0, 0)),
                  pl.BlockSpec((9, C, C), lambda i: (0, 0, 0))],
        out_specs=[pl.BlockSpec((H, N * W, C), lambda i: (0, 0, 0)),
                   pl.BlockSpec((W, N * H, C), lambda i: (0, 0, 0))],
        scratch_shapes=[pltpu.VMEM((N, W + 16, C), jnp.float32),
                        pltpu.VMEM((N * W, C), jnp.float32),
                        pltpu.VMEM((N, H + 16, C), jnp.float32),
                        pltpu.VMEM((N * H, C), jnp.float32)],
        compiler_params=pltpu.CompilerParams(
            dimension_semantics=("arbitrary",)),
    )(xv, xh, wv, wh)


# ------------------- Kernel 2: fused shortcut + BN/ELU tail ---------------------

def _tail_kernel(xc_ref, v_ref, h_ref, ws_ref,
                 gd_ref, bd_ref, gs_ref, bs_ref, gp_ref, bp_ref, o_ref):
    eps = 1e-5

    def bn(z, g, b):
        # BatchNorm2d, training-mode batch stats; (C, M) layout -> stats over lanes
        mean = jnp.mean(z, axis=1, keepdims=True)
        var = jnp.mean(jnp.square(z - mean), axis=1, keepdims=True)
        return (z - mean) * jax.lax.rsqrt(var + eps) * g + b

    def elu(z):
        return jnp.where(z > 0, z, jnp.exp(jnp.minimum(z, 0.0)) - 1.0)

    # shortcut ConvBlock: 1x1 conv (bias dropped: cancelled by BN) -> BN, no ELU
    shortcut = bn(jnp.dot(ws_ref[...], xc_ref[...],
                          preferred_element_type=jnp.float32),
                  gs_ref[...], bs_ref[...])
    # DirectionalConvBlock tail: vertical + horizontal -> BN -> ELU
    d = elu(bn(v_ref[...] + h_ref[...], gd_ref[...], bd_ref[...]))
    # DirectionalConvPath tail: add shortcut -> BN -> ELU
    o_ref[...] = elu(bn(d + shortcut, gp_ref[...], bp_ref[...]))


def fused_tail(x_cm, v_cm, h_cm, ws, gd, bd, gs, bs, gp, bp):
    C, M = x_cm.shape
    full = lambda shape: pl.BlockSpec(shape, lambda i: (0, 0))
    return pl.pallas_call(
        _tail_kernel,
        out_shape=jax.ShapeDtypeStruct((C, M), jnp.float32),
        grid=(1,),
        in_specs=[full((C, M)), full((C, M)), full((C, M)),
                  full((C, C)),
                  full((C, 1)), full((C, 1)),
                  full((C, 1)), full((C, 1)),
                  full((C, 1)), full((C, 1))],
        out_specs=full((C, M)),
        compiler_params=pltpu.CompilerParams(
            dimension_semantics=("arbitrary",)),
    )(x_cm, v_cm, h_cm, ws, gd, bd, gs, bs, gp, bp)


# -------------------------------- forward pass ----------------------------------

def directional_conv_path(x_nchw, p):
    x = x_nchw.astype(jnp.float32)
    N, C, H, W = x.shape
    M = N * H * W

    # Recurrence layouts (glue transposes only):
    #   vertical  : (H, N*W, C)  -- sequence over rows,    conv along W
    #   horizontal: (W, N*H, C)  -- sequence over columns, conv along H
    xv = jnp.transpose(x, (2, 0, 3, 1)).reshape(H, N * W, C)
    xh = jnp.transpose(x, (3, 0, 2, 1)).reshape(W, N * H, C)

    yv, yh = directional_pair(xv, xh, p["wv"], p["wh"], N, H, W, C)

    # Channel-major lane-dense slabs (C, N*H*W) for the fused tail kernel.
    x_cm = jnp.transpose(x, (1, 0, 2, 3)).reshape(C, M)
    v_cm = jnp.transpose(yv.reshape(H, N, W, C), (3, 1, 0, 2)).reshape(C, M)
    h_cm = jnp.transpose(yh.reshape(W, N, H, C), (3, 1, 2, 0)).reshape(C, M)

    out_cm = fused_tail(x_cm, v_cm, h_cm, p["ws"],
                        p["g_d"], p["b_d"], p["g_s"], p["b_s"],
                        p["g_p"], p["b_p"])
    return jnp.transpose(out_cm.reshape(C, N, H, W), (1, 0, 2, 3))   # NCHW


# ------------------------- deterministic parameters ------------------------------

def init_params(key, C):
    ks = jax.random.split(key, 9)
    nrm = lambda k, shape, s=0.1: s * jax.random.normal(k, shape, jnp.float32)
    # NOTE: conv biases are omitted — a per-channel constant is exactly cancelled by
    # the InstanceNorm / training-mode BatchNorm that immediately follows each conv.
    return {
        "wv": nrm(ks[0], (9, C, C)),            # vertical (1,9) conv  (tap, cin, cout)
        "wh": nrm(ks[1], (9, C, C)),            # horizontal (9,1) conv (tap, cin, cout)
        "ws": nrm(ks[2], (C, C)),               # shortcut 1x1 conv (cout, cin)
        "g_d": 1.0 + nrm(ks[3], (C, 1)), "b_d": nrm(ks[4], (C, 1), 0.05),  # block BN
        "g_s": 1.0 + nrm(ks[5], (C, 1)), "b_s": nrm(ks[6], (C, 1), 0.05),  # shortcut BN
        "g_p": 1.0 + nrm(ks[7], (C, 1)), "b_p": nrm(ks[8], (C, 1), 0.05),  # path BN
    }


# ------------------------------------ main ---------------------------------------

if __name__ == "__main__":
    key = jax.random.PRNGKey(0)
    kx, kp = jax.random.split(key)
    N, C, H, W = 2, 4, 16, 16
    x = jax.random.normal(kx, (N, C, H, W), jnp.float32)   # NCHW like PyTorch
    params = init_params(kp, C)

    fwd = jax.jit(directional_conv_path)
    out = fwd(x, params)
    jax.block_until_ready(out)
    assert out.shape == (N, C, H, W)
    print("KERNEL_OK")
</pallas_src>

<mosaic_0001>
module attributes {stable_mosaic.version = 11 : i64} {
  func.func @_directional_pair_kernel(%arg0: i32, %arg1: memref<16x32x4xf32, #tpu.memory_space<vmem>>, %arg2: memref<16x32x4xf32, #tpu.memory_space<vmem>>, %arg3: memref<9x4x4xf32, #tpu.memory_space<vmem>>, %arg4: memref<9x4x4xf32, #tpu.memory_space<vmem>>, %arg5: memref<16x32x4xf32, #tpu.memory_space<vmem>>, %arg6: memref<16x32x4xf32, #tpu.memory_space<vmem>>, %arg7: memref<2x32x4xf32, #tpu.memory_space<vmem>>, %arg8: memref<32x4xf32, #tpu.memory_space<vmem>>, %arg9: memref<2x32x4xf32, #tpu.memory_space<vmem>>, %arg10: memref<32x4xf32, #tpu.memory_space<vmem>>) attributes {dimension_semantics = [#tpu.dimension_semantics<arbitrary>], iteration_bounds = array<i64: 1>, scalar_prefetch = 0 : i64, scratch_operands = 4 : i64, tpu.core_type = #tpu.core_type<tc>, window_params = [{pipeline_mode = #tpu.pipeline_mode<synchronous>, transform_indices = @transform_0, window_bounds = array<i64: 16, 32, 4>}, {pipeline_mode = #tpu.pipeline_mode<synchronous>, transform_indices = @transform_1, window_bounds = array<i64: 16, 32, 4>}, {pipeline_mode = #tpu.pipeline_mode<synchronous>, transform_indices = @transform_2, window_bounds = array<i64: 9, 4, 4>}, {pipeline_mode = #tpu.pipeline_mode<synchronous>, transform_indices = @transform_3, window_bounds = array<i64: 9, 4, 4>}, {pipeline_mode = #tpu.pipeline_mode<synchronous>, transform_indices = @transform_4, window_bounds = array<i64: 16, 32, 4>}, {pipeline_mode = #tpu.pipeline_mode<synchronous>, transform_indices = @transform_5, window_bounds = array<i64: 16, 32, 4>}]} {
    %cst = arith.constant 0.000000e+00 : f32
    %0 = vector.broadcast %cst : f32 to vector<2x32x4xf32>
    %c0 = arith.constant 0 : index
    %c0_0 = arith.constant 0 : index
    %c0_1 = arith.constant 0 : index
    %1 = vector.load %arg7[%c0, %c0_0, %c0_1] : memref<2x32x4xf32, #tpu.memory_space<vmem>>, vector<2x32x4xf32>
    tpu.vector_store %arg7[%c0, %c0_0, %c0_1], %0 {strides = array<i32>} : memref<2x32x4xf32, #tpu.memory_space<vmem>>, vector<2x32x4xf32>,
    %c0_2 = arith.constant 0 : index
    %c0_3 = arith.constant 0 : index
    %c0_4 = arith.constant 0 : index
    %2 = vector.load %arg1[%c0_2, %c0_3, %c0_4] : memref<16x32x4xf32, #tpu.memory_space<vmem>>, vector<1x32x4xf32>
    %3 = vector.shape_cast %2 : vector<1x32x4xf32> to vector<32x4xf32>
    %c0_5 = arith.constant 0 : index
    %c0_6 = arith.constant 0 : index
    %c0_7 = arith.constant 0 : index
    %4 = vector.load %arg5[%c0_5, %c0_6, %c0_7] : memref<16x32x4xf32, #tpu.memory_space<vmem>>, vector<1x32x4xf32>
    %5 = vector.shape_cast %4 : vector<1x32x4xf32> to vector<32x4xf32>
    %6 = vector.shape_cast %3 : vector<32x4xf32> to vector<1x32x4xf32>
    tpu.vector_store %arg5[%c0_5, %c0_6, %c0_7], %6 {strides = array<i32>} : memref<16x32x4xf32, #tpu.memory_space<vmem>>, vector<1x32x4xf32>,
    %c1_i32 = arith.constant 1 : i32
    %c15_i32 = arith.constant 15 : i32
    %7 = arith.addi %c1_i32, %c15_i32 : i32
    %c1_i32_8 = arith.constant 1 : i32
    scf.for %arg11 = %c1_i32 to %7 step %c1_i32_8  : i32 {
      %c1_i32_31 = arith.constant 1 : i32
      %18 = arith.subi %arg11, %c1_i32_31 : i32
      %19 = arith.index_cast %18 : i32 to index
      %c0_32 = arith.constant 0 : index
      %c0_33 = arith.constant 0 : index
      %20 = vector.load %arg5[%19, %c0_32, %c0_33] : memref<16x32x4xf32, #tpu.memory_space<vmem>>, vector<1x32x4xf32>
      %21 = vector.shape_cast %20 : vector<1x32x4xf32> to vector<32x4xf32>
      %22 = vector.extract_strided_slice %21 {offsets = [0, 0], sizes = [16, 4], strides = [1, 1]} : vector<32x4xf32> to vector<16x4xf32>
      %c0_34 = arith.constant 0 : index
      %c8 = arith.constant 8 : index
      %c0_35 = arith.constant 0 : index
      %23 = vector.load %arg7[%c0_34, %c8, %c0_35] : memref<2x32x4xf32, #tpu.memory_space<vmem>>, vector<1x16x4xf32>
      %24 = vector.shape_cast %23 : vector<1x16x4xf32> to vector<16x4xf32>
      %25 = vector.shape_cast %22 : vector<16x4xf32> to vector<1x16x4xf32>
      tpu.vector_store %arg7[%c0_34, %c8, %c0_35], %25 {strides = array<i32>} : memref<2x32x4xf32, #tpu.memory_space<vmem>>, vector<1x16x4xf32>,
      %26 = vector.extract_strided_slice %21 {offsets = [16, 0], sizes = [16, 4], strides = [1, 1]} : vector<32x4xf32> to vector<16x4xf32>
      %c1 = arith.constant 1 : index
      %c8_36 = arith.constant 8 : index
      %c0_37 = arith.constant 0 : index
      %27 = vector.load %arg7[%c1, %c8_36, %c0_37] : memref<2x32x4xf32, #tpu.memory_space<vmem>>, vector<1x16x4xf32>
      %28 = vector.shape_cast %27 : vector<1x16x4xf32> to vector<16x4xf32>
      %29 = vector.shape_cast %26 : vector<16x4xf32> to vector<1x16x4xf32>
      tpu.vector_store %arg7[%c1, %c8_36, %c0_37], %29 {strides = array<i32>} : memref<2x32x4xf32, #tpu.memory_space<vmem>>, vector<1x16x4xf32>,
      %cst_38 = arith.constant 0.000000e+00 : f32
      %30 = vector.broadcast %cst_38 : f32 to vector<16x4xf32>
      %c0_39 = arith.constant 0 : index
      %c4 = arith.constant 4 : index
      %c0_40 = arith.constant 0 : index
      %31 = vector.load %arg7[%c0_39, %c4, %c0_40] : memref<2x32x4xf32, #tpu.memory_space<vmem>>, vector<1x16x4xf32>
      %32 = vector.shape_cast %31 : vector<1x16x4xf32> to vector<16x4xf32>
      %c0_41 = arith.constant 0 : index
      %c0_42 = arith.constant 0 : index
      %c0_43 = arith.constant 0 : index
      %33 = vector.load %arg3[%c0_41, %c0_42, %c0_43] : memref<9x4x4xf32, #tpu.memory_space<vmem>>, vector<1x4x4xf32>
      %34 = vector.shape_cast %33 : vector<1x4x4xf32> to vector<4x4xf32>
      %cst_44 = arith.constant dense<0.000000e+00> : vector<16x4xf32>
      %35 = tpu.matmul %32, %34, %cst_44 {dimension_numbers = #tpu.dot_dimension_numbers<[1], [0], [0], [1], [0, 0, 1, 1], [], []>} : vector<16x4xf32>, vector<4x4xf32>, vector<16x4xf32> -> vector<16x4xf32>
      %36 = arith.addf %30, %35 : vector<16x4xf32>
      %c0_45 = arith.constant 0 : index
      %c5 = arith.constant 5 : index
      %c0_46 = arith.constant 0 : index
      %37 = vector.load %arg7[%c0_45, %c5, %c0_46] : memref<2x32x4xf32, #tpu.memory_space<vmem>>, vector<1x16x4xf32>
      %38 = vector.shape_cast %37 : vector<1x16x4xf32> to vector<16x4xf32>
      %c1_47 = arith.constant 1 : index
      %c0_48 = arith.constant 0 : index
      %c0_49 = arith.constant 0 : index
      %39 = vector.load %arg3[%c1_47, %c0_48, %c0_49] : memref<9x4x4xf32, #tpu.memory_space<vmem>>, vector<1x4x4xf32>
      %40 = vector.shape_cast %39 : vector<1x4x4xf32> to vector<4x4xf32>
      %cst_50 = arith.constant dense<0.000000e+00> : vector<16x4xf32>
      %41 = tpu.matmul %38, %40, %cst_50 {dimension_numbers = #tpu.dot_dimension_numbers<[1], [0], [0], [1], [0, 0, 1, 1], [], []>} : vector<16x4xf32>, vector<4x4xf32>, vector<16x4xf32> -> vector<16x4xf32>
      %42 = arith.addf %36, %41 : vector<16x4xf32>
      %c0_51 = arith.constant 0 : index
      %c6 = arith.constant 6 : index
      %c0_52 = arith.constant 0 : index
      %43 = vector.load %arg7[%c0_51, %c6, %c0_52] : memref<2x32x4xf32, #tpu.memory_space<vmem>>, vector<1x16x4xf32>
      %44 = vector.shape_cast %43 : vector<1x16x4xf32> to vector<16x4xf32>
      %c2 = arith.constant 2 : index
      %c0_53 = arith.constant 0 : index
      %c0_54 = arith.constant 0 : index
      %45 = vector.load %arg3[%c2, %c0_53, %c0_54] : memref<9x4x4xf32, #tpu.memory_space<vmem>>, vector<1x4x4xf32>
      %46 = vector.shape_cast %45 : vector<1x4x4xf32> to vector<4x4xf32>
      %cst_55 = arith.constant dense<0.000000e+00> : vector<16x4xf32>
      %47 = tpu.matmul %44, %46, %cst_55 {dimension_numbers = #tpu.dot_dimension_numbers<[1], [0], [0], [1], [0, 0, 1, 1], [], []>} : vector<16x4xf32>, vector<4x4xf32>, vector<16x4xf32> -> vector<16x4xf32>
      %48 = arith.addf %42, %47 : vector<16x4xf32>
      %c0_56 = arith.constant 0 : index
      %c7 = arith.constant 7 : index
      %c0_57 = arith.constant 0 : index
      %49 = vector.load %arg7[%c0_56, %c7, %c0_57] : memref<2x32x4xf32, #tpu.memory_space<vmem>>, vector<1x16x4xf32>
      %50 = vector.shape_cast %49 : vector<1x16x4xf32> to vector<16x4xf32>
      %c3 = arith.constant 3 : index
      %c0_58 = arith.constant 0 : index
      %c0_59 = arith.constant 0 : index
      %51 = vector.load %arg3[%c3, %c0_58, %c0_59] : memref<9x4x4xf32, #tpu.memory_space<vmem>>, vector<1x4x4xf32>
      %52 = vector.shape_cast %51 : vector<1x4x4xf32> to vector<4x4xf32>
      %cst_60 = arith.constant dense<0.000000e+00> : vector<16x4xf32>
      %53 = tpu.matmul %50, %52, %cst_60 {dimension_numbers = #tpu.dot_dimension_numbers<[1], [0], [0], [1], [0, 0, 1, 1], [], []>} : vector<16x4xf32>, vector<4x4xf32>, vector<16x4xf32> -> vector<16x4xf32>
      %54 = arith.addf %48, %53 : vector<16x4xf32>
      %c0_61 = arith.constant 0 : index
      %c8_62 = arith.constant 8 : index
      %c0_63 = arith.constant 0 : index
      %55 = vector.load %arg7[%c0_61, %c8_62, %c0_63] : memref<2x32x4xf32, #tpu.memory_space<vmem>>, vector<1x16x4xf32>
      %56 = vector.shape_cast %55 : vector<1x16x4xf32> to vector<16x4xf32>
      %c4_64 = arith.constant 4 : index
      %c0_65 = arith.constant 0 : index
      %c0_66 = arith.constant 0 : index
      %57 = vector.load %arg3[%c4_64, %c0_65, %c0_66] : memref<9x4x4xf32, #tpu.memory_space<vmem>>, vector<1x4x4xf32>
      %58 = vector.shape_cast %57 : vector<1x4x4xf32> to vector<4x4xf32>
      %cst_67 = arith.constant dense<0.000000e+00> : vector<16x4xf32>
      %59 = tpu.matmul %56, %58, %cst_67 {dimension_numbers = #tpu.dot_dimension_numbers<[1], [0], [0], [1], [0, 0, 1, 1], [], []>} : vector<16x4xf32>, vector<4x4xf32>, vector<16x4xf32> -> vector<16x4xf32>
      %60 = arith.addf %54, %59 : vector<16x4xf32>
      %c0_68 = arith.constant 0 : index
      %c9 = arith.constant 9 : index
      %c0_69 = arith.constant 0 : index
      %61 = vector.load %arg7[%c0_68, %c9, %c0_69] : memref<2x32x4xf32, #tpu.memory_space<vmem>>, vector<1x16x4xf32>
      %62 = vector.shape_cast %61 : vector<1x16x4xf32> to vector<16x4xf32>
      %c5_70 = arith.constant 5 : index
      %c0_71 = arith.constant 0 : index
      %c0_72 = arith.constant 0 : index
      %63 = vector.load %arg3[%c5_70, %c0_71, %c0_72] : memref<9x4x4xf32, #tpu.memory_space<vmem>>, vector<1x4x4xf32>
      %64 = vector.shape_cast %63 : vector<1x4x4xf32> to vector<4x4xf32>
      %cst_73 = arith.constant dense<0.000000e+00> : vector<16x4xf32>
      %65 = tpu.matmul %62, %64, %cst_73 {dimension_numbers = #tpu.dot_dimension_numbers<[1], [0], [0], [1], [0, 0, 1, 1], [], []>} : vector<16x4xf32>, vector<4x4xf32>, vector<16x4xf32> -> vector<16x4xf32>
      %66 = arith.addf %60, %65 : vector<16x4xf32>
      %c0_74 = arith.constant 0 : index
      %c10 = arith.constant 10 : index
      %c0_75 = arith.constant 0 : index
      %67 = vector.load %arg7[%c0_74, %c10, %c0_75] : memref<2x32x4xf32, #tpu.memory_space<vmem>>, vector<1x16x4xf32>
      %68 = vector.shape_cast %67 : vector<1x16x4xf32> to vector<16x4xf32>
      %c6_76 = arith.constant 6 : index
      %c0_77 = arith.constant 0 : index
      %c0_78 = arith.constant 0 : index
      %69 = vector.load %arg3[%c6_76, %c0_77, %c0_78] : memref<9x4x4xf32, #tpu.memory_space<vmem>>, vector<1x4x4xf32>
      %70 = vector.shape_cast %69 : vector<1x4x4xf32> to vector<4x4xf32>
      %cst_79 = arith.constant dense<0.000000e+00> : vector<16x4xf32>
      %71 = tpu.matmul %68, %70, %cst_79 {dimension_numbers = #tpu.dot_dimension_numbers<[1], [0], [0], [1], [0, 0, 1, 1], [], []>} : vector<16x4xf32>, vector<4x4xf32>, vector<16x4xf32> -> vector<16x4xf32>
      %72 = arith.addf %66, %71 : vector<16x4xf32>
      %c0_80 = arith.constant 0 : index
      %c11 = arith.constant 11 : index
      %c0_81 = arith.constant 0 : index
      %73 = vector.load %arg7[%c0_80, %c11, %c0_81] : memref<2x32x4xf32, #tpu.memory_space<vmem>>, vector<1x16x4xf32>
      %74 = vector.shape_cast %73 : vector<1x16x4xf32> to vector<16x4xf32>
      %c7_82 = arith.constant 7 : index
      %c0_83 = arith.constant 0 : index
      %c0_84 = arith.constant 0 : index
      %75 = vector.load %arg3[%c7_82, %c0_83, %c0_84] : memref<9x4x4xf32, #tpu.memory_space<vmem>>, vector<1x4x4xf32>
      %76 = vector.shape_cast %75 : vector<1x4x4xf32> to vector<4x4xf32>
      %cst_85 = arith.constant dense<0.000000e+00> : vector<16x4xf32>
      %77 = tpu.matmul %74, %76, %cst_85 {dimension_numbers = #tpu.dot_dimension_numbers<[1], [0], [0], [1], [0, 0, 1, 1], [], []>} : vector<16x4xf32>, vector<4x4xf32>, vector<16x4xf32> -> vector<16x4xf32>
      %78 = arith.addf %72, %77 : vector<16x4xf32>
      %c0_86 = arith.constant 0 : index
      %c12 = arith.constant 12 : index
      %c0_87 = arith.constant 0 : index
      %79 = vector.load %arg7[%c0_86, %c12, %c0_87] : memref<2x32x4xf32, #tpu.memory_space<vmem>>, vector<1x16x4xf32>
      %80 = vector.shape_cast %79 : vector<1x16x4xf32> to vector<16x4xf32>
      %c8_88 = arith.constant 8 : index
      %c0_89 = arith.constant 0 : index
      %c0_90 = arith.constant 0 : index
      %81 = vector.load %arg3[%c8_88, %c0_89, %c0_90] : memref<9x4x4xf32, #tpu.memory_space<vmem>>, vector<1x4x4xf32>
      %82 = vector.shape_cast %81 : vector<1x4x4xf32> to vector<4x4xf32>
      %cst_91 = arith.constant dense<0.000000e+00> : vector<16x4xf32>
      %83 = tpu.matmul %80, %82, %cst_91 {dimension_numbers = #tpu.dot_dimension_numbers<[1], [0], [0], [1], [0, 0, 1, 1], [], []>} : vector<16x4xf32>, vector<4x4xf32>, vector<16x4xf32> -> vector<16x4xf32>
      %84 = arith.addf %78, %83 : vector<16x4xf32>
      %cst_92 = arith.constant dense<0.000000e+00> : vector<4xf32>
      %85 = vector.multi_reduction <add>, %84, %cst_92 [0] : vector<16x4xf32> to vector<4xf32>
      %86 = vector.shape_cast %85 : vector<4xf32> to vector<1x4xf32>
      %cst_93 = arith.constant 1.600000e+01 : f32
      %87 = vector.broadcast %cst_93 : f32 to vector<1x4xf32>
      %88 = arith.divf %86, %87 : vector<1x4xf32>
      %89 = vector.broadcast %88 : vector<1x4xf32> to vector<16x4xf32>
      %90 = arith.subf %84, %89 : vector<16x4xf32>
      %91 = arith.mulf %90, %90 : vector<16x4xf32>
      %cst_94 = arith.constant dense<0.000000e+00> : vector<4xf32>
      %92 = vector.multi_reduction <add>, %91, %cst_94 [0] : vector<16x4xf32> to vector<4xf32>
      %93 = vector.shape_cast %92 : vector<4xf32> to vector<1x4xf32>
      %cst_95 = arith.constant 1.600000e+01 : f32
      %94 = vector.broadcast %cst_95 : f32 to vector<1x4xf32>
      %95 = arith.divf %93, %94 : vector<1x4xf32>
      %96 = vector.broadcast %88 : vector<1x4xf32> to vector<16x4xf32>
      %97 = arith.subf %84, %96 : vector<16x4xf32>
      %cst_96 = arith.constant 9.99999974E-6 : f32
      %98 = vector.broadcast %cst_96 : f32 to vector<1x4xf32>
      %99 = arith.addf %95, %98 : vector<1x4xf32>
      %100 = math.rsqrt %99 : vector<1x4xf32>
      %101 = vector.broadcast %100 : vector<1x4xf32> to vector<16x4xf32>
      %102 = arith.mulf %97, %101 : vector<16x4xf32>
      %cst_97 = arith.constant 0.000000e+00 : f32
      %103 = vector.broadcast %cst_97 : f32 to vector<16x4xf32>
      %104 = arith.cmpf ogt, %102, %103 : vector<16x4xf32>
      %cst_98 = arith.constant 0.000000e+00 : f32
      %105 = vector.broadcast %cst_98 : f32 to vector<16x4xf32>
      %106 = arith.minimumf %102, %105 : vector<16x4xf32>
      %107 = math.exp %106 : vector<16x4xf32>
      %cst_99 = arith.constant 1.000000e+00 : f32
      %108 = vector.broadcast %cst_99 : f32 to vector<16x4xf32>
      %109 = arith.subf %107, %108 : vector<16x4xf32>
      %110 = arith.select %104, %102, %109 : vector<16x4xi1>, vector<16x4xf32>
      %c0_100 = arith.constant 0 : index
      %c0_101 = arith.constant 0 : index
      %111 = vector.load %arg8[%c0_100, %c0_101] : memref<32x4xf32, #tpu.memory_space<vmem>>, vector<16x4xf32>
      tpu.vector_store %arg8[%c0_100, %c0_101], %110 {strides = array<i32>} : memref<32x4xf32, #tpu.memory_space<vmem>>, vector<16x4xf32>,
      %cst_102 = arith.constant 0.000000e+00 : f32
      %112 = vector.broadcast %cst_102 : f32 to vector<16x4xf32>
      %c1_103 = arith.constant 1 : index
      %c4_104 = arith.constant 4 : index
      %c0_105 = arith.constant 0 : index
      %113 = vector.load %arg7[%c1_103, %c4_104, %c0_105] : memref<2x32x4xf32, #tpu.memory_space<vmem>>, vector<1x16x4xf32>
      %114 = vector.shape_cast %113 : vector<1x16x4xf32> to vector<16x4xf32>
      %c0_106 = arith.constant 0 : index
      %c0_107 = arith.constant 0 : index
      %c0_108 = arith.constant 0 : index
      %115 = vector.load %arg3[%c0_106, %c0_107, %c0_108] : memref<9x4x4xf32, #tpu.memory_space<vmem>>, vector<1x4x4xf32>
      %116 = vector.shape_cast %115 : vector<1x4x4xf32> to vector<4x4xf32>
      %cst_109 = arith.constant dense<0.000000e+00> : vector<16x4xf32>
      %117 = tpu.matmul %114, %116, %cst_109 {dimension_numbers = #tpu.dot_dimension_numbers<[1], [0], [0], [1], [0, 0, 1, 1], [], []>} : vector<16x4xf32>, vector<4x4xf32>, vector<16x4xf32> -> vector<16x4xf32>
      %118 = arith.addf %112, %117 : vector<16x4xf32>
      %c1_110 = arith.constant 1 : index
      %c5_111 = arith.constant 5 : index
      %c0_112 = arith.constant 0 : index
      %119 = vector.load %arg7[%c1_110, %c5_111, %c0_112] : memref<2x32x4xf32, #tpu.memory_space<vmem>>, vector<1x16x4xf32>
      %120 = vector.shape_cast %119 : vector<1x16x4xf32> to vector<16x4xf32>
      %c1_113 = arith.constant 1 : index
      %c0_114 = arith.constant 0 : index
      %c0_115 = arith.constant 0 : index
      %121 = vector.load %arg3[%c1_113, %c0_114, %c0_115] : memref<9x4x4xf32, #tpu.memory_space<vmem>>, vector<1x4x4xf32>
      %122 = vector.shape_cast %121 : vector<1x4x4xf32> to vector<4x4xf32>
      %cst_116 = arith.constant dense<0.000000e+00> : vector<16x4xf32>
      %123 = tpu.matmul %120, %122, %cst_116 {dimension_numbers = #tpu.dot_dimension_numbers<[1], [0], [0], [1], [0, 0, 1, 1], [], []>} : vector<16x4xf32>, vector<4x4xf32>, vector<16x4xf32> -> vector<16x4xf32>
      %124 = arith.addf %118, %123 : vector<16x4xf32>
      %c1_117 = arith.constant 1 : index
      %c6_118 = arith.constant 6 : index
      %c0_119 = arith.constant 0 : index
      %125 = vector.load %arg7[%c1_117, %c6_118, %c0_119] : memref<2x32x4xf32, #tpu.memory_space<vmem>>, vector<1x16x4xf32>
      %126 = vector.shape_cast %125 : vector<1x16x4xf32> to vector<16x4xf32>
      %c2_120 = arith.constant 2 : index
      %c0_121 = arith.constant 0 : index
      %c0_122 = arith.constant 0 : index
      %127 = vector.load %arg3[%c2_120, %c0_121, %c0_122] : memref<9x4x4xf32, #tpu.memory_space<vmem>>, vector<1x4x4xf32>
      %128 = vector.shape_cast %127 : vector<1x4x4xf32> to vector<4x4xf32>
      %cst_123 = arith.constant dense<0.000000e+00> : vector<16x4xf32>
      %129 = tpu.matmul %126, %128, %cst_123 {dimension_numbers = #tpu.dot_dimension_numbers<[1], [0], [0], [1], [0, 0, 1, 1], [], []>} : vector<16x4xf32>, vector<4x4xf32>, vector<16x4xf32> -> vector<16x4xf32>
      %130 = arith.addf %124, %129 : vector<16x4xf32>
      %c1_124 = arith.constant 1 : index
      %c7_125 = arith.constant 7 : index
      %c0_126 = arith.constant 0 : index
      %131 = vector.load %arg7[%c1_124, %c7_125, %c0_126] : memref<2x32x4xf32, #tpu.memory_space<vmem>>, vector<1x16x4xf32>
      %132 = vector.shape_cast %131 : vector<1x16x4xf32> to vector<16x4xf32>
      %c3_127 = arith.constant 3 : index
      %c0_128 = arith.constant 0 : index
      %c0_129 = arith.constant 0 : index
      %133 = vector.load %arg3[%c3_127, %c0_128, %c0_129] : memref<9x4x4xf32, #tpu.memory_space<vmem>>, vector<1x4x4xf32>
      %134 = vector.shape_cast %133 : vector<1x4x4xf32> to vector<4x4xf32>
      %cst_130 = arith.constant dense<0.000000e+00> : vector<16x4xf32>
      %135 = tpu.matmul %132, %134, %cst_130 {dimension_numbers = #tpu.dot_dimension_numbers<[1], [0], [0], [1], [0, 0, 1, 1], [], []>} : vector<16x4xf32>, vector<4x4xf32>, vector<16x4xf32> -> vector<16x4xf32>
      %136 = arith.addf %130, %135 : vector<16x4xf32>
      %c1_131 = arith.constant 1 : index
      %c8_132 = arith.constant 8 : index
      %c0_133 = arith.constant 0 : index
      %137 = vector.load %arg7[%c1_131, %c8_132, %c0_133] : memref<2x32x4xf32, #tpu.memory_space<vmem>>, vector<1x16x4xf32>
      %138 = vector.shape_cast %137 : vector<1x16x4xf32> to vector<16x4xf32>
      %c4_134 = arith.constant 4 : index
      %c0_135 = arith.constant 0 : index
      %c0_136 = arith.constant 0 : index
      %139 = vector.load %arg3[%c4_134, %c0_135, %c0_136] : memref<9x4x4xf32, #tpu.memory_space<vmem>>, vector<1x4x4xf32>
      %140 = vector.shape_cast %139 : vector<1x4x4xf32> to vector<4x4xf32>
      %cst_137 = arith.constant dense<0.000000e+00> : vector<16x4xf32>
      %141 = tpu.matmul %138, %140, %cst_137 {dimension_numbers = #tpu.dot_dimension_numbers<[1], [0], [0], [1], [0, 0, 1, 1], [], []>} : vector<16x4xf32>, vector<4x4xf32>, vector<16x4xf32> -> vector<16x4xf32>
      %142 = arith.addf %136, %141 : vector<16x4xf32>
      %c1_138 = arith.constant 1 : index
      %c9_139 = arith.constant 9 : index
      %c0_140 = arith.constant 0 : index
      %143 = vector.load %arg7[%c1_138, %c9_139, %c0_140] : memref<2x32x4xf32, #tpu.memory_space<vmem>>, vector<1x16x4xf32>
      %144 = vector.shape_cast %143 : vector<1x16x4xf32> to vector<16x4xf32>
      %c5_141 = arith.constant 5 : index
      %c0_142 = arith.constant 0 : index
      %c0_143 = arith.constant 0 : index
      %145 = vector.load %arg3[%c5_141, %c0_142, %c0_143] : memref<9x4x4xf32, #tpu.memory_space<vmem>>, vector<1x4x4xf32>
      %146 = vector.shape_cast %145 : vector<1x4x4xf32> to vector<4x4xf32>
      %cst_144 = arith.constant dense<0.000000e+00> : vector<16x4xf32>
      %147 = tpu.matmul %144, %146, %cst_144 {dimension_numbers = #tpu.dot_dimension_numbers<[1], [0], [0], [1], [0, 0, 1, 1], [], []>} : vector<16x4xf32>, vector<4x4xf32>, vector<16x4xf32> -> vector<16x4xf32>
      %148 = arith.addf %142, %147 : vector<16x4xf32>
      %c1_145 = arith.constant 1 : index
      %c10_146 = arith.constant 10 : index
      %c0_147 = arith.constant 0 : index
      %149 = vector.load %arg7[%c1_145, %c10_146, %c0_147] : memref<2x32x4xf32, #tpu.memory_space<vmem>>, vector<1x16x4xf32>
      %150 = vector.shape_cast %149 : vector<1x16x4xf32> to vector<16x4xf32>
      %c6_148 = arith.constant 6 : index
      %c0_149 = arith.constant 0 : index
      %c0_150 = arith.constant 0 : index
      %151 = vector.load %arg3[%c6_148, %c0_149, %c0_150] : memref<9x4x4xf32, #tpu.memory_space<vmem>>, vector<1x4x4xf32>
      %152 = vector.shape_cast %151 : vector<1x4x4xf32> to vector<4x4xf32>
      %cst_151 = arith.constant dense<0.000000e+00> : vector<16x4xf32>
      %153 = tpu.matmul %150, %152, %cst_151 {dimension_numbers = #tpu.dot_dimension_numbers<[1], [0], [0], [1], [0, 0, 1, 1], [], []>} : vector<16x4xf32>, vector<4x4xf32>, vector<16x4xf32> -> vector<16x4xf32>
      %154 = arith.addf %148, %153 : vector<16x4xf32>
      %c1_152 = arith.constant 1 : index
      %c11_153 = arith.constant 11 : index
      %c0_154 = arith.constant 0 : index
      %155 = vector.load %arg7[%c1_152, %c11_153, %c0_154] : memref<2x32x4xf32, #tpu.memory_space<vmem>>, vector<1x16x4xf32>
      %156 = vector.shape_cast %155 : vector<1x16x4xf32> to vector<16x4xf32>
      %c7_155 = arith.constant 7 : index
      %c0_156 = arith.constant 0 : index
      %c0_157 = arith.constant 0 : index
      %157 = vector.load %arg3[%c7_155, %c0_156, %c0_157] : memref<9x4x4xf32, #tpu.memory_space<vmem>>, vector<1x4x4xf32>
      %158 = vector.shape_cast %157 : vector<1x4x4xf32> to vector<4x4xf32>
      %cst_158 = arith.constant dense<0.000000e+00> : vector<16x4xf32>
      %159 = tpu.matmul %156, %158, %cst_158 {dimension_numbers = #tpu.dot_dimension_numbers<[1], [0], [0], [1], [0, 0, 1, 1], [], []>} : vector<16x4xf32>, vector<4x4xf32>, vector<16x4xf32> -> vector<16x4xf32>
      %160 = arith.addf %154, %159 : vector<16x4xf32>
      %c1_159 = arith.constant 1 : index
      %c12_160 = arith.constant 12 : index
      %c0_161 = arith.constant 0 : index
      %161 = vector.load %arg7[%c1_159, %c12_160, %c0_161] : memref<2x32x4xf32, #tpu.memory_space<vmem>>, vector<1x16x4xf32>
      %162 = vector.shape_cast %161 : vector<1x16x4xf32> to vector<16x4xf32>
      %c8_162 = arith.constant 8 : index
      %c0_163 = arith.constant 0 : index
      %c0_164 = arith.constant 0 : index
      %163 = vector.load %arg3[%c8_162, %c0_163, %c0_164] : memref<9x4x4xf32, #tpu.memory_space<vmem>>, vector<1x4x4xf32>
      %164 = vector.shape_cast %163 : vector<1x4x4xf32> to vector<4x4xf32>
      %cst_165 = arith.constant dense<0.000000e+00> : vector<16x4xf32>
      %165 = tpu.matmul %162, %164, %cst_165 {dimension_numbers = #tpu.dot_dimension_numbers<[1], [0], [0], [1], [0, 0, 1, 1], [], []>} : vector<16x4xf32>, vector<4x4xf32>, vector<16x4xf32> -> vector<16x4xf32>
      %166 = arith.addf %160, %165 : vector<16x4xf32>
      %cst_166 = arith.constant dense<0.000000e+00> : vector<4xf32>
      %167 = vector.multi_reduction <add>, %166, %cst_166 [0] : vector<16x4xf32> to vector<4xf32>
      %168 = vector.shape_cast %167 : vector<4xf32> to vector<1x4xf32>
      %cst_167 = arith.constant 1.600000e+01 : f32
      %169 = vector.broadcast %cst_167 : f32 to vector<1x4xf32>
      %170 = arith.divf %168, %169 : vector<1x4xf32>
      %171 = vector.broadcast %170 : vector<1x4xf32> to vector<16x4xf32>
      %172 = arith.subf %166, %171 : vector<16x4xf32>
      %173 = arith.mulf %172, %172 : vector<16x4xf32>
      %cst_168 = arith.constant dense<0.000000e+00> : vector<4xf32>
      %174 = vector.multi_reduction <add>, %173, %cst_168 [0] : vector<16x4xf32> to vector<4xf32>
      %175 = vector.shape_cast %174 : vector<4xf32> to vector<1x4xf32>
      %cst_169 = arith.constant 1.600000e+01 : f32
      %176 = vector.broadcast %cst_169 : f32 to vector<1x4xf32>
      %177 = arith.divf %175, %176 : vector<1x4xf32>
      %178 = vector.broadcast %170 : vector<1x4xf32> to vector<16x4xf32>
      %179 = arith.subf %166, %178 : vector<16x4xf32>
      %cst_170 = arith.constant 9.99999974E-6 : f32
      %180 = vector.broadcast %cst_170 : f32 to vector<1x4xf32>
      %181 = arith.addf %177, %180 : vector<1x4xf32>
      %182 = math.rsqrt %181 : vector<1x4xf32>
      %183 = vector.broadcast %182 : vector<1x4xf32> to vector<16x4xf32>
      %184 = arith.mulf %179, %183 : vector<16x4xf32>
      %cst_171 = arith.constant 0.000000e+00 : f32
      %185 = vector.broadcast %cst_171 : f32 to vector<16x4xf32>
      %186 = arith.cmpf ogt, %184, %185 : vector<16x4xf32>
      %cst_172 = arith.constant 0.000000e+00 : f32
      %187 = vector.broadcast %cst_172 : f32 to vector<16x4xf32>
      %188 = arith.minimumf %184, %187 : vector<16x4xf32>
      %189 = math.exp %188 : vector<16x4xf32>
      %cst_173 = arith.constant 1.000000e+00 : f32
      %190 = vector.broadcast %cst_173 : f32 to vector<16x4xf32>
      %191 = arith.subf %189, %190 : vector<16x4xf32>
      %192 = arith.select %186, %184, %191 : vector<16x4xi1>, vector<16x4xf32>
      %c16 = arith.constant 16 : index
      %c0_174 = arith.constant 0 : index
      %193 = vector.load %arg8[%c16, %c0_174] : memref<32x4xf32, #tpu.memory_space<vmem>>, vector<16x4xf32>
      tpu.vector_store %arg8[%c16, %c0_174], %192 {strides = array<i32>} : memref<32x4xf32, #tpu.memory_space<vmem>>, vector<16x4xf32>,
      %c0_175 = arith.constant 0 : index
      %c0_176 = arith.constant 0 : index
      %194 = vector.load %arg8[%c0_175, %c0_176] : memref<32x4xf32, #tpu.memory_space<vmem>>, vector<32x4xf32>
      %195 = arith.index_cast %arg11 : i32 to index
      %c0_177 = arith.constant 0 : index
      %c0_178 = arith.constant 0 : index
      %196 = vector.load %arg1[%195, %c0_177, %c0_178] : memref<16x32x4xf32, #tpu.memory_space<vmem>>, vector<1x32x4xf32>
      %197 = vector.shape_cast %196 : vector<1x32x4xf32> to vector<32x4xf32>
      %198 = arith.addf %194, %197 : vector<32x4xf32>
      %199 = arith.index_cast %arg11 : i32 to index
      %c0_179 = arith.constant 0 : index
      %c0_180 = arith.constant 0 : index
      %200 = vector.load %arg5[%199, %c0_179, %c0_180] : memref<16x32x4xf32, #tpu.memory_space<vmem>>, vector<1x32x4xf32>
      %201 = vector.shape_cast %200 : vector<1x32x4xf32> to vector<32x4xf32>
      %202 = vector.shape_cast %198 : vector<32x4xf32> to vector<1x32x4xf32>
      tpu.vector_store %arg5[%199, %c0_179, %c0_180], %202 {strides = array<i32>} : memref<16x32x4xf32, #tpu.memory_space<vmem>>, vector<1x32x4xf32>,
    }
    %c15_i32_9 = arith.constant 15 : i32
    %c0_i32 = arith.constant 0 : i32
    %c15_i32_10 = arith.constant 15 : i32
    %8 = arith.addi %c0_i32, %c15_i32_10 : i32
    %c1_i32_11 = arith.constant 1 : i32
    scf.for %arg11 = %c0_i32 to %8 step %c1_i32_11  : i32 {
      %c14_i32 = arith.constant 14 : i32
      %18 = arith.subi %c14_i32, %arg11 : i32
      %c1_i32_31 = arith.constant 1 : i32
      %19 = arith.addi %18, %c1_i32_31 : i32
      %20 = arith.index_cast %19 : i32 to index
      %c0_32 = arith.constant 0 : index
      %c0_33 = arith.constant 0 : index
      %21 = vector.load %arg5[%20, %c0_32, %c0_33] : memref<16x32x4xf32, #tpu.memory_space<vmem>>, vector<1x32x4xf32>
      %22 = vector.shape_cast %21 : vector<1x32x4xf32> to vector<32x4xf32>
      %23 = vector.extract_strided_slice %22 {offsets = [0, 0], sizes = [16, 4], strides = [1, 1]} : vector<32x4xf32> to vector<16x4xf32>
      %c0_34 = arith.constant 0 : index
      %c8 = arith.constant 8 : index
      %c0_35 = arith.constant 0 : index
      %24 = vector.load %arg7[%c0_34, %c8, %c0_35] : memref<2x32x4xf32, #tpu.memory_space<vmem>>, vector<1x16x4xf32>
      %25 = vector.shape_cast %24 : vector<1x16x4xf32> to vector<16x4xf32>
      %26 = vector.shape_cast %23 : vector<16x4xf32> to vector<1x16x4xf32>
      tpu.vector_store %arg7[%c0_34, %c8, %c0_35], %26 {strides = array<i32>} : memref<2x32x4xf32, #tpu.memory_space<vmem>>, vector<1x16x4xf32>,
      %27 = vector.extract_strided_slice %22 {offsets = [16, 0], sizes = [16, 4], strides = [1, 1]} : vector<32x4xf32> to vector<16x4xf32>
      %c1 = arith.constant 1 : index
      %c8_36 = arith.constant 8 : index
      %c0_37 = arith.constant 0 : index
      %28 = vector.load %arg7[%c1, %c8_36, %c0_37] : memref<2x32x4xf32, #tpu.memory_space<vmem>>, vector<1x16x4xf32>
      %29 = vector.shape_cast %28 : vector<1x16x4xf32> to vector<16x4xf32>
      %30 = vector.shape_cast %27 : vector<16x4xf32> to vector<1x16x4xf32>
      tpu.vector_store %arg7[%c1, %c8_36, %c0_37], %30 {strides = array<i32>} : memref<2x32x4xf32, #tpu.memory_space<vmem>>, vector<1x16x4xf32>,
      %cst_38 = arith.constant 0.000000e+00 : f32
      %31 = vector.broadcast %cst_38 : f32 to vector<16x4xf32>
      %c0_39 = arith.constant 0 : index
      %c4 = arith.constant 4 : index
      %c0_40 = arith.constant 0 : index
      %32 = vector.load %arg7[%c0_39, %c4, %c0_40] : memref<2x32x4xf32, #tpu.memory_space<vmem>>, vector<1x16x4xf32>
      %33 = vector.shape_cast %32 : vector<1x16x4xf32> to vector<16x4xf32>
      %c0_41 = arith.constant 0 : index
      %c0_42 = arith.constant 0 : index
      %c0_43 = arith.constant 0 : index
      %34 = vector.load %arg3[%c0_41, %c0_42, %c0_43] : memref<9x4x4xf32, #tpu.memory_space<vmem>>, vector<1x4x4xf32>
      %35 = vector.shape_cast %34 : vector<1x4x4xf32> to vector<4x4xf32>
      %cst_44 = arith.constant dense<0.000000e+00> : vector<16x4xf32>
      %36 = tpu.matmul %33, %35, %cst_44 {dimension_numbers = #tpu.dot_dimension_numbers<[1], [0], [0], [1], [0, 0, 1, 1], [], []>} : vector<16x4xf32>, vector<4x4xf32>, vector<16x4xf32> -> vector<16x4xf32>
      %37 = arith.addf %31, %36 : vector<16x4xf32>
      %c0_45 = arith.constant 0 : index
      %c5 = arith.constant 5 : index
      %c0_46 = arith.constant 0 : index
      %38 = vector.load %arg7[%c0_45, %c5, %c0_46] : memref<2x32x4xf32, #tpu.memory_space<vmem>>, vector<1x16x4xf32>
      %39 = vector.shape_cast %38 : vector<1x16x4xf32> to vector<16x4xf32>
      %c1_47 = arith.constant 1 : index
      %c0_48 = arith.constant 0 : index
      %c0_49 = arith.constant 0 : index
      %40 = vector.load %arg3[%c1_47, %c0_48, %c0_49] : memref<9x4x4xf32, #tpu.memory_space<vmem>>, vector<1x4x4xf32>
      %41 = vector.shape_cast %40 : vector<1x4x4xf32> to vector<4x4xf32>
      %cst_50 = arith.constant dense<0.000000e+00> : vector<16x4xf32>
      %42 = tpu.matmul %39, %41, %cst_50 {dimension_numbers = #tpu.dot_dimension_numbers<[1], [0], [0], [1], [0, 0, 1, 1], [], []>} : vector<16x4xf32>, vector<4x4xf32>, vector<16x4xf32> -> vector<16x4xf32>
      %43 = arith.addf %37, %42 : vector<16x4xf32>
      %c0_51 = arith.constant 0 : index
      %c6 = arith.constant 6 : index
      %c0_52 = arith.constant 0 : index
      %44 = vector.load %arg7[%c0_51, %c6, %c0_52] : memref<2x32x4xf32, #tpu.memory_space<vmem>>, vector<1x16x4xf32>
      %45 = vector.shape_cast %44 : vector<1x16x4xf32> to vector<16x4xf32>
      %c2 = arith.constant 2 : index
      %c0_53 = arith.constant 0 : index
      %c0_54 = arith.constant 0 : index
      %46 = vector.load %arg3[%c2, %c0_53, %c0_54] : memref<9x4x4xf32, #tpu.memory_space<vmem>>, vector<1x4x4xf32>
      %47 = vector.shape_cast %46 : vector<1x4x4xf32> to vector<4x4xf32>
      %cst_55 = arith.constant dense<0.000000e+00> : vector<16x4xf32>
      %48 = tpu.matmul %45, %47, %cst_55 {dimension_numbers = #tpu.dot_dimension_numbers<[1], [0], [0], [1], [0, 0, 1, 1], [], []>} : vector<16x4xf32>, vector<4x4xf32>, vector<16x4xf32> -> vector<16x4xf32>
      %49 = arith.addf %43, %48 : vector<16x4xf32>
      %c0_56 = arith.constant 0 : index
      %c7 = arith.constant 7 : index
      %c0_57 = arith.constant 0 : index
      %50 = vector.load %arg7[%c0_56, %c7, %c0_57] : memref<2x32x4xf32, #tpu.memory_space<vmem>>, vector<1x16x4xf32>
      %51 = vector.shape_cast %50 : vector<1x16x4xf32> to vector<16x4xf32>
      %c3 = arith.constant 3 : index
      %c0_58 = arith.constant 0 : index
      %c0_59 = arith.constant 0 : index
      %52 = vector.load %arg3[%c3, %c0_58, %c0_59] : memref<9x4x4xf32, #tpu.memory_space<vmem>>, vector<1x4x4xf32>
      %53 = vector.shape_cast %52 : vector<1x4x4xf32> to vector<4x4xf32>
      %cst_60 = arith.constant dense<0.000000e+00> : vector<16x4xf32>
      %54 = tpu.matmul %51, %53, %cst_60 {dimension_numbers = #tpu.dot_dimension_numbers<[1], [0], [0], [1], [0, 0, 1, 1], [], []>} : vector<16x4xf32>, vector<4x4xf32>, vector<16x4xf32> -> vector<16x4xf32>
      %55 = arith.addf %49, %54 : vector<16x4xf32>
      %c0_61 = arith.constant 0 : index
      %c8_62 = arith.constant 8 : index
      %c0_63 = arith.constant 0 : index
      %56 = vector.load %arg7[%c0_61, %c8_62, %c0_63] : memref<2x32x4xf32, #tpu.memory_space<vmem>>, vector<1x16x4xf32>
      %57 = vector.shape_cast %56 : vector<1x16x4xf32> to vector<16x4xf32>
      %c4_64 = arith.constant 4 : index
      %c0_65 = arith.constant 0 : index
      %c0_66 = arith.constant 0 : index
      %58 = vector.load %arg3[%c4_64, %c0_65, %c0_66] : memref<9x4x4xf32, #tpu.memory_space<vmem>>, vector<1x4x4xf32>
      %59 = vector.shape_cast %58 : vector<1x4x4xf32> to vector<4x4xf32>
      %cst_67 = arith.constant dense<0.000000e+00> : vector<16x4xf32>
      %60 = tpu.matmul %57, %59, %cst_67 {dimension_numbers = #tpu.dot_dimension_numbers<[1], [0], [0], [1], [0, 0, 1, 1], [], []>} : vector<16x4xf32>, vector<4x4xf32>, vector<16x4xf32> -> vector<16x4xf32>
      %61 = arith.addf %55, %60 : vector<16x4xf32>
      %c0_68 = arith.constant 0 : index
      %c9 = arith.constant 9 : index
      %c0_69 = arith.constant 0 : index
      %62 = vector.load %arg7[%c0_68, %c9, %c0_69] : memref<2x32x4xf32, #tpu.memory_space<vmem>>, vector<1x16x4xf32>
      %63 = vector.shape_cast %62 : vector<1x16x4xf32> to vector<16x4xf32>
      %c5_70 = arith.constant 5 : index
      %c0_71 = arith.constant 0 : index
      %c0_72 = arith.constant 0 : index
      %64 = vector.load %arg3[%c5_70, %c0_71, %c0_72] : memref<9x4x4xf32, #tpu.memory_space<vmem>>, vector<1x4x4xf32>
      %65 = vector.shape_cast %64 : vector<1x4x4xf32> to vector<4x4xf32>
      %cst_73 = arith.constant dense<0.000000e+00> : vector<16x4xf32>
      %66 = tpu.matmul %63, %65, %cst_73 {dimension_numbers = #tpu.dot_dimension_numbers<[1], [0], [0], [1], [0, 0, 1, 1], [], []>} : vector<16x4xf32>, vector<4x4xf32>, vector<16x4xf32> -> vector<16x4xf32>
      %67 = arith.addf %61, %66 : vector<16x4xf32>
      %c0_74 = arith.constant 0 : index
      %c10 = arith.constant 10 : index
      %c0_75 = arith.constant 0 : index
      %68 = vector.load %arg7[%c0_74, %c10, %c0_75] : memref<2x32x4xf32, #tpu.memory_space<vmem>>, vector<1x16x4xf32>
      %69 = vector.shape_cast %68 : vector<1x16x4xf32> to vector<16x4xf32>
      %c6_76 = arith.constant 6 : index
      %c0_77 = arith.constant 0 : index
      %c0_78 = arith.constant 0 : index
      %70 = vector.load %arg3[%c6_76, %c0_77, %c0_78] : memref<9x4x4xf32, #tpu.memory_space<vmem>>, vector<1x4x4xf32>
      %71 = vector.shape_cast %70 : vector<1x4x4xf32> to vector<4x4xf32>
      %cst_79 = arith.constant dense<0.000000e+00> : vector<16x4xf32>
      %72 = tpu.matmul %69, %71, %cst_79 {dimension_numbers = #tpu.dot_dimension_numbers<[1], [0], [0], [1], [0, 0, 1, 1], [], []>} : vector<16x4xf32>, vector<4x4xf32>, vector<16x4xf32> -> vector<16x4xf32>
      %73 = arith.addf %67, %72 : vector<16x4xf32>
      %c0_80 = arith.constant 0 : index
      %c11 = arith.constant 11 : index
      %c0_81 = arith.constant 0 : index
      %74 = vector.load %arg7[%c0_80, %c11, %c0_81] : memref<2x32x4xf32, #tpu.memory_space<vmem>>, vector<1x16x4xf32>
      %75 = vector.shape_cast %74 : vector<1x16x4xf32> to vector<16x4xf32>
      %c7_82 = arith.constant 7 : index
      %c0_83 = arith.constant 0 : index
      %c0_84 = arith.constant 0 : index
      %76 = vector.load %arg3[%c7_82, %c0_83, %c0_84] : memref<9x4x4xf32, #tpu.memory_space<vmem>>, vector<1x4x4xf32>
      %77 = vector.shape_cast %76 : vector<1x4x4xf32> to vector<4x4xf32>
      %cst_85 = arith.constant dense<0.000000e+00> : vector<16x4xf32>
      %78 = tpu.matmul %75, %77, %cst_85 {dimension_numbers = #tpu.dot_dimension_numbers<[1], [0], [0], [1], [0, 0, 1, 1], [], []>} : vector<16x4xf32>, vector<4x4xf32>, vector<16x4xf32> -> vector<16x4xf32>
      %79 = arith.addf %73, %78 : vector<16x4xf32>
      %c0_86 = arith.constant 0 : index
      %c12 = arith.constant 12 : index
      %c0_87 = arith.constant 0 : index
      %80 = vector.load %arg7[%c0_86, %c12, %c0_87] : memref<2x32x4xf32, #tpu.memory_space<vmem>>, vector<1x16x4xf32>
      %81 = vector.shape_cast %80 : vector<1x16x4xf32> to vector<16x4xf32>
      %c8_88 = arith.constant 8 : index
      %c0_89 = arith.constant 0 : index
      %c0_90 = arith.constant 0 : index
      %82 = vector.load %arg3[%c8_88, %c0_89, %c0_90] : memref<9x4x4xf32, #tpu.memory_space<vmem>>, vector<1x4x4xf32>
      %83 = vector.shape_cast %82 : vector<1x4x4xf32> to vector<4x4xf32>
      %cst_91 = arith.constant dense<0.000000e+00> : vector<16x4xf32>
      %84 = tpu.matmul %81, %83, %cst_91 {dimension_numbers = #tpu.dot_dimension_numbers<[1], [0], [0], [1], [0, 0, 1, 1], [], []>} : vector<16x4xf32>, vector<4x4xf32>, vector<16x4xf32> -> vector<16x4xf32>
      %85 = arith.addf %79, %84 : vector<16x4xf32>
      %cst_92 = arith.constant dense<0.000000e+00> : vector<4xf32>
      %86 = vector.multi_reduction <add>, %85, %cst_92 [0] : vector<16x4xf32> to vector<4xf32>
      %87 = vector.shape_cast %86 : vector<4xf32> to vector<1x4xf32>
      %cst_93 = arith.constant 1.600000e+01 : f32
      %88 = vector.broadcast %cst_93 : f32 to vector<1x4xf32>
      %89 = arith.divf %87, %88 : vector<1x4xf32>
      %90 = vector.broadcast %89 : vector<1x4xf32> to vector<16x4xf32>
      %91 = arith.subf %85, %90 : vector<16x4xf32>
      %92 = arith.mulf %91, %91 : vector<16x4xf32>
      %cst_94 = arith.constant dense<0.000000e+00> : vector<4xf32>
      %93 = vector.multi_reduction <add>, %92, %cst_94 [0] : vector<16x4xf32> to vector<4xf32>
      %94 = vector.shape_cast %93 : vector<4xf32> to vector<1x4xf32>
      %cst_95 = arith.constant 1.600000e+01 : f32
      %95 = vector.broadcast %cst_95 : f32 to vector<1x4xf32>
      %96 = arith.divf %94, %95 : vector<1x4xf32>
      %97 = vector.broadcast %89 : vector<1x4xf32> to vector<16x4xf32>
      %98 = arith.subf %85, %97 : vector<16x4xf32>
      %cst_96 = arith.constant 9.99999974E-6 : f32
      %99 = vector.broadcast %cst_96 : f32 to vector<1x4xf32>
      %100 = arith.addf %96, %99 : vector<1x4xf32>
      %101 = math.rsqrt %100 : vector<1x4xf32>
      %102 = vector.broadcast %101 : vector<1x4xf32> to vector<16x4xf32>
      %103 = arith.mulf %98, %102 : vector<16x4xf32>
      %cst_97 = arith.constant 0.000000e+00 : f32
      %104 = vector.broadcast %cst_97 : f32 to vector<16x4xf32>
      %105 = arith.cmpf ogt, %103, %104 : vector<16x4xf32>
      %cst_98 = arith.constant 0.000000e+00 : f32
      %106 = vector.broadcast %cst_98 : f32 to vector<16x4xf32>
      %107 = arith.minimumf %103, %106 : vector<16x4xf32>
      %108 = math.exp %107 : vector<16x4xf32>
      %cst_99 = arith.constant 1.000000e+00 : f32
      %109 = vector.broadcast %cst_99 : f32 to vector<16x4xf32>
      %110 = arith.subf %108, %109 : vector<16x4xf32>
      %111 = arith.select %105, %103, %110 : vector<16x4xi1>, vector<16x4xf32>
      %c0_100 = arith.constant 0 : index
      %c0_101 = arith.constant 0 : index
      %112 = vector.load %arg8[%c0_100, %c0_101] : memref<32x4xf32, #tpu.memory_space<vmem>>, vector<16x4xf32>
      tpu.vector_store %arg8[%c0_100, %c0_101], %111 {strides = array<i32>} : memref<32x4xf32, #tpu.memory_space<vmem>>, vector<16x4xf32>,
      %cst_102 = arith.constant 0.000000e+00 : f32
      %113 = vector.broadcast %cst_102 : f32 to vector<16x4xf32>
      %c1_103 = arith.constant 1 : index
      %c4_104 = arith.constant 4 : index
      %c0_105 = arith.constant 0 : index
      %114 = vector.load %arg7[%c1_103, %c4_104, %c0_105] : memref<2x32x4xf32, #tpu.memory_space<vmem>>, vector<1x16x4xf32>
      %115 = vector.shape_cast %114 : vector<1x16x4xf32> to vector<16x4xf32>
      %c0_106 = arith.constant 0 : index
      %c0_107 = arith.constant 0 : index
      %c0_108 = arith.constant 0 : index
      %116 = vector.load %arg3[%c0_106, %c0_107, %c0_108] : memref<9x4x4xf32, #tpu.memory_space<vmem>>, vector<1x4x4xf32>
      %117 = vector.shape_cast %116 : vector<1x4x4xf32> to vector<4x4xf32>
      %cst_109 = arith.constant dense<0.000000e+00> : vector<16x4xf32>
      %118 = tpu.matmul %115, %117, %cst_109 {dimension_numbers = #tpu.dot_dimension_numbers<[1], [0], [0], [1], [0, 0, 1, 1], [], []>} : vector<16x4xf32>, vector<4x4xf32>, vector<16x4xf32> -> vector<16x4xf32>
      %119 = arith.addf %113, %118 : vector<16x4xf32>
      %c1_110 = arith.constant 1 : index
      %c5_111 = arith.constant 5 : index
      %c0_112 = arith.constant 0 : index
      %120 = vector.load %arg7[%c1_110, %c5_111, %c0_112] : memref<2x32x4xf32, #tpu.memory_space<vmem>>, vector<1x16x4xf32>
      %121 = vector.shape_cast %120 : vector<1x16x4xf32> to vector<16x4xf32>
      %c1_113 = arith.constant 1 : index
      %c0_114 = arith.constant 0 : index
      %c0_115 = arith.constant 0 : index
      %122 = vector.load %arg3[%c1_113, %c0_114, %c0_115] : memref<9x4x4xf32, #tpu.memory_space<vmem>>, vector<1x4x4xf32>
      %123 = vector.shape_cast %122 : vector<1x4x4xf32> to vector<4x4xf32>
      %cst_116 = arith.constant dense<0.000000e+00> : vector<16x4xf32>
      %124 = tpu.matmul %121, %123, %cst_116 {dimension_numbers = #tpu.dot_dimension_numbers<[1], [0], [0], [1], [0, 0, 1, 1], [], []>} : vector<16x4xf32>, vector<4x4xf32>, vector<16x4xf32> -> vector<16x4xf32>
      %125 = arith.addf %119, %124 : vector<16x4xf32>
      %c1_117 = arith.constant 1 : index
      %c6_118 = arith.constant 6 : index
      %c0_119 = arith.constant 0 : index
      %126 = vector.load %arg7[%c1_117, %c6_118, %c0_119] : memref<2x32x4xf32, #tpu.memory_space<vmem>>, vector<1x16x4xf32>
      %127 = vector.shape_cast %126 : vector<1x16x4xf32> to vector<16x4xf32>
      %c2_120 = arith.constant 2 : index
      %c0_121 = arith.constant 0 : index
      %c0_122 = arith.constant 0 : index
      %128 = vector.load %arg3[%c2_120, %c0_121, %c0_122] : memref<9x4x4xf32, #tpu.memory_space<vmem>>, vector<1x4x4xf32>
      %129 = vector.shape_cast %128 : vector<1x4x4xf32> to vector<4x4xf32>
      %cst_123 = arith.constant dense<0.000000e+00> : vector<16x4xf32>
      %130 = tpu.matmul %127, %129, %cst_123 {dimension_numbers = #tpu.dot_dimension_numbers<[1], [0], [0], [1], [0, 0, 1, 1], [], []>} : vector<16x4xf32>, vector<4x4xf32>, vector<16x4xf32> -> vector<16x4xf32>
      %131 = arith.addf %125, %130 : vector<16x4xf32>
      %c1_124 = arith.constant 1 : index
      %c7_125 = arith.constant 7 : index
      %c0_126 = arith.constant 0 : index
      %132 = vector.load %arg7[%c1_124, %c7_125, %c0_126] : memref<2x32x4xf32, #tpu.memory_space<vmem>>, vector<1x16x4xf32>
      %133 = vector.shape_cast %132 : vector<1x16x4xf32> to vector<16x4xf32>
      %c3_127 = arith.constant 3 : index
      %c0_128 = arith.constant 0 : index
      %c0_129 = arith.constant 0 : index
      %134 = vector.load %arg3[%c3_127, %c0_128, %c0_129] : memref<9x4x4xf32, #tpu.memory_space<vmem>>, vector<1x4x4xf32>
      %135 = vector.shape_cast %134 : vector<1x4x4xf32> to vector<4x4xf32>
      %cst_130 = arith.constant dense<0.000000e+00> : vector<16x4xf32>
      %136 = tpu.matmul %133, %135, %cst_130 {dimension_numbers = #tpu.dot_dimension_numbers<[1], [0], [0], [1], [0, 0, 1, 1], [], []>} : vector<16x4xf32>, vector<4x4xf32>, vector<16x4xf32> -> vector<16x4xf32>
      %137 = arith.addf %131, %136 : vector<16x4xf32>
      %c1_131 = arith.constant 1 : index
      %c8_132 = arith.constant 8 : index
      %c0_133 = arith.constant 0 : index
      %138 = vector.load %arg7[%c1_131, %c8_132, %c0_133] : memref<2x32x4xf32, #tpu.memory_space<vmem>>, vector<1x16x4xf32>
      %139 = vector.shape_cast %138 : vector<1x16x4xf32> to vector<16x4xf32>
      %c4_134 = arith.constant 4 : index
      %c0_135 = arith.constant 0 : index
      %c0_136 = arith.constant 0 : index
      %140 = vector.load %arg3[%c4_134, %c0_135, %c0_136] : memref<9x4x4xf32, #tpu.memory_space<vmem>>, vector<1x4x4xf32>
      %141 = vector.shape_cast %140 : vector<1x4x4xf32> to vector<4x4xf32>
      %cst_137 = arith.constant dense<0.000000e+00> : vector<16x4xf32>
      %142 = tpu.matmul %139, %141, %cst_137 {dimension_numbers = #tpu.dot_dimension_numbers<[1], [0], [0], [1], [0, 0, 1, 1], [], []>} : vector<16x4xf32>, vector<4x4xf32>, vector<16x4xf32> -> vector<16x4xf32>
      %143 = arith.addf %137, %142 : vector<16x4xf32>
      %c1_138 = arith.constant 1 : index
      %c9_139 = arith.constant 9 : index
      %c0_140 = arith.constant 0 : index
      %144 = vector.load %arg7[%c1_138, %c9_139, %c0_140] : memref<2x32x4xf32, #tpu.memory_space<vmem>>, vector<1x16x4xf32>
      %145 = vector.shape_cast %144 : vector<1x16x4xf32> to vector<16x4xf32>
      %c5_141 = arith.constant 5 : index
      %c0_142 = arith.constant 0 : index
      %c0_143 = arith.constant 0 : index
      %146 = vector.load %arg3[%c5_141, %c0_142, %c0_143] : memref<9x4x4xf32, #tpu.memory_space<vmem>>, vector<1x4x4xf32>
      %147 = vector.shape_cast %146 : vector<1x4x4xf32> to vector<4x4xf32>
      %cst_144 = arith.constant dense<0.000000e+00> : vector<16x4xf32>
      %148 = tpu.matmul %145, %147, %cst_144 {dimension_numbers = #tpu.dot_dimension_numbers<[1], [0], [0], [1], [0, 0, 1, 1], [], []>} : vector<16x4xf32>, vector<4x4xf32>, vector<16x4xf32> -> vector<16x4xf32>
      %149 = arith.addf %143, %148 : vector<16x4xf32>
      %c1_145 = arith.constant 1 : index
      %c10_146 = arith.constant 10 : index
      %c0_147 = arith.constant 0 : index
      %150 = vector.load %arg7[%c1_145, %c10_146, %c0_147] : memref<2x32x4xf32, #tpu.memory_space<vmem>>, vector<1x16x4xf32>
      %151 = vector.shape_cast %150 : vector<1x16x4xf32> to vector<16x4xf32>
      %c6_148 = arith.constant 6 : index
      %c0_149 = arith.constant 0 : index
      %c0_150 = arith.constant 0 : index
      %152 = vector.load %arg3[%c6_148, %c0_149, %c0_150] : memref<9x4x4xf32, #tpu.memory_space<vmem>>, vector<1x4x4xf32>
      %153 = vector.shape_cast %152 : vector<1x4x4xf32> to vector<4x4xf32>
      %cst_151 = arith.constant dense<0.000000e+00> : vector<16x4xf32>
      %154 = tpu.matmul %151, %153, %cst_151 {dimension_numbers = #tpu.dot_dimension_numbers<[1], [0], [0], [1], [0, 0, 1, 1], [], []>} : vector<16x4xf32>, vector<4x4xf32>, vector<16x4xf32> -> vector<16x4xf32>
      %155 = arith.addf %149, %154 : vector<16x4xf32>
      %c1_152 = arith.constant 1 : index
      %c11_153 = arith.constant 11 : index
      %c0_154 = arith.constant 0 : index
      %156 = vector.load %arg7[%c1_152, %c11_153, %c0_154] : memref<2x32x4xf32, #tpu.memory_space<vmem>>, vector<1x16x4xf32>
      %157 = vector.shape_cast %156 : vector<1x16x4xf32> to vector<16x4xf32>
      %c7_155 = arith.constant 7 : index
      %c0_156 = arith.constant 0 : index
      %c0_157 = arith.constant 0 : index
      %158 = vector.load %arg3[%c7_155, %c0_156, %c0_157] : memref<9x4x4xf32, #tpu.memory_space<vmem>>, vector<1x4x4xf32>
      %159 = vector.shape_cast %158 : vector<1x4x4xf32> to vector<4x4xf32>
      %cst_158 = arith.constant dense<0.000000e+00> : vector<16x4xf32>
      %160 = tpu.matmul %157, %159, %cst_158 {dimension_numbers = #tpu.dot_dimension_numbers<[1], [0], [0], [1], [0, 0, 1, 1], [], []>} : vector<16x4xf32>, vector<4x4xf32>, vector<16x4xf32> -> vector<16x4xf32>
      %161 = arith.addf %155, %160 : vector<16x4xf32>
      %c1_159 = arith.constant 1 : index
      %c12_160 = arith.constant 12 : index
      %c0_161 = arith.constant 0 : index
      %162 = vector.load %arg7[%c1_159, %c12_160, %c0_161] : memref<2x32x4xf32, #tpu.memory_space<vmem>>, vector<1x16x4xf32>
      %163 = vector.shape_cast %162 : vector<1x16x4xf32> to vector<16x4xf32>
      %c8_162 = arith.constant 8 : index
      %c0_163 = arith.constant 0 : index
      %c0_164 = arith.constant 0 : index
      %164 = vector.load %arg3[%c8_162, %c0_163, %c0_164] : memref<9x4x4xf32, #tpu.memory_space<vmem>>, vector<1x4x4xf32>
      %165 = vector.shape_cast %164 : vector<1x4x4xf32> to vector<4x4xf32>
      %cst_165 = arith.constant dense<0.000000e+00> : vector<16x4xf32>
      %166 = tpu.matmul %163, %165, %cst_165 {dimension_numbers = #tpu.dot_dimension_numbers<[1], [0], [0], [1], [0, 0, 1, 1], [], []>} : vector<16x4xf32>, vector<4x4xf32>, vector<16x4xf32> -> vector<16x4xf32>
      %167 = arith.addf %161, %166 : vector<16x4xf32>
      %cst_166 = arith.constant dense<0.000000e+00> : vector<4xf32>
      %168 = vector.multi_reduction <add>, %167, %cst_166 [0] : vector<16x4xf32> to vector<4xf32>
      %169 = vector.shape_cast %168 : vector<4xf32> to vector<1x4xf32>
      %cst_167 = arith.constant 1.600000e+01 : f32
      %170 = vector.broadcast %cst_167 : f32 to vector<1x4xf32>
      %171 = arith.divf %169, %170 : vector<1x4xf32>
      %172 = vector.broadcast %171 : vector<1x4xf32> to vector<16x4xf32>
      %173 = arith.subf %167, %172 : vector<16x4xf32>
      %174 = arith.mulf %173, %173 : vector<16x4xf32>
      %cst_168 = arith.constant dense<0.000000e+00> : vector<4xf32>
      %175 = vector.multi_reduction <add>, %174, %cst_168 [0] : vector<16x4xf32> to vector<4xf32>
      %176 = vector.shape_cast %175 : vector<4xf32> to vector<1x4xf32>
      %cst_169 = arith.constant 1.600000e+01 : f32
      %177 = vector.broadcast %cst_169 : f32 to vector<1x4xf32>
      %178 = arith.divf %176, %177 : vector<1x4xf32>
      %179 = vector.broadcast %171 : vector<1x4xf32> to vector<16x4xf32>
      %180 = arith.subf %167, %179 : vector<16x4xf32>
      %cst_170 = arith.constant 9.99999974E-6 : f32
      %181 = vector.broadcast %cst_170 : f32 to vector<1x4xf32>
      %182 = arith.addf %178, %181 : vector<1x4xf32>
      %183 = math.rsqrt %182 : vector<1x4xf32>
      %184 = vector.broadcast %183 : vector<1x4xf32> to vector<16x4xf32>
      %185 = arith.mulf %180, %184 : vector<16x4xf32>
      %cst_171 = arith.constant 0.000000e+00 : f32
      %186 = vector.broadcast %cst_171 : f32 to vector<16x4xf32>
      %187 = arith.cmpf ogt, %185, %186 : vector<16x4xf32>
      %cst_172 = arith.constant 0.000000e+00 : f32
      %188 = vector.broadcast %cst_172 : f32 to vector<16x4xf32>
      %189 = arith.minimumf %185, %188 : vector<16x4xf32>
      %190 = math.exp %189 : vector<16x4xf32>
      %cst_173 = arith.constant 1.000000e+00 : f32
      %191 = vector.broadcast %cst_173 : f32 to vector<16x4xf32>
      %192 = arith.subf %190, %191 : vector<16x4xf32>
      %193 = arith.select %187, %185, %192 : vector<16x4xi1>, vector<16x4xf32>
      %c16 = arith.constant 16 : index
      %c0_174 = arith.constant 0 : index
      %194 = vector.load %arg8[%c16, %c0_174] : memref<32x4xf32, #tpu.memory_space<vmem>>, vector<16x4xf32>
      tpu.vector_store %arg8[%c16, %c0_174], %193 {strides = array<i32>} : memref<32x4xf32, #tpu.memory_space<vmem>>, vector<16x4xf32>,
      %c0_175 = arith.constant 0 : index
      %c0_176 = arith.constant 0 : index
      %195 = vector.load %arg8[%c0_175, %c0_176] : memref<32x4xf32, #tpu.memory_space<vmem>>, vector<32x4xf32>
      %196 = arith.index_cast %18 : i32 to index
      %c0_177 = arith.constant 0 : index
      %c0_178 = arith.constant 0 : index
      %197 = vector.load %arg5[%196, %c0_177, %c0_178] : memref<16x32x4xf32, #tpu.memory_space<vmem>>, vector<1x32x4xf32>
      %198 = vector.shape_cast %197 : vector<1x32x4xf32> to vector<32x4xf32>
      %199 = arith.addf %195, %198 : vector<32x4xf32>
      %200 = arith.index_cast %18 : i32 to index
      %c0_179 = arith.constant 0 : index
      %c0_180 = arith.constant 0 : index
      %201 = vector.load %arg5[%200, %c0_179, %c0_180] : memref<16x32x4xf32, #tpu.memory_space<vmem>>, vector<1x32x4xf32>
      %202 = vector.shape_cast %201 : vector<1x32x4xf32> to vector<32x4xf32>
      %203 = vector.shape_cast %199 : vector<32x4xf32> to vector<1x32x4xf32>
      tpu.vector_store %arg5[%200, %c0_179, %c0_180], %203 {strides = array<i32>} : memref<16x32x4xf32, #tpu.memory_space<vmem>>, vector<1x32x4xf32>,
    }
    %c15_i32_12 = arith.constant 15 : i32
    %cst_13 = arith.constant 0.000000e+00 : f32
    %9 = vector.broadcast %cst_13 : f32 to vector<2x32x4xf32>
    %c0_14 = arith.constant 0 : index
    %c0_15 = arith.constant 0 : index
    %c0_16 = arith.constant 0 : index
    %10 = vector.load %arg9[%c0_14, %c0_15, %c0_16] : memref<2x32x4xf32, #tpu.memory_space<vmem>>, vector<2x32x4xf32>
    tpu.vector_store %arg9[%c0_14, %c0_15, %c0_16], %9 {strides = array<i32>} : memref<2x32x4xf32, #tpu.memory_space<vmem>>, vector<2x32x4xf32>,
    %c0_17 = arith.constant 0 : index
    %c0_18 = arith.constant 0 : index
    %c0_19 = arith.constant 0 : index
    %11 = vector.load %arg2[%c0_17, %c0_18, %c0_19] : memref<16x32x4xf32, #tpu.memory_space<vmem>>, vector<1x32x4xf32>
    %12 = vector.shape_cast %11 : vector<1x32x4xf32> to vector<32x4xf32>
    %c0_20 = arith.constant 0 : index
    %c0_21 = arith.constant 0 : index
    %c0_22 = arith.constant 0 : index
    %13 = vector.load %arg6[%c0_20, %c0_21, %c0_22] : memref<16x32x4xf32, #tpu.memory_space<vmem>>, vector<1x32x4xf32>
    %14 = vector.shape_cast %13 : vector<1x32x4xf32> to vector<32x4xf32>
    %15 = vector.shape_cast %12 : vector<32x4xf32> to vector<1x32x4xf32>
    tpu.vector_store %arg6[%c0_20, %c0_21, %c0_22], %15 {strides = array<i32>} : memref<16x32x4xf32, #tpu.memory_space<vmem>>, vector<1x32x4xf32>,
    %c1_i32_23 = arith.constant 1 : i32
    %c15_i32_24 = arith.constant 15 : i32
    %16 = arith.addi %c1_i32_23, %c15_i32_24 : i32
    %c1_i32_25 = arith.constant 1 : i32
    scf.for %arg11 = %c1_i32_23 to %16 step %c1_i32_25  : i32 {
      %c1_i32_31 = arith.constant 1 : i32
      %18 = arith.subi %arg11, %c1_i32_31 : i32
      %19 = arith.index_cast %18 : i32 to index
      %c0_32 = arith.constant 0 : index
      %c0_33 = arith.constant 0 : index
      %20 = vector.load %arg6[%19, %c0_32, %c0_33] : memref<16x32x4xf32, #tpu.memory_space<vmem>>, vector<1x32x4xf32>
      %21 = vector.shape_cast %20 : vector<1x32x4xf32> to vector<32x4xf32>
      %22 = vector.extract_strided_slice %21 {offsets = [0, 0], sizes = [16, 4], strides = [1, 1]} : vector<32x4xf32> to vector<16x4xf32>
      %c0_34 = arith.constant 0 : index
      %c8 = arith.constant 8 : index
      %c0_35 = arith.constant 0 : index
      %23 = vector.load %arg9[%c0_34, %c8, %c0_35] : memref<2x32x4xf32, #tpu.memory_space<vmem>>, vector<1x16x4xf32>
      %24 = vector.shape_cast %23 : vector<1x16x4xf32> to vector<16x4xf32>
      %25 = vector.shape_cast %22 : vector<16x4xf32> to vector<1x16x4xf32>
      tpu.vector_store %arg9[%c0_34, %c8, %c0_35], %25 {strides = array<i32>} : memref<2x32x4xf32, #tpu.memory_space<vmem>>, vector<1x16x4xf32>,
      %26 = vector.extract_strided_slice %21 {offsets = [16, 0], sizes = [16, 4], strides = [1, 1]} : vector<32x4xf32> to vector<16x4xf32>
      %c1 = arith.constant 1 : index
      %c8_36 = arith.constant 8 : index
      %c0_37 = arith.constant 0 : index
      %27 = vector.load %arg9[%c1, %c8_36, %c0_37] : memref<2x32x4xf32, #tpu.memory_space<vmem>>, vector<1x16x4xf32>
      %28 = vector.shape_cast %27 : vector<1x16x4xf32> to vector<16x4xf32>
      %29 = vector.shape_cast %26 : vector<16x4xf32> to vector<1x16x4xf32>
      tpu.vector_store %arg9[%c1, %c8_36, %c0_37], %29 {strides = array<i32>} : memref<2x32x4xf32, #tpu.memory_space<vmem>>, vector<1x16x4xf32>,
      %cst_38 = arith.constant 0.000000e+00 : f32
      %30 = vector.broadcast %cst_38 : f32 to vector<16x4xf32>
      %c0_39 = arith.constant 0 : index
      %c4 = arith.constant 4 : index
      %c0_40 = arith.constant 0 : index
      %31 = vector.load %arg9[%c0_39, %c4, %c0_40] : memref<2x32x4xf32, #tpu.memory_space<vmem>>, vector<1x16x4xf32>
      %32 = vector.shape_cast %31 : vector<1x16x4xf32> to vector<16x4xf32>
      %c0_41 = arith.constant 0 : index
      %c0_42 = arith.constant 0 : index
      %c0_43 = arith.constant 0 : index
      %33 = vector.load %arg4[%c0_41, %c0_42, %c0_43] : memref<9x4x4xf32, #tpu.memory_space<vmem>>, vector<1x4x4xf32>
      %34 = vector.shape_cast %33 : vector<1x4x4xf32> to vector<4x4xf32>
      %cst_44 = arith.constant dense<0.000000e+00> : vector<16x4xf32>
      %35 = tpu.matmul %32, %34, %cst_44 {dimension_numbers = #tpu.dot_dimension_numbers<[1], [0], [0], [1], [0, 0, 1, 1], [], []>} : vector<16x4xf32>, vector<4x4xf32>, vector<16x4xf32> -> vector<16x4xf32>
      %36 = arith.addf %30, %35 : vector<16x4xf32>
      %c0_45 = arith.constant 0 : index
      %c5 = arith.constant 5 : index
      %c0_46 = arith.constant 0 : index
      %37 = vector.load %arg9[%c0_45, %c5, %c0_46] : memref<2x32x4xf32, #tpu.memory_space<vmem>>, vector<1x16x4xf32>
      %38 = vector.shape_cast %37 : vector<1x16x4xf32> to vector<16x4xf32>
      %c1_47 = arith.constant 1 : index
      %c0_48 = arith.constant 0 : index
      %c0_49 = arith.constant 0 : index
      %39 = vector.load %arg4[%c1_47, %c0_48, %c0_49] : memref<9x4x4xf32, #tpu.memory_space<vmem>>, vector<1x4x4xf32>
      %40 = vector.shape_cast %39 : vector<1x4x4xf32> to vector<4x4xf32>
      %cst_50 = arith.constant dense<0.000000e+00> : vector<16x4xf32>
      %41 = tpu.matmul %38, %40, %cst_50 {dimension_numbers = #tpu.dot_dimension_numbers<[1], [0], [0], [1], [0, 0, 1, 1], [], []>} : vector<16x4xf32>, vector<4x4xf32>, vector<16x4xf32> -> vector<16x4xf32>
      %42 = arith.addf %36, %41 : vector<16x4xf32>
      %c0_51 = arith.constant 0 : index
      %c6 = arith.constant 6 : index
      %c0_52 = arith.constant 0 : index
      %43 = vector.load %arg9[%c0_51, %c6, %c0_52] : memref<2x32x4xf32, #tpu.memory_space<vmem>>, vector<1x16x4xf32>
      %44 = vector.shape_cast %43 : vector<1x16x4xf32> to vector<16x4xf32>
      %c2 = arith.constant 2 : index
      %c0_53 = arith.constant 0 : index
      %c0_54 = arith.constant 0 : index
      %45 = vector.load %arg4[%c2, %c0_53, %c0_54] : memref<9x4x4xf32, #tpu.memory_space<vmem>>, vector<1x4x4xf32>
      %46 = vector.shape_cast %45 : vector<1x4x4xf32> to vector<4x4xf32>
      %cst_55 = arith.constant dense<0.000000e+00> : vector<16x4xf32>
      %47 = tpu.matmul %44, %46, %cst_55 {dimension_numbers = #tpu.dot_dimension_numbers<[1], [0], [0], [1], [0, 0, 1, 1], [], []>} : vector<16x4xf32>, vector<4x4xf32>, vector<16x4xf32> -> vector<16x4xf32>
      %48 = arith.addf %42, %47 : vector<16x4xf32>
      %c0_56 = arith.constant 0 : index
      %c7 = arith.constant 7 : index
      %c0_57 = arith.constant 0 : index
      %49 = vector.load %arg9[%c0_56, %c7, %c0_57] : memref<2x32x4xf32, #tpu.memory_space<vmem>>, vector<1x16x4xf32>
      %50 = vector.shape_cast %49 : vector<1x16x4xf32> to vector<16x4xf32>
      %c3 = arith.constant 3 : index
      %c0_58 = arith.constant 0 : index
      %c0_59 = arith.constant 0 : index
      %51 = vector.load %arg4[%c3, %c0_58, %c0_59] : memref<9x4x4xf32, #tpu.memory_space<vmem>>, vector<1x4x4xf32>
      %52 = vector.shape_cast %51 : vector<1x4x4xf32> to vector<4x4xf32>
      %cst_60 = arith.constant dense<0.000000e+00> : vector<16x4xf32>
      %53 = tpu.matmul %50, %52, %cst_60 {dimension_numbers = #tpu.dot_dimension_numbers<[1], [0], [0], [1], [0, 0, 1, 1], [], []>} : vector<16x4xf32>, vector<4x4xf32>, vector<16x4xf32> -> vector<16x4xf32>
      %54 = arith.addf %48, %53 : vector<16x4xf32>
      %c0_61 = arith.constant 0 : index
      %c8_62 = arith.constant 8 : index
      %c0_63 = arith.constant 0 : index
      %55 = vector.load %arg9[%c0_61, %c8_62, %c0_63] : memref<2x32x4xf32, #tpu.memory_space<vmem>>, vector<1x16x4xf32>
      %56 = vector.shape_cast %55 : vector<1x16x4xf32> to vector<16x4xf32>
      %c4_64 = arith.constant 4 : index
      %c0_65 = arith.constant 0 : index
      %c0_66 = arith.constant 0 : index
      %57 = vector.load %arg4[%c4_64, %c0_65, %c0_66] : memref<9x4x4xf32, #tpu.memory_space<vmem>>, vector<1x4x4xf32>
      %58 = vector.shape_cast %57 : vector<1x4x4xf32> to vector<4x4xf32>
      %cst_67 = arith.constant dense<0.000000e+00> : vector<16x4xf32>
      %59 = tpu.matmul %56, %58, %cst_67 {dimension_numbers = #tpu.dot_dimension_numbers<[1], [0], [0], [1], [0, 0, 1, 1], [], []>} : vector<16x4xf32>, vector<4x4xf32>, vector<16x4xf32> -> vector<16x4xf32>
      %60 = arith.addf %54, %59 : vector<16x4xf32>
      %c0_68 = arith.constant 0 : index
      %c9 = arith.constant 9 : index
      %c0_69 = arith.constant 0 : index
      %61 = vector.load %arg9[%c0_68, %c9, %c0_69] : memref<2x32x4xf32, #tpu.memory_space<vmem>>, vector<1x16x4xf32>
      %62 = vector.shape_cast %61 : vector<1x16x4xf32> to vector<16x4xf32>
      %c5_70 = arith.constant 5 : index
      %c0_71 = arith.constant 0 : index
      %c0_72 = arith.constant 0 : index
      %63 = vector.load %arg4[%c5_70, %c0_71, %c0_72] : memref<9x4x4xf32, #tpu.memory_space<vmem>>, vector<1x4x4xf32>
      %64 = vector.shape_cast %63 : vector<1x4x4xf32> to vector<4x4xf32>
      %cst_73 = arith.constant dense<0.000000e+00> : vector<16x4xf32>
      %65 = tpu.matmul %62, %64, %cst_73 {dimension_numbers = #tpu.dot_dimension_numbers<[1], [0], [0], [1], [0, 0, 1, 1], [], []>} : vector<16x4xf32>, vector<4x4xf32>, vector<16x4xf32> -> vector<16x4xf32>
      %66 = arith.addf %60, %65 : vector<16x4xf32>
      %c0_74 = arith.constant 0 : index
      %c10 = arith.constant 10 : index
      %c0_75 = arith.constant 0 : index
      %67 = vector.load %arg9[%c0_74, %c10, %c0_75] : memref<2x32x4xf32, #tpu.memory_space<vmem>>, vector<1x16x4xf32>
      %68 = vector.shape_cast %67 : vector<1x16x4xf32> to vector<16x4xf32>
      %c6_76 = arith.constant 6 : index
      %c0_77 = arith.constant 0 : index
      %c0_78 = arith.constant 0 : index
      %69 = vector.load %arg4[%c6_76, %c0_77, %c0_78] : memref<9x4x4xf32, #tpu.memory_space<vmem>>, vector<1x4x4xf32>
      %70 = vector.shape_cast %69 : vector<1x4x4xf32> to vector<4x4xf32>
      %cst_79 = arith.constant dense<0.000000e+00> : vector<16x4xf32>
      %71 = tpu.matmul %68, %70, %cst_79 {dimension_numbers = #tpu.dot_dimension_numbers<[1], [0], [0], [1], [0, 0, 1, 1], [], []>} : vector<16x4xf32>, vector<4x4xf32>, vector<16x4xf32> -> vector<16x4xf32>
      %72 = arith.addf %66, %71 : vector<16x4xf32>
      %c0_80 = arith.constant 0 : index
      %c11 = arith.constant 11 : index
      %c0_81 = arith.constant 0 : index
      %73 = vector.load %arg9[%c0_80, %c11, %c0_81] : memref<2x32x4xf32, #tpu.memory_space<vmem>>, vector<1x16x4xf32>
      %74 = vector.shape_cast %73 : vector<1x16x4xf32> to vector<16x4xf32>
      %c7_82 = arith.constant 7 : index
      %c0_83 = arith.constant 0 : index
      %c0_84 = arith.constant 0 : index
      %75 = vector.load %arg4[%c7_82, %c0_83, %c0_84] : memref<9x4x4xf32, #tpu.memory_space<vmem>>, vector<1x4x4xf32>
      %76 = vector.shape_cast %75 : vector<1x4x4xf32> to vector<4x4xf32>
      %cst_85 = arith.constant dense<0.000000e+00> : vector<16x4xf32>
      %77 = tpu.matmul %74, %76, %cst_85 {dimension_numbers = #tpu.dot_dimension_numbers<[1], [0], [0], [1], [0, 0, 1, 1], [], []>} : vector<16x4xf32>, vector<4x4xf32>, vector<16x4xf32> -> vector<16x4xf32>
      %78 = arith.addf %72, %77 : vector<16x4xf32>
      %c0_86 = arith.constant 0 : index
      %c12 = arith.constant 12 : index
      %c0_87 = arith.constant 0 : index
      %79 = vector.load %arg9[%c0_86, %c12, %c0_87] : memref<2x32x4xf32, #tpu.memory_space<vmem>>, vector<1x16x4xf32>
      %80 = vector.shape_cast %79 : vector<1x16x4xf32> to vector<16x4xf32>
      %c8_88 = arith.constant 8 : index
      %c0_89 = arith.constant 0 : index
      %c0_90 = arith.constant 0 : index
      %81 = vector.load %arg4[%c8_88, %c0_89, %c0_90] : memref<9x4x4xf32, #tpu.memory_space<vmem>>, vector<1x4x4xf32>
      %82 = vector.shape_cast %81 : vector<1x4x4xf32> to vector<4x4xf32>
      %cst_91 = arith.constant dense<0.000000e+00> : vector<16x4xf32>
      %83 = tpu.matmul %80, %82, %cst_91 {dimension_numbers = #tpu.dot_dimension_numbers<[1], [0], [0], [1], [0, 0, 1, 1], [], []>} : vector<16x4xf32>, vector<4x4xf32>, vector<16x4xf32> -> vector<16x4xf32>
      %84 = arith.addf %78, %83 : vector<16x4xf32>
      %cst_92 = arith.constant dense<0.000000e+00> : vector<4xf32>
      %85 = vector.multi_reduction <add>, %84, %cst_92 [0] : vector<16x4xf32> to vector<4xf32>
      %86 = vector.shape_cast %85 : vector<4xf32> to vector<1x4xf32>
      %cst_93 = arith.constant 1.600000e+01 : f32
      %87 = vector.broadcast %cst_93 : f32 to vector<1x4xf32>
      %88 = arith.divf %86, %87 : vector<1x4xf32>
      %89 = vector.broadcast %88 : vector<1x4xf32> to vector<16x4xf32>
      %90 = arith.subf %84, %89 : vector<16x4xf32>
      %91 = arith.mulf %90, %90 : vector<16x4xf32>
      %cst_94 = arith.constant dense<0.000000e+00> : vector<4xf32>
      %92 = vector.multi_reduction <add>, %91, %cst_94 [0] : vector<16x4xf32> to vector<4xf32>
      %93 = vector.shape_cast %92 : vector<4xf32> to vector<1x4xf32>
      %cst_95 = arith.constant 1.600000e+01 : f32
      %94 = vector.broadcast %cst_95 : f32 to vector<1x4xf32>
      %95 = arith.divf %93, %94 : vector<1x4xf32>
      %96 = vector.broadcast %88 : vector<1x4xf32> to vector<16x4xf32>
      %97 = arith.subf %84, %96 : vector<16x4xf32>
      %cst_96 = arith.constant 9.99999974E-6 : f32
      %98 = vector.broadcast %cst_96 : f32 to vector<1x4xf32>
      %99 = arith.addf %95, %98 : vector<1x4xf32>
      %100 = math.rsqrt %99 : vector<1x4xf32>
      %101 = vector.broadcast %100 : vector<1x4xf32> to vector<16x4xf32>
      %102 = arith.mulf %97, %101 : vector<16x4xf32>
      %cst_97 = arith.constant 0.000000e+00 : f32
      %103 = vector.broadcast %cst_97 : f32 to vector<16x4xf32>
      %104 = arith.cmpf ogt, %102, %103 : vector<16x4xf32>
      %cst_98 = arith.constant 0.000000e+00 : f32
      %105 = vector.broadcast %cst_98 : f32 to vector<16x4xf32>
      %106 = arith.minimumf %102, %105 : vector<16x4xf32>
      %107 = math.exp %106 : vector<16x4xf32>
      %cst_99 = arith.constant 1.000000e+00 : f32
      %108 = vector.broadcast %cst_99 : f32 to vector<16x4xf32>
      %109 = arith.subf %107, %108 : vector<16x4xf32>
      %110 = arith.select %104, %102, %109 : vector<16x4xi1>, vector<16x4xf32>
      %c0_100 = arith.constant 0 : index
      %c0_101 = arith.constant 0 : index
      %111 = vector.load %arg10[%c0_100, %c0_101] : memref<32x4xf32, #tpu.memory_space<vmem>>, vector<16x4xf32>
      tpu.vector_store %arg10[%c0_100, %c0_101], %110 {strides = array<i32>} : memref<32x4xf32, #tpu.memory_space<vmem>>, vector<16x4xf32>,
      %cst_102 = arith.constant 0.000000e+00 : f32
      %112 = vector.broadcast %cst_102 : f32 to vector<16x4xf32>
      %c1_103 = arith.constant 1 : index
      %c4_104 = arith.constant 4 : index
      %c0_105 = arith.constant 0 : index
      %113 = vector.load %arg9[%c1_103, %c4_104, %c0_105] : memref<2x32x4xf32, #tpu.memory_space<vmem>>, vector<1x16x4xf32>
      %114 = vector.shape_cast %113 : vector<1x16x4xf32> to vector<16x4xf32>
      %c0_106 = arith.constant 0 : index
      %c0_107 = arith.constant 0 : index
      %c0_108 = arith.constant 0 : index
      %115 = vector.load %arg4[%c0_106, %c0_107, %c0_108] : memref<9x4x4xf32, #tpu.memory_space<vmem>>, vector<1x4x4xf32>
      %116 = vector.shape_cast %115 : vector<1x4x4xf32> to vector<4x4xf32>
      %cst_109 = arith.constant dense<0.000000e+00> : vector<16x4xf32>
      %117 = tpu.matmul %114, %116, %cst_109 {dimension_numbers = #tpu.dot_dimension_numbers<[1], [0], [0], [1], [0, 0, 1, 1], [], []>} : vector<16x4xf32>, vector<4x4xf32>, vector<16x4xf32> -> vector<16x4xf32>
      %118 = arith.addf %112, %117 : vector<16x4xf32>
      %c1_110 = arith.constant 1 : index
      %c5_111 = arith.constant 5 : index
      %c0_112 = arith.constant 0 : index
      %119 = vector.load %arg9[%c1_110, %c5_111, %c0_112] : memref<2x32x4xf32, #tpu.memory_space<vmem>>, vector<1x16x4xf32>
      %120 = vector.shape_cast %119 : vector<1x16x4xf32> to vector<16x4xf32>
      %c1_113 = arith.constant 1 : index
      %c0_114 = arith.constant 0 : index
      %c0_115 = arith.constant 0 : index
      %121 = vector.load %arg4[%c1_113, %c0_114, %c0_115] : memref<9x4x4xf32, #tpu.memory_space<vmem>>, vector<1x4x4xf32>
      %122 = vector.shape_cast %121 : vector<1x4x4xf32> to vector<4x4xf32>
      %cst_116 = arith.constant dense<0.000000e+00> : vector<16x4xf32>
      %123 = tpu.matmul %120, %122, %cst_116 {dimension_numbers = #tpu.dot_dimension_numbers<[1], [0], [0], [1], [0, 0, 1, 1], [], []>} : vector<16x4xf32>, vector<4x4xf32>, vector<16x4xf32> -> vector<16x4xf32>
      %124 = arith.addf %118, %123 : vector<16x4xf32>
      %c1_117 = arith.constant 1 : index
      %c6_118 = arith.constant 6 : index
      %c0_119 = arith.constant 0 : index
      %125 = vector.load %arg9[%c1_117, %c6_118, %c0_119] : memref<2x32x4xf32, #tpu.memory_space<vmem>>, vector<1x16x4xf32>
      %126 = vector.shape_cast %125 : vector<1x16x4xf32> to vector<16x4xf32>
      %c2_120 = arith.constant 2 : index
      %c0_121 = arith.constant 0 : index
      %c0_122 = arith.constant 0 : index
      %127 = vector.load %arg4[%c2_120, %c0_121, %c0_122] : memref<9x4x4xf32, #tpu.memory_space<vmem>>, vector<1x4x4xf32>
      %128 = vector.shape_cast %127 : vector<1x4x4xf32> to vector<4x4xf32>
      %cst_123 = arith.constant dense<0.000000e+00> : vector<16x4xf32>
      %129 = tpu.matmul %126, %128, %cst_123 {dimension_numbers = #tpu.dot_dimension_numbers<[1], [0], [0], [1], [0, 0, 1, 1], [], []>} : vector<16x4xf32>, vector<4x4xf32>, vector<16x4xf32> -> vector<16x4xf32>
      %130 = arith.addf %124, %129 : vector<16x4xf32>
      %c1_124 = arith.constant 1 : index
      %c7_125 = arith.constant 7 : index
      %c0_126 = arith.constant 0 : index
      %131 = vector.load %arg9[%c1_124, %c7_125, %c0_126] : memref<2x32x4xf32, #tpu.memory_space<vmem>>, vector<1x16x4xf32>
      %132 = vector.shape_cast %131 : vector<1x16x4xf32> to vector<16x4xf32>
      %c3_127 = arith.constant 3 : index
      %c0_128 = arith.constant 0 : index
      %c0_129 = arith.constant 0 : index
      %133 = vector.load %arg4[%c3_127, %c0_128, %c0_129] : memref<9x4x4xf32, #tpu.memory_space<vmem>>, vector<1x4x4xf32>
      %134 = vector.shape_cast %133 : vector<1x4x4xf32> to vector<4x4xf32>
      %cst_130 = arith.constant dense<0.000000e+00> : vector<16x4xf32>
      %135 = tpu.matmul %132, %134, %cst_130 {dimension_numbers = #tpu.dot_dimension_numbers<[1], [0], [0], [1], [0, 0, 1, 1], [], []>} : vector<16x4xf32>, vector<4x4xf32>, vector<16x4xf32> -> vector<16x4xf32>
      %136 = arith.addf %130, %135 : vector<16x4xf32>
      %c1_131 = arith.constant 1 : index
      %c8_132 = arith.constant 8 : index
      %c0_133 = arith.constant 0 : index
      %137 = vector.load %arg9[%c1_131, %c8_132, %c0_133] : memref<2x32x4xf32, #tpu.memory_space<vmem>>, vector<1x16x4xf32>
      %138 = vector.shape_cast %137 : vector<1x16x4xf32> to vector<16x4xf32>
      %c4_134 = arith.constant 4 : index
      %c0_135 = arith.constant 0 : index
      %c0_136 = arith.constant 0 : index
      %139 = vector.load %arg4[%c4_134, %c0_135, %c0_136] : memref<9x4x4xf32, #tpu.memory_space<vmem>>, vector<1x4x4xf32>
      %140 = vector.shape_cast %139 : vector<1x4x4xf32> to vector<4x4xf32>
      %cst_137 = arith.constant dense<0.000000e+00> : vector<16x4xf32>
      %141 = tpu.matmul %138, %140, %cst_137 {dimension_numbers = #tpu.dot_dimension_numbers<[1], [0], [0], [1], [0, 0, 1, 1], [], []>} : vector<16x4xf32>, vector<4x4xf32>, vector<16x4xf32> -> vector<16x4xf32>
      %142 = arith.addf %136, %141 : vector<16x4xf32>
      %c1_138 = arith.constant 1 : index
      %c9_139 = arith.constant 9 : index
      %c0_140 = arith.constant 0 : index
      %143 = vector.load %arg9[%c1_138, %c9_139, %c0_140] : memref<2x32x4xf32, #tpu.memory_space<vmem>>, vector<1x16x4xf32>
      %144 = vector.shape_cast %143 : vector<1x16x4xf32> to vector<16x4xf32>
      %c5_141 = arith.constant 5 : index
      %c0_142 = arith.constant 0 : index
      %c0_143 = arith.constant 0 : index
      %145 = vector.load %arg4[%c5_141, %c0_142, %c0_143] : memref<9x4x4xf32, #tpu.memory_space<vmem>>, vector<1x4x4xf32>
      %146 = vector.shape_cast %145 : vector<1x4x4xf32> to vector<4x4xf32>
      %cst_144 = arith.constant dense<0.000000e+00> : vector<16x4xf32>
      %147 = tpu.matmul %144, %146, %cst_144 {dimension_numbers = #tpu.dot_dimension_numbers<[1], [0], [0], [1], [0, 0, 1, 1], [], []>} : vector<16x4xf32>, vector<4x4xf32>, vector<16x4xf32> -> vector<16x4xf32>
      %148 = arith.addf %142, %147 : vector<16x4xf32>
      %c1_145 = arith.constant 1 : index
      %c10_146 = arith.constant 10 : index
      %c0_147 = arith.constant 0 : index
      %149 = vector.load %arg9[%c1_145, %c10_146, %c0_147] : memref<2x32x4xf32, #tpu.memory_space<vmem>>, vector<1x16x4xf32>
      %150 = vector.shape_cast %149 : vector<1x16x4xf32> to vector<16x4xf32>
      %c6_148 = arith.constant 6 : index
      %c0_149 = arith.constant 0 : index
      %c0_150 = arith.constant 0 : index
      %151 = vector.load %arg4[%c6_148, %c0_149, %c0_150] : memref<9x4x4xf32, #tpu.memory_space<vmem>>, vector<1x4x4xf32>
      %152 = vector.shape_cast %151 : vector<1x4x4xf32> to vector<4x4xf32>
      %cst_151 = arith.constant dense<0.000000e+00> : vector<16x4xf32>
      %153 = tpu.matmul %150, %152, %cst_151 {dimension_numbers = #tpu.dot_dimension_numbers<[1], [0], [0], [1], [0, 0, 1, 1], [], []>} : vector<16x4xf32>, vector<4x4xf32>, vector<16x4xf32> -> vector<16x4xf32>
      %154 = arith.addf %148, %153 : vector<16x4xf32>
      %c1_152 = arith.constant 1 : index
      %c11_153 = arith.constant 11 : index
      %c0_154 = arith.constant 0 : index
      %155 = vector.load %arg9[%c1_152, %c11_153, %c0_154] : memref<2x32x4xf32, #tpu.memory_space<vmem>>, vector<1x16x4xf32>
      %156 = vector.shape_cast %155 : vector<1x16x4xf32> to vector<16x4xf32>
      %c7_155 = arith.constant 7 : index
      %c0_156 = arith.constant 0 : index
      %c0_157 = arith.constant 0 : index
      %157 = vector.load %arg4[%c7_155, %c0_156, %c0_157] : memref<9x4x4xf32, #tpu.memory_space<vmem>>, vector<1x4x4xf32>
      %158 = vector.shape_cast %157 : vector<1x4x4xf32> to vector<4x4xf32>
      %cst_158 = arith.constant dense<0.000000e+00> : vector<16x4xf32>
      %159 = tpu.matmul %156, %158, %cst_158 {dimension_numbers = #tpu.dot_dimension_numbers<[1], [0], [0], [1], [0, 0, 1, 1], [], []>} : vector<16x4xf32>, vector<4x4xf32>, vector<16x4xf32> -> vector<16x4xf32>
      %160 = arith.addf %154, %159 : vector<16x4xf32>
      %c1_159 = arith.constant 1 : index
      %c12_160 = arith.constant 12 : index
      %c0_161 = arith.constant 0 : index
      %161 = vector.load %arg9[%c1_159, %c12_160, %c0_161] : memref<2x32x4xf32, #tpu.memory_space<vmem>>, vector<1x16x4xf32>
      %162 = vector.shape_cast %161 : vector<1x16x4xf32> to vector<16x4xf32>
      %c8_162 = arith.constant 8 : index
      %c0_163 = arith.constant 0 : index
      %c0_164 = arith.constant 0 : index
      %163 = vector.load %arg4[%c8_162, %c0_163, %c0_164] : memref<9x4x4xf32, #tpu.memory_space<vmem>>, vector<1x4x4xf32>
      %164 = vector.shape_cast %163 : vector<1x4x4xf32> to vector<4x4xf32>
      %cst_165 = arith.constant dense<0.000000e+00> : vector<16x4xf32>
      %165 = tpu.matmul %162, %164, %cst_165 {dimension_numbers = #tpu.dot_dimension_numbers<[1], [0], [0], [1], [0, 0, 1, 1], [], []>} : vector<16x4xf32>, vector<4x4xf32>, vector<16x4xf32> -> vector<16x4xf32>
      %166 = arith.addf %160, %165 : vector<16x4xf32>
      %cst_166 = arith.constant dense<0.000000e+00> : vector<4xf32>
      %167 = vector.multi_reduction <add>, %166, %cst_166 [0] : vector<16x4xf32> to vector<4xf32>
      %168 = vector.shape_cast %167 : vector<4xf32> to vector<1x4xf32>
      %cst_167 = arith.constant 1.600000e+01 : f32
      %169 = vector.broadcast %cst_167 : f32 to vector<1x4xf32>
      %170 = arith.divf %168, %169 : vector<1x4xf32>
      %171 = vector.broadcast %170 : vector<1x4xf32> to vector<16x4xf32>
      %172 = arith.subf %166, %171 : vector<16x4xf32>
      %173 = arith.mulf %172, %172 : vector<16x4xf32>
      %cst_168 = arith.constant dense<0.000000e+00> : vector<4xf32>
      %174 = vector.multi_reduction <add>, %173, %cst_168 [0] : vector<16x4xf32> to vector<4xf32>
      %175 = vector.shape_cast %174 : vector<4xf32> to vector<1x4xf32>
      %cst_169 = arith.constant 1.600000e+01 : f32
      %176 = vector.broadcast %cst_169 : f32 to vector<1x4xf32>
      %177 = arith.divf %175, %176 : vector<1x4xf32>
      %178 = vector.broadcast %170 : vector<1x4xf32> to vector<16x4xf32>
      %179 = arith.subf %166, %178 : vector<16x4xf32>
      %cst_170 = arith.constant 9.99999974E-6 : f32
      %180 = vector.broadcast %cst_170 : f32 to vector<1x4xf32>
      %181 = arith.addf %177, %180 : vector<1x4xf32>
      %182 = math.rsqrt %181 : vector<1x4xf32>
      %183 = vector.broadcast %182 : vector<1x4xf32> to vector<16x4xf32>
      %184 = arith.mulf %179, %183 : vector<16x4xf32>
      %cst_171 = arith.constant 0.000000e+00 : f32
      %185 = vector.broadcast %cst_171 : f32 to vector<16x4xf32>
      %186 = arith.cmpf ogt, %184, %185 : vector<16x4xf32>
      %cst_172 = arith.constant 0.000000e+00 : f32
      %187 = vector.broadcast %cst_172 : f32 to vector<16x4xf32>
      %188 = arith.minimumf %184, %187 : vector<16x4xf32>
      %189 = math.exp %188 : vector<16x4xf32>
      %cst_173 = arith.constant 1.000000e+00 : f32
      %190 = vector.broadcast %cst_173 : f32 to vector<16x4xf32>
      %191 = arith.subf %189, %190 : vector<16x4xf32>
      %192 = arith.select %186, %184, %191 : vector<16x4xi1>, vector<16x4xf32>
      %c16 = arith.constant 16 : index
      %c0_174 = arith.constant 0 : index
      %193 = vector.load %arg10[%c16, %c0_174] : memref<32x4xf32, #tpu.memory_space<vmem>>, vector<16x4xf32>
      tpu.vector_store %arg10[%c16, %c0_174], %192 {strides = array<i32>} : memref<32x4xf32, #tpu.memory_space<vmem>>, vector<16x4xf32>,
      %c0_175 = arith.constant 0 : index
      %c0_176 = arith.constant 0 : index
      %194 = vector.load %arg10[%c0_175, %c0_176] : memref<32x4xf32, #tpu.memory_space<vmem>>, vector<32x4xf32>
      %195 = arith.index_cast %arg11 : i32 to index
      %c0_177 = arith.constant 0 : index
      %c0_178 = arith.constant 0 : index
      %196 = vector.load %arg2[%195, %c0_177, %c0_178] : memref<16x32x4xf32, #tpu.memory_space<vmem>>, vector<1x32x4xf32>
      %197 = vector.shape_cast %196 : vector<1x32x4xf32> to vector<32x4xf32>
      %198 = arith.addf %194, %197 : vector<32x4xf32>
      %199 = arith.index_cast %arg11 : i32 to index
      %c0_179 = arith.constant 0 : index
      %c0_180 = arith.constant 0 : index
      %200 = vector.load %arg6[%199, %c0_179, %c0_180] : memref<16x32x4xf32, #tpu.memory_space<vmem>>, vector<1x32x4xf32>
      %201 = vector.shape_cast %200 : vector<1x32x4xf32> to vector<32x4xf32>
      %202 = vector.shape_cast %198 : vector<32x4xf32> to vector<1x32x4xf32>
      tpu.vector_store %arg6[%199, %c0_179, %c0_180], %202 {strides = array<i32>} : memref<16x32x4xf32, #tpu.memory_space<vmem>>, vector<1x32x4xf32>,
    }
    %c15_i32_26 = arith.constant 15 : i32
    %c0_i32_27 = arith.constant 0 : i32
    %c15_i32_28 = arith.constant 15 : i32
    %17 = arith.addi %c0_i32_27, %c15_i32_28 : i32
    %c1_i32_29 = arith.constant 1 : i32
    scf.for %arg11 = %c0_i32_27 to %17 step %c1_i32_29  : i32 {
      %c14_i32 = arith.constant 14 : i32
      %18 = arith.subi %c14_i32, %arg11 : i32
      %c1_i32_31 = arith.constant 1 : i32
      %19 = arith.addi %18, %c1_i32_31 : i32
      %20 = arith.index_cast %19 : i32 to index
      %c0_32 = arith.constant 0 : index
      %c0_33 = arith.constant 0 : index
      %21 = vector.load %arg6[%20, %c0_32, %c0_33] : memref<16x32x4xf32, #tpu.memory_space<vmem>>, vector<1x32x4xf32>
      %22 = vector.shape_cast %21 : vector<1x32x4xf32> to vector<32x4xf32>
      %23 = vector.extract_strided_slice %22 {offsets = [0, 0], sizes = [16, 4], strides = [1, 1]} : vector<32x4xf32> to vector<16x4xf32>
      %c0_34 = arith.constant 0 : index
      %c8 = arith.constant 8 : index
      %c0_35 = arith.constant 0 : index
      %24 = vector.load %arg9[%c0_34, %c8, %c0_35] : memref<2x32x4xf32, #tpu.memory_space<vmem>>, vector<1x16x4xf32>
      %25 = vector.shape_cast %24 : vector<1x16x4xf32> to vector<16x4xf32>
      %26 = vector.shape_cast %23 : vector<16x4xf32> to vector<1x16x4xf32>
      tpu.vector_store %arg9[%c0_34, %c8, %c0_35], %26 {strides = array<i32>} : memref<2x32x4xf32, #tpu.memory_space<vmem>>, vector<1x16x4xf32>,
      %27 = vector.extract_strided_slice %22 {offsets = [16, 0], sizes = [16, 4], strides = [1, 1]} : vector<32x4xf32> to vector<16x4xf32>
      %c1 = arith.constant 1 : index
      %c8_36 = arith.constant 8 : index
      %c0_37 = arith.constant 0 : index
      %28 = vector.load %arg9[%c1, %c8_36, %c0_37] : memref<2x32x4xf32, #tpu.memory_space<vmem>>, vector<1x16x4xf32>
      %29 = vector.shape_cast %28 : vector<1x16x4xf32> to vector<16x4xf32>
      %30 = vector.shape_cast %27 : vector<16x4xf32> to vector<1x16x4xf32>
      tpu.vector_store %arg9[%c1, %c8_36, %c0_37], %30 {strides = array<i32>} : memref<2x32x4xf32, #tpu.memory_space<vmem>>, vector<1x16x4xf32>,
      %cst_38 = arith.constant 0.000000e+00 : f32
      %31 = vector.broadcast %cst_38 : f32 to vector<16x4xf32>
      %c0_39 = arith.constant 0 : index
      %c4 = arith.constant 4 : index
      %c0_40 = arith.constant 0 : index
      %32 = vector.load %arg9[%c0_39, %c4, %c0_40] : memref<2x32x4xf32, #tpu.memory_space<vmem>>, vector<1x16x4xf32>
      %33 = vector.shape_cast %32 : vector<1x16x4xf32> to vector<16x4xf32>
      %c0_41 = arith.constant 0 : index
      %c0_42 = arith.constant 0 : index
      %c0_43 = arith.constant 0 : index
      %34 = vector.load %arg4[%c0_41, %c0_42, %c0_43] : memref<9x4x4xf32, #tpu.memory_space<vmem>>, vector<1x4x4xf32>
      %35 = vector.shape_cast %34 : vector<1x4x4xf32> to vector<4x4xf32>
      %cst_44 = arith.constant dense<0.000000e+00> : vector<16x4xf32>
      %36 = tpu.matmul %33, %35, %cst_44 {dimension_numbers = #tpu.dot_dimension_numbers<[1], [0], [0], [1], [0, 0, 1, 1], [], []>} : vector<16x4xf32>, vector<4x4xf32>, vector<16x4xf32> -> vector<16x4xf32>
      %37 = arith.addf %31, %36 : vector<16x4xf32>
      %c0_45 = arith.constant 0 : index
      %c5 = arith.constant 5 : index
      %c0_46 = arith.constant 0 : index
      %38 = vector.load %arg9[%c0_45, %c5, %c0_46] : memref<2x32x4xf32, #tpu.memory_space<vmem>>, vector<1x16x4xf32>
      %39 = vector.shape_cast %38 : vector<1x16x4xf32> to vector<16x4xf32>
      %c1_47 = arith.constant 1 : index
      %c0_48 = arith.constant 0 : index
      %c0_49 = arith.constant 0 : index
      %40 = vector.load %arg4[%c1_47, %c0_48, %c0_49] : memref<9x4x4xf32, #tpu.memory_space<vmem>>, vector<1x4x4xf32>
      %41 = vector.shape_cast %40 : vector<1x4x4xf32> to vector<4x4xf32>
      %cst_50 = arith.constant dense<0.000000e+00> : vector<16x4xf32>
      %42 = tpu.matmul %39, %41, %cst_50 {dimension_numbers = #tpu.dot_dimension_numbers<[1], [0], [0], [1], [0, 0, 1, 1], [], []>} : vector<16x4xf32>, vector<4x4xf32>, vector<16x4xf32> -> vector<16x4xf32>
      %43 = arith.addf %37, %42 : vector<16x4xf32>
      %c0_51 = arith.constant 0 : index
      %c6 = arith.constant 6 : index
      %c0_52 = arith.constant 0 : index
      %44 = vector.load %arg9[%c0_51, %c6, %c0_52] : memref<2x32x4xf32, #tpu.memory_space<vmem>>, vector<1x16x4xf32>
      %45 = vector.shape_cast %44 : vector<1x16x4xf32> to vector<16x4xf32>
      %c2 = arith.constant 2 : index
      %c0_53 = arith.constant 0 : index
      %c0_54 = arith.constant 0 : index
      %46 = vector.load %arg4[%c2, %c0_53, %c0_54] : memref<9x4x4xf32, #tpu.memory_space<vmem>>, vector<1x4x4xf32>
      %47 = vector.shape_cast %46 : vector<1x4x4xf32> to vector<4x4xf32>
      %cst_55 = arith.constant dense<0.000000e+00> : vector<16x4xf32>
      %48 = tpu.matmul %45, %47, %cst_55 {dimension_numbers = #tpu.dot_dimension_numbers<[1], [0], [0], [1], [0, 0, 1, 1], [], []>} : vector<16x4xf32>, vector<4x4xf32>, vector<16x4xf32> -> vector<16x4xf32>
      %49 = arith.addf %43, %48 : vector<16x4xf32>
      %c0_56 = arith.constant 0 : index
      %c7 = arith.constant 7 : index
      %c0_57 = arith.constant 0 : index
      %50 = vector.load %arg9[%c0_56, %c7, %c0_57] : memref<2x32x4xf32, #tpu.memory_space<vmem>>, vector<1x16x4xf32>
      %51 = vector.shape_cast %50 : vector<1x16x4xf32> to vector<16x4xf32>
      %c3 = arith.constant 3 : index
      %c0_58 = arith.constant 0 : index
      %c0_59 = arith.constant 0 : index
      %52 = vector.load %arg4[%c3, %c0_58, %c0_59] : memref<9x4x4xf32, #tpu.memory_space<vmem>>, vector<1x4x4xf32>
      %53 = vector.shape_cast %52 : vector<1x4x4xf32> to vector<4x4xf32>
      %cst_60 = arith.constant dense<0.000000e+00> : vector<16x4xf32>
      %54 = tpu.matmul %51, %53, %cst_60 {dimension_numbers = #tpu.dot_dimension_numbers<[1], [0], [0], [1], [0, 0, 1, 1], [], []>} : vector<16x4xf32>, vector<4x4xf32>, vector<16x4xf32> -> vector<16x4xf32>
      %55 = arith.addf %49, %54 : vector<16x4xf32>
      %c0_61 = arith.constant 0 : index
      %c8_62 = arith.constant 8 : index
      %c0_63 = arith.constant 0 : index
      %56 = vector.load %arg9[%c0_61, %c8_62, %c0_63] : memref<2x32x4xf32, #tpu.memory_space<vmem>>, vector<1x16x4xf32>
      %57 = vector.shape_cast %56 : vector<1x16x4xf32> to vector<16x4xf32>
      %c4_64 = arith.constant 4 : index
      %c0_65 = arith.constant 0 : index
      %c0_66 = arith.constant 0 : index
      %58 = vector.load %arg4[%c4_64, %c0_65, %c0_66] : memref<9x4x4xf32, #tpu.memory_space<vmem>>, vector<1x4x4xf32>
      %59 = vector.shape_cast %58 : vector<1x4x4xf32> to vector<4x4xf32>
      %cst_67 = arith.constant dense<0.000000e+00> : vector<16x4xf32>
      %60 = tpu.matmul %57, %59, %cst_67 {dimension_numbers = #tpu.dot_dimension_numbers<[1], [0], [0], [1], [0, 0, 1, 1], [], []>} : vector<16x4xf32>, vector<4x4xf32>, vector<16x4xf32> -> vector<16x4xf32>
      %61 = arith.addf %55, %60 : vector<16x4xf32>
      %c0_68 = arith.constant 0 : index
      %c9 = arith.constant 9 : index
      %c0_69 = arith.constant 0 : index
      %62 = vector.load %arg9[%c0_68, %c9, %c0_69] : memref<2x32x4xf32, #tpu.memory_space<vmem>>, vector<1x16x4xf32>
      %63 = vector.shape_cast %62 : vector<1x16x4xf32> to vector<16x4xf32>
      %c5_70 = arith.constant 5 : index
      %c0_71 = arith.constant 0 : index
      %c0_72 = arith.constant 0 : index
      %64 = vector.load %arg4[%c5_70, %c0_71, %c0_72] : memref<9x4x4xf32, #tpu.memory_space<vmem>>, vector<1x4x4xf32>
      %65 = vector.shape_cast %64 : vector<1x4x4xf32> to vector<4x4xf32>
      %cst_73 = arith.constant dense<0.000000e+00> : vector<16x4xf32>
      %66 = tpu.matmul %63, %65, %cst_73 {dimension_numbers = #tpu.dot_dimension_numbers<[1], [0], [0], [1], [0, 0, 1, 1], [], []>} : vector<16x4xf32>, vector<4x4xf32>, vector<16x4xf32> -> vector<16x4xf32>
      %67 = arith.addf %61, %66 : vector<16x4xf32>
      %c0_74 = arith.constant 0 : index
      %c10 = arith.constant 10 : index
      %c0_75 = arith.constant 0 : index
      %68 = vector.load %arg9[%c0_74, %c10, %c0_75] : memref<2x32x4xf32, #tpu.memory_space<vmem>>, vector<1x16x4xf32>
      %69 = vector.shape_cast %68 : vector<1x16x4xf32> to vector<16x4xf32>
      %c6_76 = arith.constant 6 : index
      %c0_77 = arith.constant 0 : index
      %c0_78 = arith.constant 0 : index
      %70 = vector.load %arg4[%c6_76, %c0_77, %c0_78] : memref<9x4x4xf32, #tpu.memory_space<vmem>>, vector<1x4x4xf32>
      %71 = vector.shape_cast %70 : vector<1x4x4xf32> to vector<4x4xf32>
      %cst_79 = arith.constant dense<0.000000e+00> : vector<16x4xf32>
      %72 = tpu.matmul %69, %71, %cst_79 {dimension_numbers = #tpu.dot_dimension_numbers<[1], [0], [0], [1], [0, 0, 1, 1], [], []>} : vector<16x4xf32>, vector<4x4xf32>, vector<16x4xf32> -> vector<16x4xf32>
      %73 = arith.addf %67, %72 : vector<16x4xf32>
      %c0_80 = arith.constant 0 : index
      %c11 = arith.constant 11 : index
      %c0_81 = arith.constant 0 : index
      %74 = vector.load %arg9[%c0_80, %c11, %c0_81] : memref<2x32x4xf32, #tpu.memory_space<vmem>>, vector<1x16x4xf32>
      %75 = vector.shape_cast %74 : vector<1x16x4xf32> to vector<16x4xf32>
      %c7_82 = arith.constant 7 : index
      %c0_83 = arith.constant 0 : index
      %c0_84 = arith.constant 0 : index
      %76 = vector.load %arg4[%c7_82, %c0_83, %c0_84] : memref<9x4x4xf32, #tpu.memory_space<vmem>>, vector<1x4x4xf32>
      %77 = vector.shape_cast %76 : vector<1x4x4xf32> to vector<4x4xf32>
      %cst_85 = arith.constant dense<0.000000e+00> : vector<16x4xf32>
      %78 = tpu.matmul %75, %77, %cst_85 {dimension_numbers = #tpu.dot_dimension_numbers<[1], [0], [0], [1], [0, 0, 1, 1], [], []>} : vector<16x4xf32>, vector<4x4xf32>, vector<16x4xf32> -> vector<16x4xf32>
      %79 = arith.addf %73, %78 : vector<16x4xf32>
      %c0_86 = arith.constant 0 : index
      %c12 = arith.constant 12 : index
      %c0_87 = arith.constant 0 : index
      %80 = vector.load %arg9[%c0_86, %c12, %c0_87] : memref<2x32x4xf32, #tpu.memory_space<vmem>>, vector<1x16x4xf32>
      %81 = vector.shape_cast %80 : vector<1x16x4xf32> to vector<16x4xf32>
      %c8_88 = arith.constant 8 : index
      %c0_89 = arith.constant 0 : index
      %c0_90 = arith.constant 0 : index
      %82 = vector.load %arg4[%c8_88, %c0_89, %c0_90] : memref<9x4x4xf32, #tpu.memory_space<vmem>>, vector<1x4x4xf32>
      %83 = vector.shape_cast %82 : vector<1x4x4xf32> to vector<4x4xf32>
      %cst_91 = arith.constant dense<0.000000e+00> : vector<16x4xf32>
      %84 = tpu.matmul %81, %83, %cst_91 {dimension_numbers = #tpu.dot_dimension_numbers<[1], [0], [0], [1], [0, 0, 1, 1], [], []>} : vector<16x4xf32>, vector<4x4xf32>, vector<16x4xf32> -> vector<16x4xf32>
      %85 = arith.addf %79, %84 : vector<16x4xf32>
      %cst_92 = arith.constant dense<0.000000e+00> : vector<4xf32>
      %86 = vector.multi_reduction <add>, %85, %cst_92 [0] : vector<16x4xf32> to vector<4xf32>
      %87 = vector.shape_cast %86 : vector<4xf32> to vector<1x4xf32>
      %cst_93 = arith.constant 1.600000e+01 : f32
      %88 = vector.broadcast %cst_93 : f32 to vector<1x4xf32>
      %89 = arith.divf %87, %88 : vector<1x4xf32>
      %90 = vector.broadcast %89 : vector<1x4xf32> to vector<16x4xf32>
      %91 = arith.subf %85, %90 : vector<16x4xf32>
      %92 = arith.mulf %91, %91 : vector<16x4xf32>
      %cst_94 = arith.constant dense<0.000000e+00> : vector<4xf32>
      %93 = vector.multi_reduction <add>, %92, %cst_94 [0] : vector<16x4xf32> to vector<4xf32>
      %94 = vector.shape_cast %93 : vector<4xf32> to vector<1x4xf32>
      %cst_95 = arith.constant 1.600000e+01 : f32
      %95 = vector.broadcast %cst_95 : f32 to vector<1x4xf32>
      %96 = arith.divf %94, %95 : vector<1x4xf32>
      %97 = vector.broadcast %89 : vector<1x4xf32> to vector<16x4xf32>
      %98 = arith.subf %85, %97 : vector<16x4xf32>
      %cst_96 = arith.constant 9.99999974E-6 : f32
      %99 = vector.broadcast %cst_96 : f32 to vector<1x4xf32>
      %100 = arith.addf %96, %99 : vector<1x4xf32>
      %101 = math.rsqrt %100 : vector<1x4xf32>
      %102 = vector.broadcast %101 : vector<1x4xf32> to vector<16x4xf32>
      %103 = arith.mulf %98, %102 : vector<16x4xf32>
      %cst_97 = arith.constant 0.000000e+00 : f32
      %104 = vector.broadcast %cst_97 : f32 to vector<16x4xf32>
      %105 = arith.cmpf ogt, %103, %104 : vector<16x4xf32>
      %cst_98 = arith.constant 0.000000e+00 : f32
      %106 = vector.broadcast %cst_98 : f32 to vector<16x4xf32>
      %107 = arith.minimumf %103, %106 : vector<16x4xf32>
      %108 = math.exp %107 : vector<16x4xf32>
      %cst_99 = arith.constant 1.000000e+00 : f32
      %109 = vector.broadcast %cst_99 : f32 to vector<16x4xf32>
      %110 = arith.subf %108, %109 : vector<16x4xf32>
      %111 = arith.select %105, %103, %110 : vector<16x4xi1>, vector<16x4xf32>
      %c0_100 = arith.constant 0 : index
      %c0_101 = arith.constant 0 : index
      %112 = vector.load %arg10[%c0_100, %c0_101] : memref<32x4xf32, #tpu.memory_space<vmem>>, vector<16x4xf32>
      tpu.vector_store %arg10[%c0_100, %c0_101], %111 {strides = array<i32>} : memref<32x4xf32, #tpu.memory_space<vmem>>, vector<16x4xf32>,
      %cst_102 = arith.constant 0.000000e+00 : f32
      %113 = vector.broadcast %cst_102 : f32 to vector<16x4xf32>
      %c1_103 = arith.constant 1 : index
      %c4_104 = arith.constant 4 : index
      %c0_105 = arith.constant 0 : index
      %114 = vector.load %arg9[%c1_103, %c4_104, %c0_105] : memref<2x32x4xf32, #tpu.memory_space<vmem>>, vector<1x16x4xf32>
      %115 = vector.shape_cast %114 : vector<1x16x4xf32> to vector<16x4xf32>
      %c0_106 = arith.constant 0 : index
      %c0_107 = arith.constant 0 : index
      %c0_108 = arith.constant 0 : index
      %116 = vector.load %arg4[%c0_106, %c0_107, %c0_108] : memref<9x4x4xf32, #tpu.memory_space<vmem>>, vector<1x4x4xf32>
      %117 = vector.shape_cast %116 : vector<1x4x4xf32> to vector<4x4xf32>
      %cst_109 = arith.constant dense<0.000000e+00> : vector<16x4xf32>
      %118 = tpu.matmul %115, %117, %cst_109 {dimension_numbers = #tpu.dot_dimension_numbers<[1], [0], [0], [1], [0, 0, 1, 1], [], []>} : vector<16x4xf32>, vector<4x4xf32>, vector<16x4xf32> -> vector<16x4xf32>
      %119 = arith.addf %113, %118 : vector<16x4xf32>
      %c1_110 = arith.constant 1 : index
      %c5_111 = arith.constant 5 : index
      %c0_112 = arith.constant 0 : index
      %120 = vector.load %arg9[%c1_110, %c5_111, %c0_112] : memref<2x32x4xf32, #tpu.memory_space<vmem>>, vector<1x16x4xf32>
      %121 = vector.shape_cast %120 : vector<1x16x4xf32> to vector<16x4xf32>
      %c1_113 = arith.constant 1 : index
      %c0_114 = arith.constant 0 : index
      %c0_115 = arith.constant 0 : index
      %122 = vector.load %arg4[%c1_113, %c0_114, %c0_115] : memref<9x4x4xf32, #tpu.memory_space<vmem>>, vector<1x4x4xf32>
      %123 = vector.shape_cast %122 : vector<1x4x4xf32> to vector<4x4xf32>
      %cst_116 = arith.constant dense<0.000000e+00> : vector<16x4xf32>
      %124 = tpu.matmul %121, %123, %cst_116 {dimension_numbers = #tpu.dot_dimension_numbers<[1], [0], [0], [1], [0, 0, 1, 1], [], []>} : vector<16x4xf32>, vector<4x4xf32>, vector<16x4xf32> -> vector<16x4xf32>
      %125 = arith.addf %119, %124 : vector<16x4xf32>
      %c1_117 = arith.constant 1 : index
      %c6_118 = arith.constant 6 : index
      %c0_119 = arith.constant 0 : index
      %126 = vector.load %arg9[%c1_117, %c6_118, %c0_119] : memref<2x32x4xf32, #tpu.memory_space<vmem>>, vector<1x16x4xf32>
      %127 = vector.shape_cast %126 : vector<1x16x4xf32> to vector<16x4xf32>
      %c2_120 = arith.constant 2 : index
      %c0_121 = arith.constant 0 : index
      %c0_122 = arith.constant 0 : index
      %128 = vector.load %arg4[%c2_120, %c0_121, %c0_122] : memref<9x4x4xf32, #tpu.memory_space<vmem>>, vector<1x4x4xf32>
      %129 = vector.shape_cast %128 : vector<1x4x4xf32> to vector<4x4xf32>
      %cst_123 = arith.constant dense<0.000000e+00> : vector<16x4xf32>
      %130 = tpu.matmul %127, %129, %cst_123 {dimension_numbers = #tpu.dot_dimension_numbers<[1], [0], [0], [1], [0, 0, 1, 1], [], []>} : vector<16x4xf32>, vector<4x4xf32>, vector<16x4xf32> -> vector<16x4xf32>
      %131 = arith.addf %125, %130 : vector<16x4xf32>
      %c1_124 = arith.constant 1 : index
      %c7_125 = arith.constant 7 : index
      %c0_126 = arith.constant 0 : index
      %132 = vector.load %arg9[%c1_124, %c7_125, %c0_126] : memref<2x32x4xf32, #tpu.memory_space<vmem>>, vector<1x16x4xf32>
      %133 = vector.shape_cast %132 : vector<1x16x4xf32> to vector<16x4xf32>
      %c3_127 = arith.constant 3 : index
      %c0_128 = arith.constant 0 : index
      %c0_129 = arith.constant 0 : index
      %134 = vector.load %arg4[%c3_127, %c0_128, %c0_129] : memref<9x4x4xf32, #tpu.memory_space<vmem>>, vector<1x4x4xf32>
      %135 = vector.shape_cast %134 : vector<1x4x4xf32> to vector<4x4xf32>
      %cst_130 = arith.constant dense<0.000000e+00> : vector<16x4xf32>
      %136 = tpu.matmul %133, %135, %cst_130 {dimension_numbers = #tpu.dot_dimension_numbers<[1], [0], [0], [1], [0, 0, 1, 1], [], []>} : vector<16x4xf32>, vector<4x4xf32>, vector<16x4xf32> -> vector<16x4xf32>
      %137 = arith.addf %131, %136 : vector<16x4xf32>
      %c1_131 = arith.constant 1 : index
      %c8_132 = arith.constant 8 : index
      %c0_133 = arith.constant 0 : index
      %138 = vector.load %arg9[%c1_131, %c8_132, %c0_133] : memref<2x32x4xf32, #tpu.memory_space<vmem>>, vector<1x16x4xf32>
      %139 = vector.shape_cast %138 : vector<1x16x4xf32> to vector<16x4xf32>
      %c4_134 = arith.constant 4 : index
      %c0_135 = arith.constant 0 : index
      %c0_136 = arith.constant 0 : index
      %140 = vector.load %arg4[%c4_134, %c0_135, %c0_136] : memref<9x4x4xf32, #tpu.memory_space<vmem>>, vector<1x4x4xf32>
      %141 = vector.shape_cast %140 : vector<1x4x4xf32> to vector<4x4xf32>
      %cst_137 = arith.constant dense<0.000000e+00> : vector<16x4xf32>
      %142 = tpu.matmul %139, %141, %cst_137 {dimension_numbers = #tpu.dot_dimension_numbers<[1], [0], [0], [1], [0, 0, 1, 1], [], []>} : vector<16x4xf32>, vector<4x4xf32>, vector<16x4xf32> -> vector<16x4xf32>
      %143 = arith.addf %137, %142 : vector<16x4xf32>
      %c1_138 = arith.constant 1 : index
      %c9_139 = arith.constant 9 : index
      %c0_140 = arith.constant 0 : index
      %144 = vector.load %arg9[%c1_138, %c9_139, %c0_140] : memref<2x32x4xf32, #tpu.memory_space<vmem>>, vector<1x16x4xf32>
      %145 = vector.shape_cast %144 : vector<1x16x4xf32> to vector<16x4xf32>
      %c5_141 = arith.constant 5 : index
      %c0_142 = arith.constant 0 : index
      %c0_143 = arith.constant 0 : index
      %146 = vector.load %arg4[%c5_141, %c0_142, %c0_143] : memref<9x4x4xf32, #tpu.memory_space<vmem>>, vector<1x4x4xf32>
      %147 = vector.shape_cast %146 : vector<1x4x4xf32> to vector<4x4xf32>
      %cst_144 = arith.constant dense<0.000000e+00> : vector<16x4xf32>
      %148 = tpu.matmul %145, %147, %cst_144 {dimension_numbers = #tpu.dot_dimension_numbers<[1], [0], [0], [1], [0, 0, 1, 1], [], []>} : vector<16x4xf32>, vector<4x4xf32>, vector<16x4xf32> -> vector<16x4xf32>
      %149 = arith.addf %143, %148 : vector<16x4xf32>
      %c1_145 = arith.constant 1 : index
      %c10_146 = arith.constant 10 : index
      %c0_147 = arith.constant 0 : index
      %150 = vector.load %arg9[%c1_145, %c10_146, %c0_147] : memref<2x32x4xf32, #tpu.memory_space<vmem>>, vector<1x16x4xf32>
      %151 = vector.shape_cast %150 : vector<1x16x4xf32> to vector<16x4xf32>
      %c6_148 = arith.constant 6 : index
      %c0_149 = arith.constant 0 : index
      %c0_150 = arith.constant 0 : index
      %152 = vector.load %arg4[%c6_148, %c0_149, %c0_150] : memref<9x4x4xf32, #tpu.memory_space<vmem>>, vector<1x4x4xf32>
      %153 = vector.shape_cast %152 : vector<1x4x4xf32> to vector<4x4xf32>
      %cst_151 = arith.constant dense<0.000000e+00> : vector<16x4xf32>
      %154 = tpu.matmul %151, %153, %cst_151 {dimension_numbers = #tpu.dot_dimension_numbers<[1], [0], [0], [1], [0, 0, 1, 1], [], []>} : vector<16x4xf32>, vector<4x4xf32>, vector<16x4xf32> -> vector<16x4xf32>
      %155 = arith.addf %149, %154 : vector<16x4xf32>
      %c1_152 = arith.constant 1 : index
      %c11_153 = arith.constant 11 : index
      %c0_154 = arith.constant 0 : index
      %156 = vector.load %arg9[%c1_152, %c11_153, %c0_154] : memref<2x32x4xf32, #tpu.memory_space<vmem>>, vector<1x16x4xf32>
      %157 = vector.shape_cast %156 : vector<1x16x4xf32> to vector<16x4xf32>
      %c7_155 = arith.constant 7 : index
      %c0_156 = arith.constant 0 : index
      %c0_157 = arith.constant 0 : index
      %158 = vector.load %arg4[%c7_155, %c0_156, %c0_157] : memref<9x4x4xf32, #tpu.memory_space<vmem>>, vector<1x4x4xf32>
      %159 = vector.shape_cast %158 : vector<1x4x4xf32> to vector<4x4xf32>
      %cst_158 = arith.constant dense<0.000000e+00> : vector<16x4xf32>
      %160 = tpu.matmul %157, %159, %cst_158 {dimension_numbers = #tpu.dot_dimension_numbers<[1], [0], [0], [1], [0, 0, 1, 1], [], []>} : vector<16x4xf32>, vector<4x4xf32>, vector<16x4xf32> -> vector<16x4xf32>
      %161 = arith.addf %155, %160 : vector<16x4xf32>
      %c1_159 = arith.constant 1 : index
      %c12_160 = arith.constant 12 : index
      %c0_161 = arith.constant 0 : index
      %162 = vector.load %arg9[%c1_159, %c12_160, %c0_161] : memref<2x32x4xf32, #tpu.memory_space<vmem>>, vector<1x16x4xf32>
      %163 = vector.shape_cast %162 : vector<1x16x4xf32> to vector<16x4xf32>
      %c8_162 = arith.constant 8 : index
      %c0_163 = arith.constant 0 : index
      %c0_164 = arith.constant 0 : index
      %164 = vector.load %arg4[%c8_162, %c0_163, %c0_164] : memref<9x4x4xf32, #tpu.memory_space<vmem>>, vector<1x4x4xf32>
      %165 = vector.shape_cast %164 : vector<1x4x4xf32> to vector<4x4xf32>
      %cst_165 = arith.constant dense<0.000000e+00> : vector<16x4xf32>
      %166 = tpu.matmul %163, %165, %cst_165 {dimension_numbers = #tpu.dot_dimension_numbers<[1], [0], [0], [1], [0, 0, 1, 1], [], []>} : vector<16x4xf32>, vector<4x4xf32>, vector<16x4xf32> -> vector<16x4xf32>
      %167 = arith.addf %161, %166 : vector<16x4xf32>
      %cst_166 = arith.constant dense<0.000000e+00> : vector<4xf32>
      %168 = vector.multi_reduction <add>, %167, %cst_166 [0] : vector<16x4xf32> to vector<4xf32>
      %169 = vector.shape_cast %168 : vector<4xf32> to vector<1x4xf32>
      %cst_167 = arith.constant 1.600000e+01 : f32
      %170 = vector.broadcast %cst_167 : f32 to vector<1x4xf32>
      %171 = arith.divf %169, %170 : vector<1x4xf32>
      %172 = vector.broadcast %171 : vector<1x4xf32> to vector<16x4xf32>
      %173 = arith.subf %167, %172 : vector<16x4xf32>
      %174 = arith.mulf %173, %173 : vector<16x4xf32>
      %cst_168 = arith.constant dense<0.000000e+00> : vector<4xf32>
      %175 = vector.multi_reduction <add>, %174, %cst_168 [0] : vector<16x4xf32> to vector<4xf32>
      %176 = vector.shape_cast %175 : vector<4xf32> to vector<1x4xf32>
      %cst_169 = arith.constant 1.600000e+01 : f32
      %177 = vector.broadcast %cst_169 : f32 to vector<1x4xf32>
      %178 = arith.divf %176, %177 : vector<1x4xf32>
      %179 = vector.broadcast %171 : vector<1x4xf32> to vector<16x4xf32>
      %180 = arith.subf %167, %179 : vector<16x4xf32>
      %cst_170 = arith.constant 9.99999974E-6 : f32
      %181 = vector.broadcast %cst_170 : f32 to vector<1x4xf32>
      %182 = arith.addf %178, %181 : vector<1x4xf32>
      %183 = math.rsqrt %182 : vector<1x4xf32>
      %184 = vector.broadcast %183 : vector<1x4xf32> to vector<16x4xf32>
      %185 = arith.mulf %180, %184 : vector<16x4xf32>
      %cst_171 = arith.constant 0.000000e+00 : f32
      %186 = vector.broadcast %cst_171 : f32 to vector<16x4xf32>
      %187 = arith.cmpf ogt, %185, %186 : vector<16x4xf32>
      %cst_172 = arith.constant 0.000000e+00 : f32
      %188 = vector.broadcast %cst_172 : f32 to vector<16x4xf32>
      %189 = arith.minimumf %185, %188 : vector<16x4xf32>
      %190 = math.exp %189 : vector<16x4xf32>
      %cst_173 = arith.constant 1.000000e+00 : f32
      %191 = vector.broadcast %cst_173 : f32 to vector<16x4xf32>
      %192 = arith.subf %190, %191 : vector<16x4xf32>
      %193 = arith.select %187, %185, %192 : vector<16x4xi1>, vector<16x4xf32>
      %c16 = arith.constant 16 : index
      %c0_174 = arith.constant 0 : index
      %194 = vector.load %arg10[%c16, %c0_174] : memref<32x4xf32, #tpu.memory_space<vmem>>, vector<16x4xf32>
      tpu.vector_store %arg10[%c16, %c0_174], %193 {strides = array<i32>} : memref<32x4xf32, #tpu.memory_space<vmem>>, vector<16x4xf32>,
      %c0_175 = arith.constant 0 : index
      %c0_176 = arith.constant 0 : index
      %195 = vector.load %arg10[%c0_175, %c0_176] : memref<32x4xf32, #tpu.memory_space<vmem>>, vector<32x4xf32>
      %196 = arith.index_cast %18 : i32 to index
      %c0_177 = arith.constant 0 : index
      %c0_178 = arith.constant 0 : index
      %197 = vector.load %arg6[%196, %c0_177, %c0_178] : memref<16x32x4xf32, #tpu.memory_space<vmem>>, vector<1x32x4xf32>
      %198 = vector.shape_cast %197 : vector<1x32x4xf32> to vector<32x4xf32>
      %199 = arith.addf %195, %198 : vector<32x4xf32>
      %200 = arith.index_cast %18 : i32 to index
      %c0_179 = arith.constant 0 : index
      %c0_180 = arith.constant 0 : index
      %201 = vector.load %arg6[%200, %c0_179, %c0_180] : memref<16x32x4xf32, #tpu.memory_space<vmem>>, vector<1x32x4xf32>
      %202 = vector.shape_cast %201 : vector<1x32x4xf32> to vector<32x4xf32>
      %203 = vector.shape_cast %199 : vector<32x4xf32> to vector<1x32x4xf32>
      tpu.vector_store %arg6[%200, %c0_179, %c0_180], %203 {strides = array<i32>} : memref<16x32x4xf32, #tpu.memory_space<vmem>>, vector<1x32x4xf32>,
    }
    %c15_i32_30 = arith.constant 15 : i32
    return
  }
  func.func @transform_0(%arg0: i32) -> (i32, i32, i32) {
    %c0_i32 = arith.constant 0 : i32
    %c0_i32_0 = arith.constant 0 : i32
    %c0_i32_1 = arith.constant 0 : i32
    %c0_i32_2 = arith.constant 0 : i32
    return %c0_i32, %c0_i32_0, %c0_i32_1 : i32, i32, i32
  }
  func.func @transform_1(%arg0: i32) -> (i32, i32, i32) {
    %c0_i32 = arith.constant 0 : i32
    %c0_i32_0 = arith.constant 0 : i32
    %c0_i32_1 = arith.constant 0 : i32
    %c0_i32_2 = arith.constant 0 : i32
    return %c0_i32, %c0_i32_0, %c0_i32_1 : i32, i32, i32
  }
  func.func @transform_2(%arg0: i32) -> (i32, i32, i32) {
    %c0_i32 = arith.constant 0 : i32
    %c0_i32_0 = arith.constant 0 : i32
    %c0_i32_1 = arith.constant 0 : i32
    %c0_i32_2 = arith.constant 0 : i32
    return %c0_i32, %c0_i32_0, %c0_i32_1 : i32, i32, i32
  }
  func.func @transform_3(%arg0: i32) -> (i32, i32, i32) {
    %c0_i32 = arith.constant 0 : i32
    %c0_i32_0 = arith.constant 0 : i32
    %c0_i32_1 = arith.constant 0 : i32
    %c0_i32_2 = arith.constant 0 : i32
    return %c0_i32, %c0_i32_0, %c0_i32_1 : i32, i32, i32
  }
  func.func @transform_4(%arg0: i32) -> (i32, i32, i32) {
    %c0_i32 = arith.constant 0 : i32
    %c0_i32_0 = arith.constant 0 : i32
    %c0_i32_1 = arith.constant 0 : i32
    %c0_i32_2 = arith.constant 0 : i32
    return %c0_i32, %c0_i32_0, %c0_i32_1 : i32, i32, i32
  }
  func.func @transform_5(%arg0: i32) -> (i32, i32, i32) {
    %c0_i32 = arith.constant 0 : i32
    %c0_i32_0 = arith.constant 0 : i32
    %c0_i32_1 = arith.constant 0 : i32
    %c0_i32_2 = arith.constant 0 : i32
    return %c0_i32, %c0_i32_0, %c0_i32_1 : i32, i32, i32
  }
}

module attributes {stable_mosaic.version = 11 : i64} {
  func.func @_tail_kernel(%arg0: i32, %arg1: memref<4x512xf32, #tpu.memory_space<vmem>>, %arg2: memref<4x512xf32, #tpu.memory_space<vmem>>, %arg3: memref<4x512xf32, #tpu.memory_space<vmem>>, %arg4: memref<4x4xf32, #tpu.memory_space<vmem>>, %arg5: memref<4x1xf32, #tpu.memory_space<vmem>>, %arg6: memref<4x1xf32, #tpu.memory_space<vmem>>, %arg7: memref<4x1xf32, #tpu.memory_space<vmem>>, %arg8: memref<4x1xf32, #tpu.memory_space<vmem>>, %arg9: memref<4x1xf32, #tpu.memory_space<vmem>>, %arg10: memref<4x1xf32, #tpu.memory_space<vmem>>, %arg11: memref<4x512xf32, #tpu.memory_space<vmem>>) attributes {dimension_semantics = [#tpu.dimension_semantics<arbitrary>], iteration_bounds = array<i64: 1>, scalar_prefetch = 0 : i64, scratch_operands = 0 : i64, tpu.core_type = #tpu.core_type<tc>, window_params = [{pipeline_mode = #tpu.pipeline_mode<synchronous>, transform_indices = @transform_0, window_bounds = array<i64: 4, 512>}, {pipeline_mode = #tpu.pipeline_mode<synchronous>, transform_indices = @transform_1, window_bounds = array<i64: 4, 512>}, {pipeline_mode = #tpu.pipeline_mode<synchronous>, transform_indices = @transform_2, window_bounds = array<i64: 4, 512>}, {pipeline_mode = #tpu.pipeline_mode<synchronous>, transform_indices = @transform_3, window_bounds = array<i64: 4, 4>}, {pipeline_mode = #tpu.pipeline_mode<synchronous>, transform_indices = @transform_4, window_bounds = array<i64: 4, 1>}, {pipeline_mode = #tpu.pipeline_mode<synchronous>, transform_indices = @transform_5, window_bounds = array<i64: 4, 1>}, {pipeline_mode = #tpu.pipeline_mode<synchronous>, transform_indices = @transform_6, window_bounds = array<i64: 4, 1>}, {pipeline_mode = #tpu.pipeline_mode<synchronous>, transform_indices = @transform_7, window_bounds = array<i64: 4, 1>}, {pipeline_mode = #tpu.pipeline_mode<synchronous>, transform_indices = @transform_8, window_bounds = array<i64: 4, 1>}, {pipeline_mode = #tpu.pipeline_mode<synchronous>, transform_indices = @transform_9, window_bounds = array<i64: 4, 1>}, {pipeline_mode = #tpu.pipeline_mode<synchronous>, transform_indices = @transform_10, window_bounds = array<i64: 4, 512>}]} {
    %c0 = arith.constant 0 : index
    %c0_0 = arith.constant 0 : index
    %0 = vector.load %arg4[%c0, %c0_0] : memref<4x4xf32, #tpu.memory_space<vmem>>, vector<4x4xf32>
    %c0_1 = arith.constant 0 : index
    %c0_2 = arith.constant 0 : index
    %1 = vector.load %arg1[%c0_1, %c0_2] : memref<4x512xf32, #tpu.memory_space<vmem>>, vector<4x512xf32>
    %cst = arith.constant dense<0.000000e+00> : vector<4x512xf32>
    %2 = tpu.matmul %0, %1, %cst {dimension_numbers = #tpu.dot_dimension_numbers<[1], [0], [0], [1], [0, 0, 1, 1], [], []>} : vector<4x4xf32>, vector<4x512xf32>, vector<4x512xf32> -> vector<4x512xf32>
    %c0_3 = arith.constant 0 : index
    %c0_4 = arith.constant 0 : index
    %3 = vector.load %arg7[%c0_3, %c0_4] : memref<4x1xf32, #tpu.memory_space<vmem>>, vector<4x1xf32>
    %c0_5 = arith.constant 0 : index
    %c0_6 = arith.constant 0 : index
    %4 = vector.load %arg8[%c0_5, %c0_6] : memref<4x1xf32, #tpu.memory_space<vmem>>, vector<4x1xf32>
    %cst_7 = arith.constant dense<0.000000e+00> : vector<4xf32>
    %5 = vector.multi_reduction <add>, %2, %cst_7 [1] : vector<4x512xf32> to vector<4xf32>
    %6 = vector.shape_cast %5 : vector<4xf32> to vector<4x1xf32>
    %cst_8 = arith.constant 5.120000e+02 : f32
    %7 = vector.broadcast %cst_8 : f32 to vector<4x1xf32>
    %8 = arith.divf %6, %7 : vector<4x1xf32>
    %9 = vector.broadcast %8 : vector<4x1xf32> to vector<4x512xf32>
    %10 = arith.subf %2, %9 : vector<4x512xf32>
    %11 = arith.mulf %10, %10 : vector<4x512xf32>
    %cst_9 = arith.constant dense<0.000000e+00> : vector<4xf32>
    %12 = vector.multi_reduction <add>, %11, %cst_9 [1] : vector<4x512xf32> to vector<4xf32>
    %13 = vector.shape_cast %12 : vector<4xf32> to vector<4x1xf32>
    %cst_10 = arith.constant 5.120000e+02 : f32
    %14 = vector.broadcast %cst_10 : f32 to vector<4x1xf32>
    %15 = arith.divf %13, %14 : vector<4x1xf32>
    %16 = vector.broadcast %8 : vector<4x1xf32> to vector<4x512xf32>
    %17 = arith.subf %2, %16 : vector<4x512xf32>
    %cst_11 = arith.constant 9.99999974E-6 : f32
    %18 = vector.broadcast %cst_11 : f32 to vector<4x1xf32>
    %19 = arith.addf %15, %18 : vector<4x1xf32>
    %20 = math.rsqrt %19 : vector<4x1xf32>
    %21 = vector.broadcast %20 : vector<4x1xf32> to vector<4x512xf32>
    %22 = arith.mulf %17, %21 : vector<4x512xf32>
    %23 = vector.broadcast %3 : vector<4x1xf32> to vector<4x512xf32>
    %24 = arith.mulf %22, %23 : vector<4x512xf32>
    %25 = vector.broadcast %4 : vector<4x1xf32> to vector<4x512xf32>
    %26 = arith.addf %24, %25 : vector<4x512xf32>
    %c0_12 = arith.constant 0 : index
    %c0_13 = arith.constant 0 : index
    %27 = vector.load %arg2[%c0_12, %c0_13] : memref<4x512xf32, #tpu.memory_space<vmem>>, vector<4x512xf32>
    %c0_14 = arith.constant 0 : index
    %c0_15 = arith.constant 0 : index
    %28 = vector.load %arg3[%c0_14, %c0_15] : memref<4x512xf32, #tpu.memory_space<vmem>>, vector<4x512xf32>
    %29 = arith.addf %27, %28 : vector<4x512xf32>
    %c0_16 = arith.constant 0 : index
    %c0_17 = arith.constant 0 : index
    %30 = vector.load %arg5[%c0_16, %c0_17] : memref<4x1xf32, #tpu.memory_space<vmem>>, vector<4x1xf32>
    %c0_18 = arith.constant 0 : index
    %c0_19 = arith.constant 0 : index
    %31 = vector.load %arg6[%c0_18, %c0_19] : memref<4x1xf32, #tpu.memory_space<vmem>>, vector<4x1xf32>
    %cst_20 = arith.constant dense<0.000000e+00> : vector<4xf32>
    %32 = vector.multi_reduction <add>, %29, %cst_20 [1] : vector<4x512xf32> to vector<4xf32>
    %33 = vector.shape_cast %32 : vector<4xf32> to vector<4x1xf32>
    %cst_21 = arith.constant 5.120000e+02 : f32
    %34 = vector.broadcast %cst_21 : f32 to vector<4x1xf32>
    %35 = arith.divf %33, %34 : vector<4x1xf32>
    %36 = vector.broadcast %35 : vector<4x1xf32> to vector<4x512xf32>
    %37 = arith.subf %29, %36 : vector<4x512xf32>
    %38 = arith.mulf %37, %37 : vector<4x512xf32>
    %cst_22 = arith.constant dense<0.000000e+00> : vector<4xf32>
    %39 = vector.multi_reduction <add>, %38, %cst_22 [1] : vector<4x512xf32> to vector<4xf32>
    %40 = vector.shape_cast %39 : vector<4xf32> to vector<4x1xf32>
    %cst_23 = arith.constant 5.120000e+02 : f32
    %41 = vector.broadcast %cst_23 : f32 to vector<4x1xf32>
    %42 = arith.divf %40, %41 : vector<4x1xf32>
    %43 = vector.broadcast %35 : vector<4x1xf32> to vector<4x512xf32>
    %44 = arith.subf %29, %43 : vector<4x512xf32>
    %cst_24 = arith.constant 9.99999974E-6 : f32
    %45 = vector.broadcast %cst_24 : f32 to vector<4x1xf32>
    %46 = arith.addf %42, %45 : vector<4x1xf32>
    %47 = math.rsqrt %46 : vector<4x1xf32>
    %48 = vector.broadcast %47 : vector<4x1xf32> to vector<4x512xf32>
    %49 = arith.mulf %44, %48 : vector<4x512xf32>
    %50 = vector.broadcast %30 : vector<4x1xf32> to vector<4x512xf32>
    %51 = arith.mulf %49, %50 : vector<4x512xf32>
    %52 = vector.broadcast %31 : vector<4x1xf32> to vector<4x512xf32>
    %53 = arith.addf %51, %52 : vector<4x512xf32>
    %cst_25 = arith.constant 0.000000e+00 : f32
    %54 = vector.broadcast %cst_25 : f32 to vector<4x512xf32>
    %55 = arith.cmpf ogt, %53, %54 : vector<4x512xf32>
    %cst_26 = arith.constant 0.000000e+00 : f32
    %56 = vector.broadcast %cst_26 : f32 to vector<4x512xf32>
    %57 = arith.minimumf %53, %56 : vector<4x512xf32>
    %58 = math.exp %57 : vector<4x512xf32>
    %cst_27 = arith.constant 1.000000e+00 : f32
    %59 = vector.broadcast %cst_27 : f32 to vector<4x512xf32>
    %60 = arith.subf %58, %59 : vector<4x512xf32>
    %61 = arith.select %55, %53, %60 : vector<4x512xi1>, vector<4x512xf32>
    %62 = arith.addf %61, %26 : vector<4x512xf32>
    %c0_28 = arith.constant 0 : index
    %c0_29 = arith.constant 0 : index
    %63 = vector.load %arg9[%c0_28, %c0_29] : memref<4x1xf32, #tpu.memory_space<vmem>>, vector<4x1xf32>
    %c0_30 = arith.constant 0 : index
    %c0_31 = arith.constant 0 : index
    %64 = vector.load %arg10[%c0_30, %c0_31] : memref<4x1xf32, #tpu.memory_space<vmem>>, vector<4x1xf32>
    %cst_32 = arith.constant dense<0.000000e+00> : vector<4xf32>
    %65 = vector.multi_reduction <add>, %62, %cst_32 [1] : vector<4x512xf32> to vector<4xf32>
    %66 = vector.shape_cast %65 : vector<4xf32> to vector<4x1xf32>
    %cst_33 = arith.constant 5.120000e+02 : f32
    %67 = vector.broadcast %cst_33 : f32 to vector<4x1xf32>
    %68 = arith.divf %66, %67 : vector<4x1xf32>
    %69 = vector.broadcast %68 : vector<4x1xf32> to vector<4x512xf32>
    %70 = arith.subf %62, %69 : vector<4x512xf32>
    %71 = arith.mulf %70, %70 : vector<4x512xf32>
    %cst_34 = arith.constant dense<0.000000e+00> : vector<4xf32>
    %72 = vector.multi_reduction <add>, %71, %cst_34 [1] : vector<4x512xf32> to vector<4xf32>
    %73 = vector.shape_cast %72 : vector<4xf32> to vector<4x1xf32>
    %cst_35 = arith.constant 5.120000e+02 : f32
    %74 = vector.broadcast %cst_35 : f32 to vector<4x1xf32>
    %75 = arith.divf %73, %74 : vector<4x1xf32>
    %76 = vector.broadcast %68 : vector<4x1xf32> to vector<4x512xf32>
    %77 = arith.subf %62, %76 : vector<4x512xf32>
    %cst_36 = arith.constant 9.99999974E-6 : f32
    %78 = vector.broadcast %cst_36 : f32 to vector<4x1xf32>
    %79 = arith.addf %75, %78 : vector<4x1xf32>
    %80 = math.rsqrt %79 : vector<4x1xf32>
    %81 = vector.broadcast %80 : vector<4x1xf32> to vector<4x512xf32>
    %82 = arith.mulf %77, %81 : vector<4x512xf32>
    %83 = vector.broadcast %63 : vector<4x1xf32> to vector<4x512xf32>
    %84 = arith.mulf %82, %83 : vector<4x512xf32>
    %85 = vector.broadcast %64 : vector<4x1xf32> to vector<4x512xf32>
    %86 = arith.addf %84, %85 : vector<4x512xf32>
    %cst_37 = arith.constant 0.000000e+00 : f32
    %87 = vector.broadcast %cst_37 : f32 to vector<4x512xf32>
    %88 = arith.cmpf ogt, %86, %87 : vector<4x512xf32>
    %cst_38 = arith.constant 0.000000e+00 : f32
    %89 = vector.broadcast %cst_38 : f32 to vector<4x512xf32>
    %90 = arith.minimumf %86, %89 : vector<4x512xf32>
    %91 = math.exp %90 : vector<4x512xf32>
    %cst_39 = arith.constant 1.000000e+00 : f32
    %92 = vector.broadcast %cst_39 : f32 to vector<4x512xf32>
    %93 = arith.subf %91, %92 : vector<4x512xf32>
    %94 = arith.select %88, %86, %93 : vector<4x512xi1>, vector<4x512xf32>
    %c0_40 = arith.constant 0 : index
    %c0_41 = arith.constant 0 : index
    %95 = vector.load %arg11[%c0_40, %c0_41] : memref<4x512xf32, #tpu.memory_space<vmem>>, vector<4x512xf32>
    tpu.vector_store %arg11[%c0_40, %c0_41], %94 {strides = array<i32>} : memref<4x512xf32, #tpu.memory_space<vmem>>, vector<4x512xf32>,
    return
  }
  func.func @transform_0(%arg0: i32) -> (i32, i32) {
    %c0_i32 = arith.constant 0 : i32
    %c0_i32_0 = arith.constant 0 : i32
    %c0_i32_1 = arith.constant 0 : i32
    return %c0_i32, %c0_i32_0 : i32, i32
  }
  func.func @transform_1(%arg0: i32) -> (i32, i32) {
    %c0_i32 = arith.constant 0 : i32
    %c0_i32_0 = arith.constant 0 : i32
    %c0_i32_1 = arith.constant 0 : i32
    return %c0_i32, %c0_i32_0 : i32, i32
  }
  func.func @transform_2(%arg0: i32) -> (i32, i32) {
    %c0_i32 = arith.constant 0 : i32
    %c0_i32_0 = arith.constant 0 : i32
    %c0_i32_1 = arith.constant 0 : i32
    return %c0_i32, %c0_i32_0 : i32, i32
  }
  func.func @transform_3(%arg0: i32) -> (i32, i32) {
    %c0_i32 = arith.constant 0 : i32
    %c0_i32_0 = arith.constant 0 : i32
    %c0_i32_1 = arith.constant 0 : i32
    return %c0_i32, %c0_i32_0 : i32, i32
  }
  func.func @transform_4(%arg0: i32) -> (i32, i32) {
    %c0_i32 = arith.constant 0 : i32
    %c0_i32_0 = arith.constant 0 : i32
    %c0_i32_1 = arith.constant 0 : i32
    return %c0_i32, %c0_i32_0 : i32, i32
  }
  func.func @transform_5(%arg0: i32) -> (i32, i32) {
    %c0_i32 = arith.constant 0 : i32
    %c0_i32_0 = arith.constant 0 : i32
    %c0_i32_1 = arith.constant 0 : i32
    return %c0_i32, %c0_i32_0 : i32, i32
  }
  func.func @transform_6(%arg0: i32) -> (i32, i32) {
    %c0_i32 = arith.constant 0 : i32
    %c0_i32_0 = arith.constant 0 : i32
    %c0_i32_1 = arith.constant 0 : i32
    return %c0_i32, %c0_i32_0 : i32, i32
  }
  func.func @transform_7(%arg0: i32) -> (i32, i32) {
    %c0_i32 = arith.constant 0 : i32
    %c0_i32_0 = arith.constant 0 : i32
    %c0_i32_1 = arith.constant 0 : i32
    return %c0_i32, %c0_i32_0 : i32, i32
  }
  func.func @transform_8(%arg0: i32) -> (i32, i32) {
    %c0_i32 = arith.constant 0 : i32
    %c0_i32_0 = arith.constant 0 : i32
    %c0_i32_1 = arith.constant 0 : i32
    return %c0_i32, %c0_i32_0 : i32, i32
  }
  func.func @transform_9(%arg0: i32) -> (i32, i32) {
    %c0_i32 = arith.constant 0 : i32
    %c0_i32_0 = arith.constant 0 : i32
    %c0_i32_1 = arith.constant 0 : i32
    return %c0_i32, %c0_i32_0 : i32, i32
  }
  func.func @transform_10(%arg0: i32) -> (i32, i32) {
    %c0_i32 = arith.constant 0 : i32
    %c0_i32_0 = arith.constant 0 : i32
    %c0_i32_1 = arith.constant 0 : i32
    return %c0_i32, %c0_i32_0 : i32, i32
  }
}

</mosaic_0001>

<bundles_post_ra>
// kernel: directional_conv_path.3
= control target key start
LH: loop header
LB: loop body
LE: loop exit
PB: predicated region body
PF: predicated region fallthrough
CT: control target
= control target key end

     0   :  { %vm51_vm0 = vcmask 1043456   ;;  %vm47_vm1 = vcmask 31744   ;;  %v490_v24 = vmov 512.0   ;;  %v491_v31 = vmov 0   ;;  %s674_s0 = inlined_call_operand.vmem [shape: f32[4,512], index: 0, kind: input, shape index: {}]   ;;  %s675_s1 = inlined_call_operand.vmem [shape: f32[4,512], index: 1, kind: input, shape index: {}]   ;;  %s676_s2 = inlined_call_operand.vmem [shape: f32[4,512], index: 2, kind: input, shape index: {}]   ;;  %s677_s3 = inlined_call_operand.vmem [shape: f32[4,4], index: 3, kind: input, shape index: {}]   ;;  %s678_s4 = inlined_call_operand.vmem [shape: f32[4,1], index: 4, kind: input, shape index: {}]   ;;  %s679_s5 = inlined_call_operand.vmem [shape: f32[4,1], index: 5, kind: input, shape index: {}]   ;;  %s680_s6 = inlined_call_operand.vmem [shape: f32[4,1], index: 6, kind: input, shape index: {}]   ;;  %s681_s8 = inlined_call_operand.vmem [shape: f32[4,1], index: 8, kind: input, shape index: {}]   ;;  %s682_s7 = inlined_call_operand.vmem [shape: f32[4,1], index: 7, kind: input, shape index: {}]   ;;  %s683_s9 = inlined_call_operand.vmem [shape: f32[4,1], index: 9, kind: input, shape index: {}]   ;;  %s684_s10 = inlined_call_operand.vmem [shape: f32[4,512], index: 10, kind: output, shape index: {}]  }
   0x1   :  { %v37_v0 = vld [vmem:[%s674_s0 + $0x8] sm:$0xff]  ;;  %v36_v1 = vld [vmem:[%s674_s0] sm:$0xff]  ;;  %474 = vrcp.f32 %v490_v24  ;;  %471 = vset.pattern.permute.xlu2 %v491_v31  ;;  %472 = vset.pattern.permute.xlu0 %v491_v31  ;;  %v492_v32 = vmov 839922192  }
   0x2   :  { %42 = vst [vmem:[#allocation1 + $0x10] ss:$2 sm:$0xff] %v37_v0  ;;  %v211_v2 = vld [vmem:[%s675_s1 + $0x8] sm:$0xff]  ;;  %v210_v4 = vld [vmem:[%s675_s1] sm:$0xff]  ;;  %v243_v33 = vunpack.c.l.s4 %v492_v32  ;;  %473 = vset.pattern.permute.xlu1 %v491_v31 }
   0x3   :  { %v213_v3 = vld [vmem:[%s676_s2 + $0x8] sm:$0xff]  ;;  %40 = vst [vmem:[#allocation1] ss:$2 sm:$0xff] %v36_v1  ;;  %v212_v5 = vld [vmem:[%s676_s2] sm:$0xff] }
   0x4   :  { %v566_v6 = vadd.f32 %v213_v3, %v211_v2  ;;  %v35_v7 = vld [vmem:[%s677_s3] sm:$0xf]  ;;  %v571_v8 = vadd.f32 %v212_v5, %v210_v4  ;;  %v590_v40 = vunpack.c.0.s8 %v243_v33 }
   0x5   :  { %v216_v29 = vld [vmem:[%s678_s4] sm:$0xf] }
   0x6   :  { %295 = vperm.xlu2 %471, %v216_v29   ;;  %v217_v43 = vld [vmem:[%s679_s5] sm:$0xf] }
   0x7   :  { %v475_v25 = vpop.eup %474  ;;  %v140_v4 = vld [vmem:[%s680_s6] sm:$0xf] }
   0x8   :  { %v152_v26 = vmul.f32 512.0, %v475_v25  ;;  %vm156_vm2 = vweird.f32 %v475_v25 }
   0x9   :  { %v45_v9 = vld.sshfl [vmem:[#allocation1 + $0x10] sm:$0xff pattern:$0x75316420]  ;;  %v46_v10 = vld.sshfl [vmem:[#allocation1 + $0x18] sm:$0xff pattern:$0x75316420] }
   0xa   :  { %460 = vmatpush.msk.msra.mxu2 %vm51_vm0, %v45_v9  ;;  %462 = vmatpush.msk.msra.mxu3 %vm51_vm0, %v46_v10  ;;  %222 = vst [vmem:[#allocation1 + $0x10] ss:$2 sm:$0xff] %v566_v6  ;;  %v43_v11 = vld.sshfl [vmem:[#allocation1] sm:$0xff pattern:$0x75316420]  ;;  %v153_v27 = vsub.f32 1.0, %v152_v26 }
   0xb   :  { %461 = vmatmul.msk.f32.vlgmr.msra.gmra.mxu2 %vm47_vm1, %v35_v7  ;;  %463 = vmatmul.msk.f32.vlgmr.msra.gmra.mxu3 %vm47_vm1, %v35_v7  ;;  %v44_v12 = vld.sshfl [vmem:[#allocation1 + $0x8] sm:$0xff pattern:$0x75316420] }
   0xc   :  { %456 = vmatpush.msk.msra.mxu0 %vm51_vm0, %v43_v11  ;;  %458 = vmatpush.msk.msra.mxu1 %vm51_vm0, %v44_v12  ;;  %220 = vst [vmem:[#allocation1] ss:$2 sm:$0xff] %v571_v8  ;;  %v154_v28 = vmul.f32 %v475_v25, %v153_v27 }
   0xd   :  { %457 = vmatmul.msk.f32.vlgmr.msra.gmra.mxu0 %vm47_vm1, %v35_v7  ;;  %459 = vmatmul.msk.f32.vlgmr.msra.gmra.mxu1 %vm47_vm1, %v35_v7 }
   0xe   :  { %v155_v30 = vadd.f32 %v475_v25, %v154_v28  ;;  %306 = vperm.xlu2 %471, %v217_v43  }
  0x10   :  { %v588_v38 = vsel %vm156_vm2, %v475_v25, %v155_v30 }
  0x11   :  { %v225_v13 = vld.sshfl [vmem:[#allocation1 + $0x10] sm:$0xff pattern:$0x75316420]  ;;  %v226_v14 = vld.sshfl [vmem:[#allocation1 + $0x18] sm:$0xff pattern:$0x75316420] }
  0x12   :  { %v234_v19 = vsel %vm51_vm0, %v225_v13, 0.0  ;;  %v236_v21 = vsel %vm51_vm0, %v226_v14, 0.0 }
  0x13   :  { %v223_v15 = vld.sshfl [vmem:[#allocation1] sm:$0xff pattern:$0x75316420]  ;;  %v224_v16 = vld.sshfl [vmem:[#allocation1 + $0x8] sm:$0xff pattern:$0x75316420] }
  0x14   :  { %v231_v17 = vsel %vm51_vm0, %v223_v15, 0.0  ;;  %v232_v18 = vsel %vm51_vm0, %v224_v16, 0.0 }
  0x15   :  { %v233_v20 = vadd.f32 %v232_v18, %v231_v17  ;;  %v339_v17 = vld [vmem:[%s681_s8] sm:$0xf] }
  0x17   :  { %v235_v22 = vadd.f32 %v234_v19, %v233_v20 }
  0x19   :  { %v237_v23 = vadd.f32 %v236_v21, %v235_v22  ;;  %v141_v21 = vld [vmem:[%s682_s7] sm:$0xf] }
  0x1b   :  { %238 = vadd.xlane.f32.xlu0 %v237_v23 }
  0x60   :  { %v296_v31 = vpop.permute.xlu2 %295 }
  0x8a   :  { %v97_v34 = vpop.f32.mrf.mxu1  ;;  %v77_v35 = vpop.f32.mrf.mxu0 }
  0x8b   :  { %v143_v36 = vsel %vm51_vm0, %v97_v34, 0.0  ;;  %v142_v37 = vsel %vm51_vm0, %v77_v35, 0.0 }
  0x8c   :  { %v144_v39 = vadd.f32 %v143_v36, %v142_v37  ;;  %v307_v37 = vpop.permute.xlu2 %306 }
  0x8e   :  { %v239_v41 = vpop.xlane.xlu0 %238  ;;  %v117_v42 = vpop.f32.mrf.mxu2 }
  0x8f   :  { %v240_v44 = vmul.f32 %v239_v41, %v588_v38  ;;  %v145_v45 = vsel %vm51_vm0, %v117_v42, 0.0  ;;  %v137_v46 = vpop.f32.mrf.mxu3 }
  0x90   :  { %v146_v47 = vadd.f32 %v145_v45, %v144_v39  ;;  %v147_v48 = vsel %vm51_vm0, %v137_v46, 0.0 }
  0x91   :  { %v245_v49 = vperm.slane %v240_v44, %v590_v40 }
  0x92   :  { %v148_v50 = vadd.f32 %v147_v48, %v146_v47 }
  0x93   :  { %v247_v51 = vsub.f32 %v571_v8, %v245_v49  ;;  %v601_v52 = vsub.f32 %v566_v6, %v245_v49 }
  0x94   :  { %149 = vadd.xlane.f32.xlu0 %v148_v50 }
  0x95   :  { %v249_v53 = vmul.f32 %v247_v51, %v247_v51  ;;  %v250_v54 = vmul.f32 %v601_v52, %v601_v52 }
  0x97   :  { %253 = vst [vmem:[#allocation1] ss:$2 sm:$0xff] %v249_v53 }
  0x98   :  { %255 = vst [vmem:[#allocation1 + $0x10] ss:$2 sm:$0xff] %v250_v54 }
  0x9e   :  { %v256_v55 = vld.sshfl [vmem:[#allocation1] sm:$0xff pattern:$0x75316420]  ;;  %v257_v56 = vld.sshfl [vmem:[#allocation1 + $0x8] sm:$0xff pattern:$0x75316420] }
  0x9f   :  { %v258_v57 = vld.sshfl [vmem:[#allocation1 + $0x10] sm:$0xff pattern:$0x75316420]  ;;  %v259_v58 = vld.sshfl [vmem:[#allocation1 + $0x18] sm:$0xff pattern:$0x75316420] }
  0xa0   :  { %v264_v59 = vsel %vm51_vm0, %v256_v55, 0.0  ;;  %v265_v60 = vsel %vm51_vm0, %v257_v56, 0.0  ;;  %v267_v61 = vsel %vm51_vm0, %v258_v57, 0.0  ;;  %v269_v63 = vsel %vm51_vm0, %v259_v58, 0.0 }
  0xa1   :  { %v266_v62 = vadd.f32 %v265_v60, %v264_v59 }
  0xa3   :  { %v268_v0 = vadd.f32 %v267_v61, %v266_v62 }
  0xa5   :  { %v270_v1 = vadd.f32 %v269_v63, %v268_v0 }
  0xa7   :  { %271 = vadd.xlane.f32.xlu1 %v270_v1 }
  0xa8   :  { %194 = vperm.xlu0 %472, %v140_v4  }
  0xb0   :  { %418 = vperm.xlu0 %472, %v339_v17  }
 0x107   :  { %v150_v2 = vpop.xlane.xlu0 %149 }
 0x108   :  { %v158_v3 = vmul.f32 %v588_v38, %v150_v2 }
 0x10a   :  { %v613_v5 = vsub.f32 %v77_v35, %v158_v3  ;;  %v615_v6 = vsub.f32 %v97_v34, %v158_v3  ;;  %v617_v7 = vsub.f32 %v117_v42, %v158_v3  ;;  %v619_v8 = vsub.f32 %v137_v46, %v158_v3 }
 0x10b   :  { %v300_v35 = vperm.slane %v296_v31, %v590_v40  ;;  %v311_v42 = vperm.slane %v307_v37, %v590_v40 }
 0x10c   :  { %v163_v9 = vmul.f32 %v613_v5, %v613_v5  ;;  %v164_v10 = vmul.f32 %v615_v6, %v615_v6  ;;  %v165_v11 = vmul.f32 %v617_v7, %v617_v7  ;;  %v166_v12 = vmul.f32 %v619_v8, %v619_v8 }
 0x10e   :  { %v167_v13 = vsel %vm51_vm0, %v163_v9, 0.0  ;;  %v168_v14 = vsel %vm51_vm0, %v164_v10, 0.0  ;;  %v170_v16 = vsel %vm51_vm0, %v165_v11, 0.0  ;;  %v172_v19 = vsel %vm51_vm0, %v166_v12, 0.0 }
 0x10f   :  { %v169_v15 = vadd.f32 %v168_v14, %v167_v13 }
 0x111   :  { %v171_v18 = vadd.f32 %v170_v16, %v169_v15 }
 0x113   :  { %v173_v20 = vadd.f32 %v172_v19, %v171_v18 }
 0x115   :  { %174 = vadd.xlane.f32.xlu1 %v173_v20 }
 0x11a   :  { %v272_v22 = vpop.xlane.xlu1 %271  ;;  %v195_v1 = vpop.permute.xlu0 %194 }
 0x11b   :  { %v273_v23 = vmul.f32 %v272_v22, %v588_v38 }
 0x11d   :  { %v274_v24 = vadd.f32 1e-05, %v273_v23 }
 0x11f   :  { %476 = vrsqrt.f32 %v274_v24  ;;  %vm281_vm3 = vweird.f32 %v274_v24 }
 0x125   :  { %v477_v25 = vpop.eup %476 }
 0x126   :  { %v276_v26 = vmul.f32 %v477_v25, %v274_v24  ;;  %vm282_vm4 = vweird.f32 %v477_v25 }
 0x127   :  { %vm283_vm5 = vmor %vm281_vm3, %vm282_vm4 }
 0x128   :  { %v277_v27 = vmul.f32 %v477_v25, %v276_v26 }
 0x12a   :  { %v278_v28 = vmul.f32 0.5, %v277_v27 }
 0x12c   :  { %v279_v29 = vsub.f32 1.5, %v278_v28 }
 0x12e   :  { %203 = vperm.xlu1 %473, %v141_v21   ;;  %v280_v30 = vmul.f32 %v477_v25, %v279_v29 }
 0x130   :  { %v284_v32 = vsel %vm283_vm5, %v477_v25, %v280_v30 }
 0x131   :  { %v289_v33 = vperm.slane %v284_v32, %v590_v40  ;;  %v340_v32 = vld [vmem:[%s683_s9] sm:$0xf] }
 0x133   :  { %v291_v34 = vmul.f32 %v289_v33, %v247_v51  ;;  %v292_v36 = vmul.f32 %v289_v33, %v601_v52 }
 0x135   :  { %v302_v41 = vmul.f32 %v300_v35, %v291_v34  ;;  %v303_v44 = vmul.f32 %v300_v35, %v292_v36 }
 0x137   :  { %v313_v46 = vadd.f32 %v311_v42, %v302_v41  ;;  %v314_v47 = vadd.f32 %v311_v42, %v303_v44 }
 0x139   :  { %v317_v48 = vmin.f32 %v313_v46, 0.0  ;;  %v318_v49 = vmin.f32 %v314_v47, 0.0  ;;  %vm315_vm9 = vcmp.gt.f32.partialorder %v313_v46, 0.0  ;;  %vm316_vm10 = vcmp.gt.f32.partialorder %v314_v47, 0.0 }
 0x13b   :  { %v319_v53 = vmul.f32 1.442695, %v317_v48  ;;  %v321_v54 = vmul.f32 1.442695, %v318_v49 }
 0x188   :  { %v175_v39 = vpop.xlane.xlu1 %174 }
 0x189   :  { %v176_v43 = vmul.f32 %v175_v39, %v588_v38 }
 0x18b   :  { %v177_v45 = vadd.f32 1e-05, %v176_v43 }
 0x18d   :  { %478 = vrsqrt.f32 %v177_v45  ;;  %vm184_vm7 = vweird.f32 %v177_v45 }
 0x18e   :  { %480 = vpow2.f32 %v319_v53 }
 0x18f   :  { %482 = vpow2.f32 %v321_v54 }
 0x193   :  { %v479_v50 = vpop.eup %478 }
 0x194   :  { %v179_v51 = vmul.f32 %v479_v50, %v177_v45  ;;  %vm185_vm6 = vweird.f32 %v479_v50  ;;  %v481_v59 = vpop.eup %480 }
 0x195   :  { %vm186_vm8 = vmor %vm184_vm7, %vm185_vm6  ;;  %v483_v0 = vpop.eup %482  ;;  %v464_v11 = vadd.f32 -1.0, %v481_v59 }
 0x196   :  { %v180_v55 = vmul.f32 %v479_v50, %v179_v51  ;;  %v465_v12 = vadd.f32 -1.0, %v483_v0 }
 0x198   :  { %v181_v52 = vmul.f32 0.5, %v180_v55 }
 0x19a   :  { %v182_v56 = vsub.f32 1.5, %v181_v52 }
 0x19c   :  { %v183_v57 = vmul.f32 %v479_v50, %v182_v56 }
 0x19e   :  { %v187_v58 = vsel %vm186_vm8, %v479_v50, %v183_v57 }
 0x19f   :  { %v188_v60 = vmul.f32 %v187_v58, %v613_v5  ;;  %v189_v61 = vmul.f32 %v187_v58, %v615_v6  ;;  %v190_v62 = vmul.f32 %v187_v58, %v617_v7  ;;  %v191_v63 = vmul.f32 %v187_v58, %v619_v8 }
 0x1a0   :  { %v204_v2 = vpop.permute.xlu1 %203  ;;  %v325_v6 = vsel %vm315_vm9, %v313_v46, %v464_v11  ;;  %v326_v7 = vsel %vm316_vm10, %v314_v47, %v465_v12 }
 0x1a1   :  { %v197_v3 = vmul.f32 %v195_v1, %v188_v60  ;;  %v198_v4 = vmul.f32 %v195_v1, %v189_v61  ;;  %v199_v9 = vmul.f32 %v195_v1, %v190_v62  ;;  %v200_v10 = vmul.f32 %v195_v1, %v191_v63  ;;  %v419_v62 = vpop.permute.xlu0 %418 }
 0x1a3   :  { %v207_v13 = vadd.f32 %v204_v2, %v198_v4  ;;  %v209_v14 = vadd.f32 %v204_v2, %v200_v10  ;;  %v206_v15 = vadd.f32 %v204_v2, %v197_v3  ;;  %v208_v16 = vadd.f32 %v204_v2, %v199_v9 }
 0x1a4   :  { %v423_v2 = vperm.slane %v419_v62, %v590_v40 }
 0x1a5   :  { %v331_v5 = vrot.slane %v207_v13, 4  ;;  %v332_v17 = vrot.slane %v209_v14, 4 }
 0x1a7   :  { %v333_v8 = vsel %vm51_vm0, %v206_v15, %v331_v5  ;;  %v334_v18 = vsel %vm51_vm0, %v208_v16, %v332_v17 }
 0x1a8   :  { %v337_v19 = vadd.f32 %v333_v8, %v325_v6  ;;  %v338_v20 = vadd.f32 %v334_v18, %v326_v7 }
 0x1aa   :  { %343 = vst [vmem:[#allocation1] ss:$2 sm:$0xff] %v337_v19 }
 0x1ab   :  { %345 = vst [vmem:[#allocation1 + $0x10] ss:$2 sm:$0xff] %v338_v20 }
 0x1b1   :  { %v346_v21 = vld.sshfl [vmem:[#allocation1] sm:$0xff pattern:$0x75316420]  ;;  %v347_v22 = vld.sshfl [vmem:[#allocation1 + $0x8] sm:$0xff pattern:$0x75316420] }
 0x1b2   :  { %v348_v23 = vld.sshfl [vmem:[#allocation1 + $0x10] sm:$0xff pattern:$0x75316420]  ;;  %v354_v24 = vsel %vm51_vm0, %v346_v21, 0.0  ;;  %v355_v25 = vsel %vm51_vm0, %v347_v22, 0.0 }
 0x1b3   :  { %v349_v26 = vld.sshfl [vmem:[#allocation1 + $0x18] sm:$0xff pattern:$0x75316420]  ;;  %v356_v27 = vadd.f32 %v355_v25, %v354_v24  ;;  %v357_v28 = vsel %vm51_vm0, %v348_v23, 0.0 }
 0x1b4   :  { %v359_v30 = vsel %vm51_vm0, %v349_v26, 0.0 }
 0x1b5   :  { %v358_v29 = vadd.f32 %v357_v28, %v356_v27 }
 0x1b7   :  { %v360_v31 = vadd.f32 %v359_v30, %v358_v29 }
 0x1b9   :  { %361 = vadd.xlane.f32.xlu2 %v360_v31 }
 0x1d1   :  { %429 = vperm.xlu2 %471, %v340_v32  }
 0x22c   :  { %v362_v33 = vpop.xlane.xlu2 %361 }
 0x22d   :  { %v363_v34 = vmul.f32 %v362_v33, %v588_v38 }
 0x22f   :  { %v368_v35 = vperm.slane %v363_v34, %v590_v40 }
 0x231   :  { %v370_v36 = vsub.f32 %v337_v19, %v368_v35  ;;  %v371_v37 = vsub.f32 %v338_v20, %v368_v35 }
 0x233   :  { %v372_v39 = vmul.f32 %v370_v36, %v370_v36  ;;  %v373_v41 = vmul.f32 %v371_v37, %v371_v37 }
 0x234   :  { %v430_v1 = vpop.permute.xlu2 %429 }
 0x235   :  { %376 = vst [vmem:[#allocation1] ss:$2 sm:$0xff] %v372_v39  ;;  %v434_v4 = vperm.slane %v430_v1, %v590_v40 }
 0x236   :  { %378 = vst [vmem:[#allocation1 + $0x10] ss:$2 sm:$0xff] %v373_v41 }
 0x23c   :  { %v379_v42 = vld.sshfl [vmem:[#allocation1] sm:$0xff pattern:$0x75316420]  ;;  %v380_v43 = vld.sshfl [vmem:[#allocation1 + $0x8] sm:$0xff pattern:$0x75316420] }
 0x23d   :  { %v381_v44 = vld.sshfl [vmem:[#allocation1 + $0x10] sm:$0xff pattern:$0x75316420]  ;;  %v387_v45 = vsel %vm51_vm0, %v379_v42, 0.0  ;;  %v388_v46 = vsel %vm51_vm0, %v380_v43, 0.0 }
 0x23e   :  { %v382_v47 = vld.sshfl [vmem:[#allocation1 + $0x18] sm:$0xff pattern:$0x75316420]  ;;  %v389_v48 = vadd.f32 %v388_v46, %v387_v45  ;;  %v390_v49 = vsel %vm51_vm0, %v381_v44, 0.0 }
 0x23f   :  { %v392_v51 = vsel %vm51_vm0, %v382_v47, 0.0 }
 0x240   :  { %v391_v50 = vadd.f32 %v390_v49, %v389_v48 }
 0x242   :  { %v393_v53 = vadd.f32 %v392_v51, %v391_v50 }
 0x244   :  { %394 = vadd.xlane.f32.xlu1 %v393_v53 }
 0x2b7   :  { %v395_v54 = vpop.xlane.xlu1 %394 }
 0x2b8   :  { %v396_v55 = vmul.f32 %v395_v54, %v588_v38 }
 0x2ba   :  { %v397_v52 = vadd.f32 1e-05, %v396_v55 }
 0x2bc   :  { %484 = vrsqrt.f32 %v397_v52  ;;  %vm404_vm12 = vweird.f32 %v397_v52 }
 0x2c2   :  { %v485_v56 = vpop.eup %484 }
 0x2c3   :  { %v399_v57 = vmul.f32 %v485_v56, %v397_v52  ;;  %vm405_vm11 = vweird.f32 %v485_v56 }
 0x2c4   :  { %vm406_vm13 = vmor %vm404_vm12, %vm405_vm11 }
 0x2c5   :  { %v400_v58 = vmul.f32 %v485_v56, %v399_v57 }
 0x2c7   :  { %v401_v59 = vmul.f32 0.5, %v400_v58 }
 0x2c9   :  { %v402_v60 = vsub.f32 1.5, %v401_v59 }
 0x2cb   :  { %v403_v61 = vmul.f32 %v485_v56, %v402_v60 }
 0x2cd   :  { %v407_v63 = vsel %vm406_vm13, %v485_v56, %v403_v61 }
 0x2ce   :  { %v412_v0 = vperm.slane %v407_v63, %v590_v40 }
 0x2d0   :  { %v414_v3 = vmul.f32 %v412_v0, %v370_v36  ;;  %v415_v38 = vmul.f32 %v412_v0, %v371_v37 }
 0x2d2   :  { %v425_v9 = vmul.f32 %v423_v2, %v414_v3  ;;  %v426_v10 = vmul.f32 %v423_v2, %v415_v38 }
 0x2d4   :  { %v436_v11 = vadd.f32 %v434_v4, %v425_v9  ;;  %v437_v12 = vadd.f32 %v434_v4, %v426_v10 }
 0x2d6   :  { %v440_v13 = vmin.f32 %v436_v11, 0.0  ;;  %v441_v14 = vmin.f32 %v437_v12, 0.0  ;;  %vm438_vm14 = vcmp.gt.f32.partialorder %v436_v11, 0.0  ;;  %vm439_vm15 = vcmp.gt.f32.partialorder %v437_v12, 0.0 }
 0x2d8   :  { %v442_v15 = vmul.f32 1.442695, %v440_v13  ;;  %v444_v16 = vmul.f32 1.442695, %v441_v14 }
 0x2da   :  { %486 = vpow2.f32 %v442_v15 }
 0x2db   :  { %488 = vpow2.f32 %v444_v16 }
 0x2e0   :  { %v487_v5 = vpop.eup %486 }
 0x2e1   :  { %v489_v17 = vpop.eup %488  ;;  %v466_v6 = vadd.f32 -1.0, %v487_v5 }
 0x2e2   :  { %v467_v7 = vadd.f32 -1.0, %v489_v17 }
 0x2e3   :  { %v448_v8 = vsel %vm438_vm14, %v436_v11, %v466_v6 }
 0x2e4   :  { %v449_v18 = vsel %vm439_vm15, %v437_v12, %v467_v7  ;;  %450 = vst [vmem:[%s684_s10] sm:$0xff] %v448_v8 }
 0x2e5   :  { %451 = vst [vmem:[%s684_s10 + $0x8] sm:$0xff] %v449_v18 }

// kernel: directional_conv_path.2
= control target key start
LH: loop header
LB: loop body
LE: loop exit
PB: predicated region body
PF: predicated region fallthrough
CT: control target
= control target key end

     0   :  { %vm19_vm0 = vcmask 31744   ;;  %v3782_v0 = vmov 0.0   ;;  %s3858_s9 = smov 1   ;;  %s4554_s1 = inlined_call_operand.vmem [shape: f32[16,32,4], index: 1, kind: input, shape index: {}]   ;;  %s4555_s2 = inlined_call_operand.vmem [shape: f32[9,4,4], index: 2, kind: input, shape index: {}]   ;;  %s4556_s3 = inlined_call_operand.vmem [shape: f32[9,4,4], index: 3, kind: input, shape index: {}]   ;;  %s4557_s5 = inlined_call_operand.vmem [shape: f32[16,32,4], index: 5, kind: output, shape index: {1}]   ;;  %s4558_s0 = inlined_call_operand.vmem [shape: f32[16,32,4], index: 0, kind: input, shape index: {}]   ;;  %s4559_s4 = inlined_call_operand.vmem [shape: f32[16,32,4], index: 4, kind: output, shape index: {0}]  }
   0x1   :  { %20 = vst.msk [vmem:[#allocation2] sm:$0xff] %vm19_vm0, %v3782_v0  ;;  %v28_v1 = vld [vmem:[%s4558_s0] sm:$0xff]  ;;  %v29_v2 = vld [vmem:[%s4558_s0 + $0x8] sm:$0xff]  ;;  %v30_v3 = vld [vmem:[%s4558_s0 + $0x10] sm:$0xff] }
   0x2   :  { %21 = vst.msk [vmem:[#allocation2 + $0x8] sm:$0xff] %vm19_vm0, %v3782_v0  ;;  %v31_v4 = vld [vmem:[%s4558_s0 + $0x18] sm:$0xff] }
   0x3   :  { %22 = vst.msk [vmem:[#allocation2 + $0x10] sm:$0xff] %vm19_vm0, %v3782_v0 }
   0x4   :  { %23 = vst.msk [vmem:[#allocation2 + $0x18] sm:$0xff] %vm19_vm0, %v3782_v0 }
   0x5   :  { %24 = vst.msk [vmem:[#allocation2 + $0x20] sm:$0xff] %vm19_vm0, %v3782_v0 }
   0x6   :  { %25 = vst.msk [vmem:[#allocation2 + $0x28] sm:$0xff] %vm19_vm0, %v3782_v0 }
   0x7   :  { %26 = vst.msk [vmem:[#allocation2 + $0x30] sm:$0xff] %vm19_vm0, %v3782_v0 }
   0x8   :  { %27 = vst.msk [vmem:[#allocation2 + $0x38] sm:$0xff] %vm19_vm0, %v3782_v0 }
   0x9   :  { %32 = vst.msk [vmem:[%s4559_s4] sm:$0xff] %vm19_vm0, %v28_v1 }
   0xa   :  { %33 = vst.msk [vmem:[%s4559_s4 + $0x8] sm:$0xff] %vm19_vm0, %v29_v2 }
   0xb   :  { %34 = vst.msk [vmem:[%s4559_s4 + $0x10] sm:$0xff] %vm19_vm0, %v30_v3 }
   0xc   :  { %35 = vst.msk [vmem:[%s4559_s4 + $0x18] sm:$0xff] %vm19_vm0, %v31_v4 }
   0xd LB: > { %v3354_v5 = vld [vmem:[%s4555_s2 + $0x4] sm:$0xf]  ;;  %vm67_vm1 = vcmask 1043456   ;;  %v56_v6 = vld [vmem:[%s4555_s2] sm:$0xf]  ;;  %s3352_s18 = sadd.s32 4294967295, %s3768_s9  ;;  %s3768_s9 = sphi %s3858_s9, %s41_s9  }
   0xe   : > { %3658 = vmatpush.msk.msra.mxu2 %vm67_vm1, %v3354_v5  ;;  %3659 = vmatpush.msk.msra.mxu3 %vm67_vm1, %v56_v6  ;;  %v3361_v7 = vld [vmem:[%s4555_s2 + $0x8] sm:$0xf]  ;;  %v3365_v8 = vld [vmem:[%s4555_s2 + $0xc] sm:$0xf]  ;;  %v3369_v9 = vld [vmem:[%s4555_s2 + $0x10] sm:$0xf] }
   0xf   : > { %s3353_s21 = sshll.u32 %s3352_s18, 5  ;;  %3355 = vmatpush.msk.msra.mxu0 %vm67_vm1, %v3354_v5  ;;  %3358 = vmatpush.msk.msra.mxu1 %vm67_vm1, %v56_v6  ;;  %v3373_v10 = vld [vmem:[%s4555_s2 + $0x14] sm:$0xf]  ;;  %v3377_v14 = vld [vmem:[%s4555_s2 + $0x18] sm:$0xf]  ;;  %s3428_s27 = sshll.u32 %s3768_s9, 5 }
  0x10   : > { %3362 = vmatpush.msk.msrb.mxu2 %vm67_vm1, %v3361_v7  ;;  %3366 = vmatpush.msk.msrb.mxu3 %vm67_vm1, %v3365_v8  ;;  %s44_s26 = scalar_lea.vmem %s4559_s4, %s3353_s21  ;;  %v3381_v15 = vld [vmem:[%s4555_s2 + $0x1c] sm:$0xf]  ;;  %v3385_v18 = vld [vmem:[%s4555_s2 + $0x20] sm:$0xf]  ;;  %v3391_v21 = vld [vmem:[%s4555_s2 + $0x4] sm:$0xf]  ;;  %s4001_s30 = scalar_lea.vmem %s4558_s0, %s3428_s27 }
  0x11   : > { %3370 = vmatpush.msk.msrb.mxu0 %vm67_vm1, %v3369_v9  ;;  %3374 = vmatpush.msk.msrb.mxu1 %vm67_vm1, %v3373_v10  ;;  %v452_v27 = vld [vmem:[%s4555_s2] sm:$0xf]  ;;  %v3398_v28 = vld [vmem:[%s4555_s2 + $0x8] sm:$0xf]  ;;  %v3402_v29 = vld [vmem:[%s4555_s2 + $0xc] sm:$0xf]  ;;  %s4008_s8 = scalar_lea.vmem %s4559_s4, %s3428_s27 }
  0x12   : > { %v3406_v30 = vld [vmem:[%s4555_s2 + $0x10] sm:$0xf]  ;;  %v3410_v38 = vld [vmem:[%s4555_s2 + $0x14] sm:$0xf]  ;;  %v3414_v39 = vld [vmem:[%s4555_s2 + $0x18] sm:$0xf] }
  0x13   : > { %v45_v11 = vld [vmem:[%s44_s26] sm:$0xff]  ;;  %v46_v12 = vld [vmem:[%s44_s26 + $0x8] sm:$0xff]  ;;  %v47_v13 = vld [vmem:[%s44_s26 + $0x10] sm:$0xff]  ;;  %s41_s9 = sadd.s32 1, %s3768_s9  }
  0x14   : > { %49 = vst.msk [vmem:[#allocation2 + $0x8] sm:$0xff] %vm19_vm0, %v45_v11  ;;  %v48_v24 = vld [vmem:[%s44_s26 + $0x18] sm:$0xff]  ;;  %v3422_v41 = vld [vmem:[%s4555_s2 + $0x20] sm:$0xf]  ;;  %p38_p0 = scmp.ge.s32.totalorder %s41_s9, 16  }
  0x15   : > { %50 = vst.msk [vmem:[#allocation2 + $0x10] sm:$0xff] %vm19_vm0, %v46_v12  ;;  %v3418_v40 = vld [vmem:[%s4555_s2 + $0x1c] sm:$0xf]  ;;  %s4025_s10 = smov (%p38_p0), 0  }
  0x16   : > { %52 = vst.msk [vmem:[#allocation2 + $0x28] sm:$0xff] %vm19_vm0, %v47_v13 }
  0x17   : > { %53 = vst.msk [vmem:[#allocation2 + $0x30] sm:$0xff] %vm19_vm0, %v48_v24 }
  0x1b   : > { %v57_v16 = vld [vmem:[#allocation2 + $0x5] sm:$0xff] }
  0x1c   : > { %v54_v17 = vld [vmem:[#allocation2 + $0x4] sm:$0xff]  ;;  %v58_v19 = vld [vmem:[#allocation2 + $0xd] sm:$0xff]  ;;  %3356 = vmatmul.msk.f32.vlgmr.msra.gmra.mxu0 %vm19_vm0, %v57_v16 }
  0x1d   : > { %v55_v20 = vld [vmem:[#allocation2 + $0xc] sm:$0xff]  ;;  %3359 = vmatmul.msk.f32.vlgmr.msra.gmra.mxu1 %vm19_vm0, %v54_v17  ;;  %3357 = vmatmul.msk.f32.vlgmr.msra.gmra.mxu2 %vm19_vm0, %v58_v19  ;;  %v355_v42 = vld [vmem:[#allocation2 + $0x14] sm:$0xff]  ;;  %v450_v48 = vld [vmem:[#allocation2 + $0x24] sm:$0xff] }
  0x1e   : > { %3360 = vmatmul.msk.f32.vlgmr.msra.gmra.mxu3 %vm19_vm0, %v55_v20  ;;  %3378 = vmatpush.msk.msra.mxu2 %vm67_vm1, %v3377_v14  ;;  %v202_v22 = vld [vmem:[#allocation2 + $0x8] sm:$0xff]  ;;  %v203_v31 = vld [vmem:[#allocation2 + $0x10] sm:$0xff] }
  0x1f   : > { %3382 = vmatpush.msk.msra.mxu3 %vm67_vm1, %v3381_v15  ;;  %3386 = vmatpush.msk.msra.mxu0 %vm67_vm1, %v3385_v18  ;;  %v240_v23 = vld [vmem:[#allocation2 + $0x9] sm:$0xff]  ;;  %v241_v32 = vld [vmem:[#allocation2 + $0x11] sm:$0xff] }
  0x20   : > { %3392 = vmatpush.msk.msra.mxu1 %vm67_vm1, %v3391_v21  ;;  %v126_v25 = vld [vmem:[#allocation2 + $0x6] sm:$0xff]  ;;  %v127_v33 = vld [vmem:[#allocation2 + $0xe] sm:$0xff] }
  0x21   : > { %v164_v26 = vld [vmem:[#allocation2 + $0x7] sm:$0xff]  ;;  %v165_v34 = vld [vmem:[#allocation2 + $0xf] sm:$0xff] }
  0x22   : > { %v453_v35 = vld [vmem:[#allocation2 + $0x25] sm:$0xff]  ;;  %v454_v43 = vld [vmem:[#allocation2 + $0x2d] sm:$0xff] }
  0x23   : > { %v278_v36 = vld [vmem:[#allocation2 + $0xa] sm:$0xff]  ;;  %v279_v44 = vld [vmem:[#allocation2 + $0x12] sm:$0xff] }
  0x24   : > { %3371 = vmatmul.msk.f32.vlgmr.msrb.gmra.mxu0 %vm19_vm0, %v202_v22  ;;  %v316_v37 = vld [vmem:[#allocation2 + $0xb] sm:$0xff]  ;;  %v317_v45 = vld [vmem:[#allocation2 + $0x13] sm:$0xff] }
  0x25   : > { %3375 = vmatmul.msk.f32.vlgmr.msrb.gmra.mxu1 %vm19_vm0, %v240_v23  ;;  %3363 = vmatmul.msk.f32.vlgmr.msrb.gmra.mxu2 %vm19_vm0, %v126_v25  ;;  %v557_v46 = vld [vmem:[#allocation2 + $0x27] sm:$0xff]  ;;  %v558_v50 = vld [vmem:[#allocation2 + $0x2f] sm:$0xff]  ;;  %v3783_v23 = vmov 16.0  }
  0x26   : > { %3367 = vmatmul.msk.f32.vlgmr.msrb.gmra.mxu3 %vm19_vm0, %v164_v26  ;;  %3395 = vmatpush.msk.msrb.mxu2 %vm67_vm1, %v452_v27  ;;  %v594_v47 = vld [vmem:[#allocation2 + $0x28] sm:$0xff]  ;;  %v595_v51 = vld [vmem:[#allocation2 + $0x30] sm:$0xff]  ;;  %3700 = vrcp.f32 %v3783_v23 }
  0x27   : > { %3399 = vmatpush.msk.msrb.mxu3 %vm67_vm1, %v3398_v28  ;;  %3403 = vmatpush.msk.msrb.mxu0 %vm67_vm1, %v3402_v29  ;;  %v520_v49 = vld [vmem:[#allocation2 + $0x26] sm:$0xff]  ;;  %v521_v53 = vld [vmem:[#allocation2 + $0x2e] sm:$0xff] }
  0x28   : > { %3407 = vmatpush.msk.msrb.mxu1 %vm67_vm1, %v3406_v30  ;;  %v451_v52 = vld [vmem:[#allocation2 + $0x2c] sm:$0xff]  ;;  %v743_v58 = vld [vmem:[#allocation2 + $0x34] sm:$0xff] }
  0x29   : > { %v705_v54 = vld [vmem:[#allocation2 + $0x2b] sm:$0xff]  ;;  %v706_v57 = vld [vmem:[#allocation2 + $0x33] sm:$0xff] }
  0x2a   : > { %v631_v55 = vld [vmem:[#allocation2 + $0x29] sm:$0xff]  ;;  %v632_v59 = vld [vmem:[#allocation2 + $0x31] sm:$0xff] }
  0x2b   : > { %v668_v56 = vld [vmem:[#allocation2 + $0x2a] sm:$0xff]  ;;  %v669_v60 = vld [vmem:[#allocation2 + $0x32] sm:$0xff] }
  0x2c   : > { %3372 = vmatmul.msk.f32.gmra.mxu0 %vm19_vm0, %v203_v31  ;;  %v3701_v29 = vpop.eup %3700 }
  0x2d   : > { %3376 = vmatmul.msk.f32.gmra.mxu1 %vm19_vm0, %v241_v32  ;;  %3364 = vmatmul.msk.f32.gmra.mxu2 %vm19_vm0, %v127_v33  ;;  %vm406_vm2 = vweird.f32 %v3701_v29 }
  0x2e   : > { %3368 = vmatmul.msk.f32.gmra.mxu3 %vm19_vm0, %v165_v34 }
  0x34   : > { %3387 = vmatmul.msk.f32.vlgmr.msra.gmra.mxu0 %vm19_vm0, %v55_v20 }
  0x35   : > { %3393 = vmatmul.msk.f32.vlgmr.msra.gmra.mxu1 %vm19_vm0, %v453_v35  ;;  %3379 = vmatmul.msk.f32.vlgmr.msra.gmra.mxu2 %vm19_vm0, %v278_v36  ;;  %v402_v35 = vmul.f32 16.0, %v3701_v29 }
  0x36   : > { %3383 = vmatmul.msk.f32.vlgmr.msra.gmra.mxu3 %vm19_vm0, %v316_v37  ;;  %3411 = vmatpush.msk.msra.mxu2 %vm67_vm1, %v3410_v38 }
  0x37   : > { %3415 = vmatpush.msk.msra.mxu3 %vm67_vm1, %v3414_v39  ;;  %3419 = vmatpush.msk.msra.mxu0 %vm67_vm1, %v3418_v40 }
  0x38   : > { %3423 = vmatpush.msk.msra.mxu1 %vm67_vm1, %v3422_v41  ;;  %v403_v41 = vsub.f32 1.0, %v402_v35 }
  0x3c   : > { %3388 = vmatmul.msk.f32.gmra.mxu0 %vm19_vm0, %v355_v42 }
  0x3d   : > { %3394 = vmatmul.msk.f32.gmra.mxu1 %vm19_vm0, %v454_v43  ;;  %3380 = vmatmul.msk.f32.gmra.mxu2 %vm19_vm0, %v279_v44 }
  0x3e   : > { %3384 = vmatmul.msk.f32.gmra.mxu3 %vm19_vm0, %v317_v45 }
  0x44   : > { %3404 = vmatmul.msk.f32.vlgmr.msrb.gmra.mxu0 %vm19_vm0, %v557_v46  ;;  %v404_v46 = vmul.f32 %v3701_v29, %v403_v41 }
  0x45   : > { %3408 = vmatmul.msk.f32.vlgmr.msrb.gmra.mxu1 %vm19_vm0, %v594_v47  ;;  %3396 = vmatmul.msk.f32.vlgmr.msrb.gmra.mxu2 %vm19_vm0, %v450_v48 }
  0x46   : > { %3400 = vmatmul.msk.f32.vlgmr.msrb.gmra.mxu3 %vm19_vm0, %v520_v49 }
  0x4c   : > { %3405 = vmatmul.msk.f32.gmra.mxu0 %vm19_vm0, %v558_v50 }
  0x4d   : > { %3409 = vmatmul.msk.f32.gmra.mxu1 %vm19_vm0, %v595_v51  ;;  %3397 = vmatmul.msk.f32.gmra.mxu2 %vm19_vm0, %v451_v52  ;;  %v405_v51 = vadd.f32 %v3701_v29, %v404_v46 }
  0x4e   : > { %3401 = vmatmul.msk.f32.gmra.mxu3 %vm19_vm0, %v521_v53 }
  0x54   : > { %3420 = vmatmul.msk.f32.vlgmr.msra.gmra.mxu0 %vm19_vm0, %v705_v54 }
  0x55   : > { %3424 = vmatmul.msk.f32.vlgmr.msra.gmra.mxu1 %vm19_vm0, %v451_v52  ;;  %3412 = vmatmul.msk.f32.vlgmr.msra.gmra.mxu2 %vm19_vm0, %v631_v55 }
  0x56   : > { %3416 = vmatmul.msk.f32.vlgmr.msra.gmra.mxu3 %vm19_vm0, %v668_v56 }
  0x5c   : > { %3421 = vmatmul.msk.f32.gmra.mxu0 %vm19_vm0, %v706_v57 }
  0x5d   : > { %3425 = vmatmul.msk.f32.gmra.mxu1 %vm19_vm0, %v743_v58  ;;  %3413 = vmatmul.msk.f32.gmra.mxu2 %vm19_vm0, %v632_v59  ;;  %v3983_v58 = vsel %vm406_vm2, %v3701_v29, %v405_v51 }
  0x5e   : > { %3417 = vmatmul.msk.f32.gmra.mxu3 %vm19_vm0, %v669_v60 }
  0x99   : > { %v88_v61 = vpop.f32.mrf.mxu0 }
  0x9a   : > { %v120_v62 = vpop.f32.mrf.mxu1 }
  0x9b   : > { %v121_v8 = vadd.f32 %v120_v62, %v88_v61 }
  0xa0   : > { %v91_v63 = vpop.f32.mrf.mxu2 }
  0xa1   : > { %v123_v1 = vpop.f32.mrf.mxu3  ;;  %v232_v2 = vpop.f32.mrf.mxu0 }
  0xa2   : > { %v270_v3 = vpop.f32.mrf.mxu1  ;;  %v124_v12 = vadd.f32 %v123_v1, %v91_v63 }
  0xa8   : > { %v156_v4 = vpop.f32.mrf.mxu2 }
  0xa9   : > { %v194_v5 = vpop.f32.mrf.mxu3  ;;  %v235_v6 = vpop.f32.mrf.mxu0  ;;  %v162_v9 = vadd.f32 %v156_v4, %v121_v8 }
  0xaa   : > { %v273_v7 = vpop.f32.mrf.mxu1 }
  0xab   : > { %v200_v13 = vadd.f32 %v194_v5, %v162_v9 }
  0xad   : > { %v238_v17 = vadd.f32 %v232_v2, %v200_v13 }
  0xaf   : > { %v276_v21 = vadd.f32 %v270_v3, %v238_v17 }
  0xb0   : > { %v159_v10 = vpop.f32.mrf.mxu2 }
  0xb1   : > { %v197_v11 = vpop.f32.mrf.mxu3  ;;  %v384_v14 = vpop.f32.mrf.mxu0  ;;  %v163_v16 = vadd.f32 %v159_v10, %v124_v12 }
  0xb2   : > { %v482_v15 = vpop.f32.mrf.mxu1 }
  0xb3   : > { %v201_v18 = vadd.f32 %v197_v11, %v163_v16 }
  0xb5   : > { %v239_v24 = vadd.f32 %v235_v6, %v201_v18 }
  0xb7   : > { %v277_v27 = vadd.f32 %v273_v7, %v239_v24 }
  0xb8   : > { %v308_v19 = vpop.f32.mrf.mxu2 }
  0xb9   : > { %v346_v20 = vpop.f32.mrf.mxu3  ;;  %v387_v22 = vpop.f32.mrf.mxu0  ;;  %v314_v25 = vadd.f32 %v308_v19, %v276_v21 }
  0xba   : > { %v485_v26 = vpop.f32.mrf.mxu1 }
  0xbb   : > { %v352_v28 = vadd.f32 %v346_v20, %v314_v25 }
  0xbd   : > { %v390_v33 = vadd.f32 %v384_v14, %v352_v28 }
  0xbf   : > { %v392_v39 = vsel %vm19_vm0, %v390_v33, 0.0 }
  0xc0   : > { %v311_v30 = vpop.f32.mrf.mxu2 }
  0xc1   : > { %v349_v31 = vpop.f32.mrf.mxu3  ;;  %v315_v32 = vadd.f32 %v311_v30, %v277_v27  ;;  %v586_v36 = vpop.f32.mrf.mxu0 }
  0xc2   : > { %v623_v38 = vpop.f32.mrf.mxu1 }
  0xc3   : > { %v353_v34 = vadd.f32 %v349_v31, %v315_v32 }
  0xc5   : > { %v391_v37 = vadd.f32 %v387_v22, %v353_v34 }
  0xc7   : > { %v393_v40 = vsel %vm19_vm0, %v391_v37, 0.0 }
  0xc8   : > { %v394_v42 = vadd.f32 %v393_v40, %v392_v39  ;;  %v514_v43 = vpop.f32.mrf.mxu2 }
  0xc9   : > { %v549_v44 = vpop.f32.mrf.mxu3  ;;  %v515_v47 = vadd.f32 %v514_v43, %v482_v15  ;;  %v589_v49 = vpop.f32.mrf.mxu0 }
  0xca   : > { %v395_v45 = vrot.slane %v394_v42, 4  ;;  %v626_v53 = vpop.f32.mrf.mxu1 }
  0xcb   : > { %v555_v52 = vadd.f32 %v549_v44, %v515_v47 }
  0xcc   : > { %v396_v48 = vadd.f32 %v395_v45, %v394_v42 }
  0xcd   : > { %v592_v59 = vadd.f32 %v586_v36, %v555_v52 }
  0xce   : > { %v397_v50 = vrot.slane %v396_v48, 2 }
  0xcf   : > { %v629_v63 = vadd.f32 %v623_v38, %v592_v59 }
  0xd0   : > { %v398_v54 = vadd.f32 %v397_v50, %v396_v48  ;;  %v517_v55 = vpop.f32.mrf.mxu2 }
  0xd1   : > { %v552_v56 = vpop.f32.mrf.mxu3  ;;  %v518_v60 = vadd.f32 %v517_v55, %v485_v26  ;;  %v734_v2 = vpop.f32.mrf.mxu0 }
  0xd2   : > { %v399_v57 = vrot.slane %v398_v54, 1  ;;  %v771_v10 = vpop.f32.mrf.mxu1 }
  0xd3   : > { %v556_v1 = vadd.f32 %v552_v56, %v518_v60 }
  0xd4   : > { %v400_v61 = vadd.f32 %v399_v57, %v398_v54 }
  0xd5   : > { %v593_v11 = vadd.f32 %v589_v49, %v556_v1 }
  0xd6   : > { %v408_v62 = vmul.f32 %v3983_v58, %v400_v61 }
  0xd7   : > { %v630_v17 = vadd.f32 %v626_v53, %v593_v11 }
  0xd8   : > { %v409_v3 = vsub.f32 %v390_v33, %v408_v62  ;;  %v410_v4 = vsub.f32 %v391_v37, %v408_v62  ;;  %v660_v5 = vpop.f32.mrf.mxu2 }
  0xd9   : > { %v697_v6 = vpop.f32.mrf.mxu3  ;;  %v666_v7 = vadd.f32 %v660_v5, %v629_v63  ;;  %v737_v23 = vpop.f32.mrf.mxu0 }
  0xda   : > { %v411_v8 = vmul.f32 %v409_v3, %v409_v3  ;;  %v412_v9 = vmul.f32 %v410_v4, %v410_v4  ;;  %v774_v26 = vpop.f32.mrf.mxu1 }
  0xdb   : > { %v703_v15 = vadd.f32 %v697_v6, %v666_v7 }
  0xdc   : > { %v413_v12 = vsel %vm19_vm0, %v411_v8, 0.0  ;;  %v414_v13 = vsel %vm19_vm0, %v412_v9, 0.0 }
  0xdd   : > { %v415_v14 = vadd.f32 %v414_v13, %v413_v12  ;;  %v740_v21 = vadd.f32 %v734_v2, %v703_v15 }
  0xdf   : > { %v416_v16 = vrot.slane %v415_v14, 4  ;;  %v777_v28 = vadd.f32 %v771_v10, %v740_v21 }
  0xe0   : > { %v663_v18 = vpop.f32.mrf.mxu2 }
  0xe1   : > { %v700_v19 = vpop.f32.mrf.mxu3  ;;  %v417_v20 = vadd.f32 %v416_v16, %v415_v14  ;;  %v667_v22 = vadd.f32 %v663_v18, %v630_v17  ;;  %v779_v33 = vsel %vm19_vm0, %v777_v28, 0.0  ;;  %v836_v17 = vld [vmem:[%s4001_s30] sm:$0xff]  ;;  %v837_v18 = vld [vmem:[%s4001_s30 + $0x8] sm:$0xff] }
  0xe3   : > { %v418_v24 = vrot.slane %v417_v20, 2  ;;  %v704_v25 = vadd.f32 %v700_v19, %v667_v22 }
  0xe5   : > { %v419_v27 = vadd.f32 %v418_v24, %v417_v20  ;;  %v741_v29 = vadd.f32 %v737_v23, %v704_v25 }
  0xe7   : > { %v420_v30 = vrot.slane %v419_v27, 1  ;;  %v778_v31 = vadd.f32 %v774_v26, %v741_v29 }
  0xe9   : > { %v421_v32 = vadd.f32 %v420_v30, %v419_v27  ;;  %v780_v34 = vsel %vm19_vm0, %v778_v31, 0.0 }
  0xea   : > { %v781_v35 = vadd.f32 %v780_v34, %v779_v33 }
  0xeb   : > { %v422_v36 = vmul.f32 %v421_v32, %v3983_v58 }
  0xec   : > { %v782_v37 = vrot.slane %v781_v35, 4 }
  0xed   : > { %v423_v38 = vadd.f32 1e-05, %v422_v36 }
  0xee   : > { %v783_v39 = vadd.f32 %v782_v37, %v781_v35 }
  0xef   : > { %3702 = vrsqrt.f32 %v423_v38  ;;  %vm430_vm4 = vweird.f32 %v423_v38 }
  0xf0   : > { %v784_v40 = vrot.slane %v783_v39, 2 }
  0xf2   : > { %v785_v41 = vadd.f32 %v784_v40, %v783_v39 }
  0xf4   : > { %v786_v42 = vrot.slane %v785_v41, 1 }
  0xf5   : > { %v3703_v43 = vpop.eup %3702 }
  0xf6   : > { %v425_v44 = vmul.f32 %v3703_v43, %v423_v38  ;;  %v787_v45 = vadd.f32 %v786_v42, %v785_v41  ;;  %vm431_vm3 = vweird.f32 %v3703_v43  ;;  %v838_v42 = vld [vmem:[%s4001_s30 + $0x10] sm:$0xff] }
  0xf7   : > { %vm432_vm5 = vmor %vm430_vm4, %vm431_vm3 }
  0xf8   : > { %v426_v46 = vmul.f32 %v3703_v43, %v425_v44  ;;  %v788_v47 = vmul.f32 %v787_v45, %v3983_v58 }
  0xfa   : > { %v427_v48 = vmul.f32 0.5, %v426_v46  ;;  %v789_v49 = vsub.f32 %v777_v28, %v788_v47  ;;  %v790_v50 = vsub.f32 %v778_v31, %v788_v47 }
  0xfc   : > { %v428_v51 = vsub.f32 1.5, %v427_v48  ;;  %v791_v52 = vmul.f32 %v789_v49, %v789_v49  ;;  %v792_v53 = vmul.f32 %v790_v50, %v790_v50 }
  0xfe   : > { %v429_v54 = vmul.f32 %v3703_v43, %v428_v51  ;;  %v793_v55 = vsel %vm19_vm0, %v791_v52, 0.0  ;;  %v794_v56 = vsel %vm19_vm0, %v792_v53, 0.0 }
  0xff   : > { %v795_v57 = vadd.f32 %v794_v56, %v793_v55 }
 0x100   : > { %v433_v59 = vsel %vm432_vm5, %v3703_v43, %v429_v54  ;;  %v839_v43 = vld [vmem:[%s4001_s30 + $0x18] sm:$0xff] }
 0x101   : > { %v434_v60 = vmul.f32 %v433_v59, %v409_v3  ;;  %v435_v61 = vmul.f32 %v433_v59, %v410_v4  ;;  %v796_v62 = vrot.slane %v795_v57, 4 }
 0x103   : > { %v438_v63 = vmin.f32 %v434_v60, 0.0  ;;  %v439_v1 = vmin.f32 %v435_v61, 0.0  ;;  %v797_v2 = vadd.f32 %v796_v62, %v795_v57  ;;  %vm436_vm6 = vcmp.gt.f32.partialorder %v434_v60, 0.0 }
 0x104   : > { %vm437_vm7 = vcmp.gt.f32.partialorder %v435_v61, 0.0 }
 0x105   : > { %v440_v5 = vmul.f32 1.442695, %v438_v63  ;;  %v442_v6 = vmul.f32 1.442695, %v439_v1  ;;  %v798_v7 = vrot.slane %v797_v2, 2 }
 0x107   : > { %3704 = vpow2.f32 %v440_v5  ;;  %v799_v8 = vadd.f32 %v798_v7, %v797_v2 }
 0x108   : > { %3706 = vpow2.f32 %v442_v6 }
 0x109   : > { %v800_v9 = vrot.slane %v799_v8, 1 }
 0x10b   : > { %v801_v10 = vadd.f32 %v800_v9, %v799_v8 }
 0x10d   : > { %v3705_v11 = vpop.eup %3704  ;;  %v802_v14 = vmul.f32 %v801_v10, %v3983_v58 }
 0x10e   : > { %v3707_v12 = vpop.eup %3706  ;;  %v3389_v13 = vadd.f32 -1.0, %v3705_v11 }
 0x10f   : > { %v3390_v3 = vadd.f32 -1.0, %v3707_v12  ;;  %v803_v15 = vadd.f32 1e-05, %v802_v14 }
 0x110   : > { %v446_v4 = vsel %vm436_vm6, %v434_v60, %v3389_v13 }
 0x111   : > { %v447_v16 = vsel %vm437_vm7, %v435_v61, %v3390_v3  ;;  %448 = vst.msk [vmem:[#allocation3] sm:$0xff] %vm19_vm0, %v446_v4  ;;  %3708 = vrsqrt.f32 %v803_v15  ;;  %vm810_vm9 = vweird.f32 %v803_v15 }
 0x112   : > { %449 = vst.msk [vmem:[#allocation3 + $0x8] sm:$0xff] %vm19_vm0, %v447_v16 }
 0x117   : > { %v3709_v19 = vpop.eup %3708 }
 0x118   : > { %v830_v20 = vld [vmem:[#allocation3] sm:$0xff]  ;;  %v805_v23 = vmul.f32 %v3709_v19, %v803_v15  ;;  %vm811_vm8 = vweird.f32 %v3709_v19 }
 0x119   : > { %v831_v21 = vld [vmem:[#allocation3 + $0x8] sm:$0xff]  ;;  %v840_v22 = vadd.f32 %v836_v17, %v830_v20  ;;  %vm812_vm10 = vmor %vm810_vm9, %vm811_vm8 }
 0x11a   : > { %v841_v24 = vadd.f32 %v837_v18, %v831_v21  ;;  %v806_v25 = vmul.f32 %v3709_v19, %v805_v23 }
 0x11b   : > { %845 = vst.msk [vmem:[%s4008_s8] sm:$0xff] %vm19_vm0, %v840_v22 }
 0x11c   : > { %846 = vst.msk [vmem:[%s4008_s8 + $0x8] sm:$0xff] %vm19_vm0, %v841_v24  ;;  %v807_v26 = vmul.f32 0.5, %v806_v25 }
 0x11e   : > { %v808_v27 = vsub.f32 1.5, %v807_v26 }
 0x120   : > { %v809_v28 = vmul.f32 %v3709_v19, %v808_v27 }
 0x122   : > { %v813_v29 = vsel %vm812_vm10, %v3709_v19, %v809_v28 }
 0x123   : > { %v814_v30 = vmul.f32 %v813_v29, %v789_v49  ;;  %v815_v31 = vmul.f32 %v813_v29, %v790_v50 }
 0x125   : > { %v818_v32 = vmin.f32 %v814_v30, 0.0  ;;  %v819_v33 = vmin.f32 %v815_v31, 0.0  ;;  %vm816_vm11 = vcmp.gt.f32.partialorder %v814_v30, 0.0  ;;  %vm817_vm12 = vcmp.gt.f32.partialorder %v815_v31, 0.0 }
 0x127   : > { %v820_v34 = vmul.f32 1.442695, %v818_v32  ;;  %v822_v35 = vmul.f32 1.442695, %v819_v33 }
 0x129   : > { %3710 = vpow2.f32 %v820_v34 }
 0x12a   : > { %3712 = vpow2.f32 %v822_v35 }
 0x12f   : > { %v3711_v36 = vpop.eup %3710 }
 0x130   : > { %v3713_v37 = vpop.eup %3712  ;;  %v3426_v38 = vadd.f32 -1.0, %v3711_v36 }
 0x131   : > { %v3427_v39 = vadd.f32 -1.0, %v3713_v37 }
 0x132   : > { %v826_v40 = vsel %vm816_vm11, %v814_v30, %v3426_v38 }
 0x133   : > { %v827_v41 = vsel %vm817_vm12, %v815_v31, %v3427_v39  ;;  %828 = vst.msk [vmem:[#allocation3 + $0x10] sm:$0xff] %vm19_vm0, %v826_v40 }
 0x134   : > { %829 = vst.msk [vmem:[#allocation3 + $0x18] sm:$0xff] %vm19_vm0, %v827_v41 }
 0x13a   : > { %v832_v44 = vld [vmem:[#allocation3 + $0x10] sm:$0xff]  ;;  %40 = sbr.rel (!%p38_p0) target bundleno = 13 (0xd), region = 118 }
 0x13b   : > { %v833_v45 = vld [vmem:[#allocation3 + $0x18] sm:$0xff]  ;;  %v842_v46 = vadd.f32 %v838_v42, %v832_v44 }
 0x13c   : > { %v843_v47 = vadd.f32 %v839_v43, %v833_v45 }
 0x13d   : > { %847 = vst.msk [vmem:[%s4008_s8 + $0x10] sm:$0xff] %vm19_vm0, %v842_v46 }
 0x13e   : > { %848 = vst.msk [vmem:[%s4008_s8 + $0x18] sm:$0xff] %vm19_vm0, %v843_v47 }
 0x13f LB: > { %v3430_v48 = vld [vmem:[%s4555_s2 + $0x4] sm:$0xf]  ;;  %v870_v49 = vld [vmem:[%s4555_s2] sm:$0xf]  ;;  %v3437_v50 = vld [vmem:[%s4555_s2 + $0x8] sm:$0xf]  ;;  %s3772_s10 = sphi %s4025_s10, %s854_s10  }
 0x140   : > { %3660 = vmatpush.msk.msra.mxu2 %vm67_vm1, %v3430_v48  ;;  %3661 = vmatpush.msk.msra.mxu3 %vm67_vm1, %v870_v49  ;;  %v3441_v51 = vld [vmem:[%s4555_s2 + $0xc] sm:$0xf]  ;;  %v3445_v52 = vld [vmem:[%s4555_s2 + $0x10] sm:$0xf]  ;;  %s856_s19 = ssub.s32 15, %s3772_s10 }
 0x141   : > { %v3449_v53 = vld [vmem:[%s4555_s2 + $0x14] sm:$0xf]  ;;  %s3429_s22 = sshll.u32 %s856_s19, 5  ;;  %3431 = vmatpush.msk.msra.mxu0 %vm67_vm1, %v3430_v48  ;;  %3434 = vmatpush.msk.msra.mxu1 %vm67_vm1, %v870_v49  ;;  %v3453_v57 = vld [vmem:[%s4555_s2 + $0x18] sm:$0xf] }
 0x142   : > { %3438 = vmatpush.msk.msrb.mxu2 %vm67_vm1, %v3437_v50  ;;  %3442 = vmatpush.msk.msrb.mxu3 %vm67_vm1, %v3441_v51  ;;  %s858_s25 = scalar_lea.vmem %s4559_s4, %s3429_s22  ;;  %v3457_v59 = vld [vmem:[%s4555_s2 + $0x1c] sm:$0xf]  ;;  %v3461_v62 = vld [vmem:[%s4555_s2 + $0x20] sm:$0xf]  ;;  %v3467_v2 = vld [vmem:[%s4555_s2 + $0x4] sm:$0xf] }
 0x143   : > { %3446 = vmatpush.msk.msrb.mxu0 %vm67_vm1, %v3445_v52  ;;  %3450 = vmatpush.msk.msrb.mxu1 %vm67_vm1, %v3449_v53  ;;  %v1266_v10 = vld [vmem:[%s4555_s2] sm:$0xf]  ;;  %v3474_v11 = vld [vmem:[%s4555_s2 + $0x8] sm:$0xf]  ;;  %v3478_v12 = vld [vmem:[%s4555_s2 + $0xc] sm:$0xf] }
 0x144   : > { %v3482_v13 = vld [vmem:[%s4555_s2 + $0x10] sm:$0xf]  ;;  %v3486_v19 = vld [vmem:[%s4555_s2 + $0x14] sm:$0xf]  ;;  %v3490_v20 = vld [vmem:[%s4555_s2 + $0x18] sm:$0xf] }
 0x145   : > { %v859_v54 = vld [vmem:[%s858_s25] sm:$0xff]  ;;  %v860_v55 = vld [vmem:[%s858_s25 + $0x8] sm:$0xff]  ;;  %v861_v56 = vld [vmem:[%s858_s25 + $0x10] sm:$0xff] }
 0x146   : > { %863 = vst.msk [vmem:[#allocation2 + $0x8] sm:$0xff] %vm19_vm0, %v859_v54  ;;  %v862_v7 = vld [vmem:[%s858_s25 + $0x18] sm:$0xff]  ;;  %v3498_v22 = vld [vmem:[%s4555_s2 + $0x20] sm:$0xf]  ;;  %s855_s25 = ssub.s32 14, %s3772_s10  ;;  %s854_s10 = sadd.s32 1, %s3772_s10  }
 0x147   : > { %864 = vst.msk [vmem:[#allocation2 + $0x10] sm:$0xff] %vm19_vm0, %v860_v55  ;;  %v3494_v21 = vld [vmem:[%s4555_s2 + $0x1c] sm:$0xf]  ;;  %s3504_s26 = sshll.u32 %s855_s25, 5  ;;  %p851_p1 = scmp.ge.s32.totalorder %s854_s10, 15  }
 0x148   : > { %866 = vst.msk [vmem:[#allocation2 + $0x28] sm:$0xff] %vm19_vm0, %v861_v56  ;;  %s4166_s29 = scalar_lea.vmem %s4559_s4, %s3504_s26  ;;  %s4229_s18 = smov (%p851_p1), 1  }
 0x149   : > { %867 = vst.msk [vmem:[#allocation2 + $0x30] sm:$0xff] %vm19_vm0, %v862_v7 }
 0x14a   :  { %1662 = vst.msk [vmem:[#allocation4] sm:$0xff] (%p851_p1), %vm19_vm0, %v3782_v0 }
 0x14b   :  { %1663 = vst.msk [vmem:[#allocation4 + $0x8] sm:$0xff] (%p851_p1), %vm19_vm0, %v3782_v0 }
 0x14c   :  { %1664 = vst.msk [vmem:[#allocation4 + $0x10] sm:$0xff] (%p851_p1), %vm19_vm0, %v3782_v0 }
 0x14d   : > { %v871_v60 = vld [vmem:[#allocation2 + $0x5] sm:$0xff]  ;;  %1665 = vst.msk [vmem:[#allocation4 + $0x18] sm:$0xff] (%p851_p1), %vm19_vm0, %v3782_v0 }
 0x14e   : > { %v868_v61 = vld [vmem:[#allocation2 + $0x4] sm:$0xff]  ;;  %v872_v63 = vld [vmem:[#allocation2 + $0xd] sm:$0xff]  ;;  %3432 = vmatmul.msk.f32.vlgmr.msra.gmra.mxu0 %vm19_vm0, %v871_v60  ;;  %1666 = vst.msk [vmem:[#allocation4 + $0x20] sm:$0xff] (%p851_p1), %vm19_vm0, %v3782_v0 }
 0x14f   : > { %v869_v1 = vld [vmem:[#allocation2 + $0xc] sm:$0xff]  ;;  %3435 = vmatmul.msk.f32.vlgmr.msra.gmra.mxu1 %vm19_vm0, %v868_v61  ;;  %3433 = vmatmul.msk.f32.vlgmr.msra.gmra.mxu2 %vm19_vm0, %v872_v63  ;;  %v1169_v23 = vld [vmem:[#allocation2 + $0x14] sm:$0xff]  ;;  %v1264_v29 = vld [vmem:[#allocation2 + $0x24] sm:$0xff]  ;;  %1667 = vst.msk [vmem:[#allocation4 + $0x28] sm:$0xff] (%p851_p1), %vm19_vm0, %v3782_v0 }
 0x150   : > { %3436 = vmatmul.msk.f32.vlgmr.msra.gmra.mxu3 %vm19_vm0, %v869_v1  ;;  %3454 = vmatpush.msk.msra.mxu2 %vm67_vm1, %v3453_v57  ;;  %v1016_v5 = vld [vmem:[#allocation2 + $0x8] sm:$0xff]  ;;  %v1017_v14 = vld [vmem:[#allocation2 + $0x10] sm:$0xff]  ;;  %1668 = vst.msk [vmem:[#allocation4 + $0x30] sm:$0xff] (%p851_p1), %vm19_vm0, %v3782_v0 }
 0x151   : > { %3458 = vmatpush.msk.msra.mxu3 %vm67_vm1, %v3457_v59  ;;  %3462 = vmatpush.msk.msra.mxu0 %vm67_vm1, %v3461_v62  ;;  %v1054_v6 = vld [vmem:[#allocation2 + $0x9] sm:$0xff]  ;;  %v1055_v3 = vld [vmem:[#allocation2 + $0x11] sm:$0xff]  ;;  %1669 = vst.msk [vmem:[#allocation4 + $0x38] sm:$0xff] (%p851_p1), %vm19_vm0, %v3782_v0 }
 0x152   : > { %3468 = vmatpush.msk.msra.mxu1 %vm67_vm1, %v3467_v2  ;;  %v940_v8 = vld [vmem:[#allocation2 + $0x6] sm:$0xff]  ;;  %v941_v4 = vld [vmem:[#allocation2 + $0xe] sm:$0xff] }
 0x153   : > { %v978_v9 = vld [vmem:[#allocation2 + $0x7] sm:$0xff]  ;;  %v979_v15 = vld [vmem:[#allocation2 + $0xf] sm:$0xff] }
 0x154   : > { %v1267_v16 = vld [vmem:[#allocation2 + $0x25] sm:$0xff]  ;;  %v1268_v24 = vld [vmem:[#allocation2 + $0x2d] sm:$0xff] }
 0x155   : > { %v1092_v17 = vld [vmem:[#allocation2 + $0xa] sm:$0xff]  ;;  %v1093_v25 = vld [vmem:[#allocation2 + $0x12] sm:$0xff] }
 0x156   : > { %3447 = vmatmul.msk.f32.vlgmr.msrb.gmra.mxu0 %vm19_vm0, %v1016_v5  ;;  %v1130_v18 = vld [vmem:[#allocation2 + $0xb] sm:$0xff]  ;;  %v1131_v26 = vld [vmem:[#allocation2 + $0x13] sm:$0xff] }
 0x157   : > { %3451 = vmatmul.msk.f32.vlgmr.msrb.gmra.mxu1 %vm19_vm0, %v1054_v6  ;;  %3439 = vmatmul.msk.f32.vlgmr.msrb.gmra.mxu2 %vm19_vm0, %v940_v8  ;;  %v1371_v27 = vld [vmem:[#allocation2 + $0x27] sm:$0xff]  ;;  %v1372_v31 = vld [vmem:[#allocation2 + $0x2f] sm:$0xff] }
 0x158   : > { %3443 = vmatmul.msk.f32.vlgmr.msrb.gmra.mxu3 %vm19_vm0, %v978_v9  ;;  %3471 = vmatpush.msk.msrb.mxu2 %vm67_vm1, %v1266_v10  ;;  %v1408_v28 = vld [vmem:[#allocation2 + $0x28] sm:$0xff]  ;;  %v1409_v32 = vld [vmem:[#allocation2 + $0x30] sm:$0xff] }
 0x159   : > { %3475 = vmatpush.msk.msrb.mxu3 %vm67_vm1, %v3474_v11  ;;  %3479 = vmatpush.msk.msrb.mxu0 %vm67_vm1, %v3478_v12  ;;  %v1334_v30 = vld [vmem:[#allocation2 + $0x26] sm:$0xff]  ;;  %v1335_v34 = vld [vmem:[#allocation2 + $0x2e] sm:$0xff] }
 0x15a   : > { %3483 = vmatpush.msk.msrb.mxu1 %vm67_vm1, %v3482_v13  ;;  %v1265_v33 = vld [vmem:[#allocation2 + $0x2c] sm:$0xff]  ;;  %v1557_v39 = vld [vmem:[#allocation2 + $0x34] sm:$0xff] }
 0x15b   : > { %v1519_v35 = vld [vmem:[#allocation2 + $0x2b] sm:$0xff]  ;;  %v1520_v38 = vld [vmem:[#allocation2 + $0x33] sm:$0xff] }
 0x15c   : > { %v1445_v36 = vld [vmem:[#allocation2 + $0x29] sm:$0xff]  ;;  %v1446_v40 = vld [vmem:[#allocation2 + $0x31] sm:$0xff] }
 0x15d   : > { %v1482_v37 = vld [vmem:[#allocation2 + $0x2a] sm:$0xff]  ;;  %v1483_v41 = vld [vmem:[#allocation2 + $0x32] sm:$0xff] }
 0x15e   : > { %3448 = vmatmul.msk.f32.gmra.mxu0 %vm19_vm0, %v1017_v14 }
 0x15f   : > { %3452 = vmatmul.msk.f32.gmra.mxu1 %vm19_vm0, %v1055_v3  ;;  %3440 = vmatmul.msk.f32.gmra.mxu2 %vm19_vm0, %v941_v4 }
 0x160   : > { %3444 = vmatmul.msk.f32.gmra.mxu3 %vm19_vm0, %v979_v15 }
 0x166   : > { %3463 = vmatmul.msk.f32.vlgmr.msra.gmra.mxu0 %vm19_vm0, %v869_v1 }
 0x167   : > { %3469 = vmatmul.msk.f32.vlgmr.msra.gmra.mxu1 %vm19_vm0, %v1267_v16  ;;  %3455 = vmatmul.msk.f32.vlgmr.msra.gmra.mxu2 %vm19_vm0, %v1092_v17 }
 0x168   : > { %3459 = vmatmul.msk.f32.vlgmr.msra.gmra.mxu3 %vm19_vm0, %v1130_v18  ;;  %3487 = vmatpush.msk.msra.mxu2 %vm67_vm1, %v3486_v19 }
 0x169   : > { %3491 = vmatpush.msk.msra.mxu3 %vm67_vm1, %v3490_v20  ;;  %3495 = vmatpush.msk.msra.mxu0 %vm67_vm1, %v3494_v21 }
 0x16a   : > { %3499 = vmatpush.msk.msra.mxu1 %vm67_vm1, %v3498_v22 }
 0x16e   : > { %3464 = vmatmul.msk.f32.gmra.mxu0 %vm19_vm0, %v1169_v23 }
 0x16f   : > { %3470 = vmatmul.msk.f32.gmra.mxu1 %vm19_vm0, %v1268_v24  ;;  %3456 = vmatmul.msk.f32.gmra.mxu2 %vm19_vm0, %v1093_v25 }
 0x170   : > { %3460 = vmatmul.msk.f32.gmra.mxu3 %vm19_vm0, %v1131_v26 }
 0x176   : > { %3480 = vmatmul.msk.f32.vlgmr.msrb.gmra.mxu0 %vm19_vm0, %v1371_v27 }
 0x177   : > { %3484 = vmatmul.msk.f32.vlgmr.msrb.gmra.mxu1 %vm19_vm0, %v1408_v28  ;;  %3472 = vmatmul.msk.f32.vlgmr.msrb.gmra.mxu2 %vm19_vm0, %v1264_v29 }
 0x178   : > { %3476 = vmatmul.msk.f32.vlgmr.msrb.gmra.mxu3 %vm19_vm0, %v1334_v30 }
 0x17e   : > { %3481 = vmatmul.msk.f32.gmra.mxu0 %vm19_vm0, %v1372_v31 }
 0x17f   : > { %3485 = vmatmul.msk.f32.gmra.mxu1 %vm19_vm0, %v1409_v32  ;;  %3473 = vmatmul.msk.f32.gmra.mxu2 %vm19_vm0, %v1265_v33 }
 0x180   : > { %3477 = vmatmul.msk.f32.gmra.mxu3 %vm19_vm0, %v1335_v34 }
 0x186   : > { %3496 = vmatmul.msk.f32.vlgmr.msra.gmra.mxu0 %vm19_vm0, %v1519_v35 }
 0x187   : > { %3500 = vmatmul.msk.f32.vlgmr.msra.gmra.mxu1 %vm19_vm0, %v1265_v33  ;;  %3488 = vmatmul.msk.f32.vlgmr.msra.gmra.mxu2 %vm19_vm0, %v1445_v36 }
 0x188   : > { %3492 = vmatmul.msk.f32.vlgmr.msra.gmra.mxu3 %vm19_vm0, %v1482_v37 }
 0x18e   : > { %3497 = vmatmul.msk.f32.gmra.mxu0 %vm19_vm0, %v1520_v38 }
 0x18f   : > { %3501 = vmatmul.msk.f32.gmra.mxu1 %vm19_vm0, %v1557_v39  ;;  %3489 = vmatmul.msk.f32.gmra.mxu2 %vm19_vm0, %v1446_v40 }
 0x190   : > { %3493 = vmatmul.msk.f32.gmra.mxu3 %vm19_vm0, %v1483_v41 }
 0x1cb   : > { %v902_v42 = vpop.f32.mrf.mxu0 }
 0x1cc   : > { %v934_v43 = vpop.f32.mrf.mxu1 }
 0x1cd   : > { %v935_v52 = vadd.f32 %v934_v43, %v902_v42 }
 0x1d2   : > { %v905_v44 = vpop.f32.mrf.mxu2 }
 0x1d3   : > { %v937_v45 = vpop.f32.mrf.mxu3  ;;  %v1046_v46 = vpop.f32.mrf.mxu0 }
 0x1d4   : > { %v1084_v47 = vpop.f32.mrf.mxu1  ;;  %v938_v56 = vadd.f32 %v937_v45, %v905_v44 }
 0x1da   : > { %v970_v48 = vpop.f32.mrf.mxu2 }
 0x1db   : > { %v1008_v49 = vpop.f32.mrf.mxu3  ;;  %v1049_v50 = vpop.f32.mrf.mxu0  ;;  %v976_v53 = vadd.f32 %v970_v48, %v935_v52 }
 0x1dc   : > { %v1087_v51 = vpop.f32.mrf.mxu1 }
 0x1dd   : > { %v1014_v57 = vadd.f32 %v1008_v49, %v976_v53 }
 0x1df   : > { %v1052_v62 = vadd.f32 %v1046_v46, %v1014_v57 }
 0x1e1   : > { %v1090_v5 = vadd.f32 %v1084_v47, %v1052_v62 }
 0x1e2   : > { %v973_v54 = vpop.f32.mrf.mxu2 }
 0x1e3   : > { %v1011_v55 = vpop.f32.mrf.mxu3  ;;  %v1198_v59 = vpop.f32.mrf.mxu0  ;;  %v977_v61 = vadd.f32 %v973_v54, %v938_v56 }
 0x1e4   : > { %v1296_v60 = vpop.f32.mrf.mxu1 }
 0x1e5   : > { %v1015_v63 = vadd.f32 %v1011_v55, %v977_v61 }
 0x1e7   : > { %v1053_v7 = vadd.f32 %v1049_v50, %v1015_v63 }
 0x1e9   : > { %v1091_v10 = vadd.f32 %v1087_v51, %v1053_v7 }
 0x1ea   : > { %v1122_v1 = vpop.f32.mrf.mxu2 }
 0x1eb   : > { %v1160_v2 = vpop.f32.mrf.mxu3  ;;  %v1201_v6 = vpop.f32.mrf.mxu0  ;;  %v1128_v8 = vadd.f32 %v1122_v1, %v1090_v5 }
 0x1ec   : > { %v1299_v9 = vpop.f32.mrf.mxu1 }
 0x1ed   : > { %v1166_v11 = vadd.f32 %v1160_v2, %v1128_v8 }
 0x1ef   : > { %v1204_v3 = vadd.f32 %v1198_v59, %v1166_v11 }
 0x1f1   : > { %v1206_v18 = vsel %vm19_vm0, %v1204_v3, 0.0 }
 0x1f2   : > { %v1125_v12 = vpop.f32.mrf.mxu2 }
 0x1f3   : > { %v1163_v13 = vpop.f32.mrf.mxu3  ;;  %v1129_v14 = vadd.f32 %v1125_v12, %v1091_v10  ;;  %v1400_v15 = vpop.f32.mrf.mxu0 }
 0x1f4   : > { %v1437_v17 = vpop.f32.mrf.mxu1 }
 0x1f5   : > { %v1167_v4 = vadd.f32 %v1163_v13, %v1129_v14 }
 0x1f7   : > { %v1205_v16 = vadd.f32 %v1201_v6, %v1167_v4 }
 0x1f9   : > { %v1207_v19 = vsel %vm19_vm0, %v1205_v16, 0.0 }
 0x1fa   : > { %v1208_v20 = vadd.f32 %v1207_v19, %v1206_v18  ;;  %v1328_v21 = vpop.f32.mrf.mxu2 }
 0x1fb   : > { %v1363_v22 = vpop.f32.mrf.mxu3  ;;  %v1329_v24 = vadd.f32 %v1328_v21, %v1296_v60  ;;  %v1403_v26 = vpop.f32.mrf.mxu0 }
 0x1fc   : > { %v1209_v23 = vrot.slane %v1208_v20, 4  ;;  %v1440_v29 = vpop.f32.mrf.mxu1 }
 0x1fd   : > { %v1369_v28 = vadd.f32 %v1363_v22, %v1329_v24 }
 0x1fe   : > { %v1210_v25 = vadd.f32 %v1209_v23, %v1208_v20 }
 0x1ff   : > { %v1406_v34 = vadd.f32 %v1400_v15, %v1369_v28 }
 0x200   : > { %v1211_v27 = vrot.slane %v1210_v25, 2 }
 0x201   : > { %v1443_v38 = vadd.f32 %v1437_v17, %v1406_v34 }
 0x202   : > { %v1212_v30 = vadd.f32 %v1211_v27, %v1210_v25  ;;  %v1331_v31 = vpop.f32.mrf.mxu2 }
 0x203   : > { %v1366_v32 = vpop.f32.mrf.mxu3  ;;  %v1332_v35 = vadd.f32 %v1331_v31, %v1299_v9  ;;  %v1548_v40 = vpop.f32.mrf.mxu0 }
 0x204   : > { %v1213_v33 = vrot.slane %v1212_v30, 1  ;;  %v1585_v48 = vpop.f32.mrf.mxu1 }
 0x205   : > { %v1370_v39 = vadd.f32 %v1366_v32, %v1332_v35 }
 0x206   : > { %v1214_v36 = vadd.f32 %v1213_v33, %v1212_v30 }
 0x207   : > { %v1407_v49 = vadd.f32 %v1403_v26, %v1370_v39 }
 0x208   : > { %v1222_v37 = vmul.f32 %v1214_v36, %v3983_v58 }
 0x209   : > { %v1444_v55 = vadd.f32 %v1440_v29, %v1407_v49 }
 0x20a   : > { %v1223_v41 = vsub.f32 %v1204_v3, %v1222_v37  ;;  %v1224_v42 = vsub.f32 %v1205_v16, %v1222_v37  ;;  %v1474_v43 = vpop.f32.mrf.mxu2 }
 0x20b   : > { %v1511_v44 = vpop.f32.mrf.mxu3  ;;  %v1480_v45 = vadd.f32 %v1474_v43, %v1443_v38  ;;  %v1551_v62 = vpop.f32.mrf.mxu0 }
 0x20c   : > { %v1225_v46 = vmul.f32 %v1223_v41, %v1223_v41  ;;  %v1226_v47 = vmul.f32 %v1224_v42, %v1224_v42  ;;  %v1588_v2 = vpop.f32.mrf.mxu1 }
 0x20d   : > { %v1517_v53 = vadd.f32 %v1511_v44, %v1480_v45 }
 0x20e   : > { %v1227_v50 = vsel %vm19_vm0, %v1225_v46, 0.0  ;;  %v1228_v51 = vsel %vm19_vm0, %v1226_v47, 0.0 }
 0x20f   : > { %v1229_v52 = vadd.f32 %v1228_v51, %v1227_v50  ;;  %v1554_v60 = vadd.f32 %v1548_v40, %v1517_v53 }
 0x211   : > { %v1230_v54 = vrot.slane %v1229_v52, 4  ;;  %v1591_v6 = vadd.f32 %v1585_v48, %v1554_v60 }
 0x212   : > { %v1477_v56 = vpop.f32.mrf.mxu2 }
 0x213   : > { %v1514_v57 = vpop.f32.mrf.mxu3  ;;  %v1231_v59 = vadd.f32 %v1230_v54, %v1229_v52  ;;  %v1481_v61 = vadd.f32 %v1477_v56, %v1444_v55  ;;  %v1593_v11 = vsel %vm19_vm0, %v1591_v6, 0.0  ;;  %v1650_v55 = vld [vmem:[%s4166_s29] sm:$0xff]  ;;  %v1651_v56 = vld [vmem:[%s4166_s29 + $0x8] sm:$0xff] }
 0x215   : > { %v1232_v63 = vrot.slane %v1231_v59, 2  ;;  %v1518_v1 = vadd.f32 %v1514_v57, %v1481_v61 }
 0x217   : > { %v1233_v5 = vadd.f32 %v1232_v63, %v1231_v59  ;;  %v1555_v7 = vadd.f32 %v1551_v62, %v1518_v1 }
 0x219   : > { %v1234_v8 = vrot.slane %v1233_v5, 1  ;;  %v1592_v9 = vadd.f32 %v1588_v2, %v1555_v7 }
 0x21b   : > { %v1235_v10 = vadd.f32 %v1234_v8, %v1233_v5  ;;  %v1594_v12 = vsel %vm19_vm0, %v1592_v9, 0.0 }
 0x21c   : > { %v1595_v13 = vadd.f32 %v1594_v12, %v1593_v11 }
 0x21d   : > { %v1236_v14 = vmul.f32 %v1235_v10, %v3983_v58 }
 0x21e   : > { %v1596_v3 = vrot.slane %v1595_v13, 4 }
 0x21f   : > { %v1237_v4 = vadd.f32 1e-05, %v1236_v14 }
 0x220   : > { %v1597_v15 = vadd.f32 %v1596_v3, %v1595_v13 }
 0x221   : > { %3714 = vrsqrt.f32 %v1237_v4  ;;  %vm1244_vm14 = vweird.f32 %v1237_v4 }
 0x222   : > { %v1598_v16 = vrot.slane %v1597_v15, 2 }
 0x224   : > { %v1599_v17 = vadd.f32 %v1598_v16, %v1597_v15 }
 0x226   : > { %v1600_v18 = vrot.slane %v1599_v17, 1 }
 0x227   : > { %v3715_v19 = vpop.eup %3714 }
 0x228   : > { %v1239_v20 = vmul.f32 %v3715_v19, %v1237_v4  ;;  %v1601_v21 = vadd.f32 %v1600_v18, %v1599_v17  ;;  %vm1245_vm13 = vweird.f32 %v3715_v19  ;;  %v1652_v18 = vld [vmem:[%s4166_s29 + $0x10] sm:$0xff] }
 0x229   : > { %vm1246_vm15 = vmor %vm1244_vm14, %vm1245_vm13 }
 0x22a   : > { %v1240_v22 = vmul.f32 %v3715_v19, %v1239_v20  ;;  %v1602_v23 = vmul.f32 %v1601_v21, %v3983_v58 }
 0x22c   : > { %v1241_v24 = vmul.f32 0.5, %v1240_v22  ;;  %v1603_v25 = vsub.f32 %v1591_v6, %v1602_v23  ;;  %v1604_v26 = vsub.f32 %v1592_v9, %v1602_v23 }
 0x22e   : > { %v1242_v27 = vsub.f32 1.5, %v1241_v24  ;;  %v1605_v28 = vmul.f32 %v1603_v25, %v1603_v25  ;;  %v1606_v29 = vmul.f32 %v1604_v26, %v1604_v26  ;;  %v1670_v24 = vld [vmem:[%s4554_s1] sm:$0xff] (%p851_p1) }
 0x22f   :  { %1674 = vst.msk [vmem:[%s4557_s5] sm:$0xff] (%p851_p1), %vm19_vm0, %v1670_v24 }
 0x230   : > { %v1243_v30 = vmul.f32 %v3715_v19, %v1242_v27  ;;  %v1607_v31 = vsel %vm19_vm0, %v1605_v28, 0.0  ;;  %v1608_v32 = vsel %vm19_vm0, %v1606_v29, 0.0  ;;  %v1673_v27 = vld [vmem:[%s4554_s1 + $0x18] sm:$0xff] (%p851_p1) }
 0x231   : > { %v1609_v33 = vadd.f32 %v1608_v32, %v1607_v31  ;;  %1677 = vst.msk [vmem:[%s4557_s5 + $0x18] sm:$0xff] (%p851_p1), %vm19_vm0, %v1673_v27 }
 0x232   : > { %v1247_v34 = vsel %vm1246_vm15, %v3715_v19, %v1243_v30  ;;  %v1653_v19 = vld [vmem:[%s4166_s29 + $0x18] sm:$0xff] }
 0x233   : > { %v1248_v35 = vmul.f32 %v1247_v34, %v1223_v41  ;;  %v1249_v36 = vmul.f32 %v1247_v34, %v1224_v42  ;;  %v1610_v37 = vrot.slane %v1609_v33, 4 }
 0x235   : > { %v1252_v38 = vmin.f32 %v1248_v35, 0.0  ;;  %v1253_v39 = vmin.f32 %v1249_v36, 0.0  ;;  %v1611_v40 = vadd.f32 %v1610_v37, %v1609_v33  ;;  %vm1250_vm2 = vcmp.gt.f32.partialorder %v1248_v35, 0.0 }
 0x236   : > { %vm1251_vm3 = vcmp.gt.f32.partialorder %v1249_v36, 0.0 }
 0x237   : > { %v1254_v43 = vmul.f32 1.442695, %v1252_v38  ;;  %v1256_v44 = vmul.f32 1.442695, %v1253_v39  ;;  %v1612_v45 = vrot.slane %v1611_v40, 2 }
 0x239   : > { %3716 = vpow2.f32 %v1254_v43  ;;  %v1613_v46 = vadd.f32 %v1612_v45, %v1611_v40 }
 0x23a   : > { %3718 = vpow2.f32 %v1256_v44 }
 0x23b   : > { %v1614_v47 = vrot.slane %v1613_v46, 1 }
 0x23d   : > { %v1615_v48 = vadd.f32 %v1614_v47, %v1613_v46 }
 0x23f   : > { %v3717_v49 = vpop.eup %3716  ;;  %v1616_v52 = vmul.f32 %v1615_v48, %v3983_v58 }
 0x240   : > { %v3719_v50 = vpop.eup %3718  ;;  %v3465_v51 = vadd.f32 -1.0, %v3717_v49 }
 0x241   : > { %v3466_v41 = vadd.f32 -1.0, %v3719_v50  ;;  %v1617_v53 = vadd.f32 1e-05, %v1616_v52 }
 0x242   : > { %v1260_v42 = vsel %vm1250_vm2, %v1248_v35, %v3465_v51 }
 0x243   : > { %v1261_v54 = vsel %vm1251_vm3, %v1249_v36, %v3466_v41  ;;  %1262 = vst.msk [vmem:[#allocation3] sm:$0xff] %vm19_vm0, %v1260_v42  ;;  %3720 = vrsqrt.f32 %v1617_v53  ;;  %vm1624_vm5 = vweird.f32 %v1617_v53 }
 0x244   : > { %1263 = vst.msk [vmem:[#allocation3 + $0x8] sm:$0xff] %vm19_vm0, %v1261_v54 }
 0x249   : > { %v3721_v57 = vpop.eup %3720 }
 0x24a   : > { %v1644_v59 = vld [vmem:[#allocation3] sm:$0xff]  ;;  %v1619_v62 = vmul.f32 %v3721_v57, %v1617_v53  ;;  %vm1625_vm4 = vweird.f32 %v3721_v57 }
 0x24b   : > { %v1645_v60 = vld [vmem:[#allocation3 + $0x8] sm:$0xff]  ;;  %v1654_v61 = vadd.f32 %v1650_v55, %v1644_v59  ;;  %vm1626_vm6 = vmor %vm1624_vm5, %vm1625_vm4 }
 0x24c   : > { %v1655_v63 = vadd.f32 %v1651_v56, %v1645_v60  ;;  %v1620_v1 = vmul.f32 %v3721_v57, %v1619_v62 }
 0x24d   : > { %1658 = vst.msk [vmem:[%s4166_s29] sm:$0xff] %vm19_vm0, %v1654_v61 }
 0x24e   : > { %1659 = vst.msk [vmem:[%s4166_s29 + $0x8] sm:$0xff] %vm19_vm0, %v1655_v63  ;;  %v1621_v2 = vmul.f32 0.5, %v1620_v1 }
 0x250   : > { %v1622_v5 = vsub.f32 1.5, %v1621_v2 }
 0x252   : > { %v1623_v6 = vmul.f32 %v3721_v57, %v1622_v5 }
 0x254   : > { %v1627_v7 = vsel %vm1626_vm6, %v3721_v57, %v1623_v6 }
 0x255   : > { %v1628_v8 = vmul.f32 %v1627_v7, %v1603_v25  ;;  %v1629_v9 = vmul.f32 %v1627_v7, %v1604_v26  ;;  %v1671_v25 = vld [vmem:[%s4554_s1 + $0x8] sm:$0xff] (%p851_p1)  ;;  %v1672_v26 = vld [vmem:[%s4554_s1 + $0x10] sm:$0xff] (%p851_p1) }
 0x256   :  { %1675 = vst.msk [vmem:[%s4557_s5 + $0x8] sm:$0xff] (%p851_p1), %vm19_vm0, %v1671_v25 }
 0x257   : > { %v1632_v10 = vmin.f32 %v1628_v8, 0.0  ;;  %v1633_v11 = vmin.f32 %v1629_v9, 0.0  ;;  %vm1630_vm7 = vcmp.gt.f32.partialorder %v1628_v8, 0.0  ;;  %vm1631_vm8 = vcmp.gt.f32.partialorder %v1629_v9, 0.0  ;;  %1676 = vst.msk [vmem:[%s4557_s5 + $0x10] sm:$0xff] (%p851_p1), %vm19_vm0, %v1672_v26 }
 0x259   : > { %v1634_v12 = vmul.f32 1.442695, %v1632_v10  ;;  %v1636_v13 = vmul.f32 1.442695, %v1633_v11 }
 0x25b   : > { %3722 = vpow2.f32 %v1634_v12 }
 0x25c   : > { %3724 = vpow2.f32 %v1636_v13 }
 0x261   : > { %v3723_v14 = vpop.eup %3722 }
 0x262   : > { %v3725_v3 = vpop.eup %3724  ;;  %v3502_v4 = vadd.f32 -1.0, %v3723_v14 }
 0x263   : > { %v3503_v15 = vadd.f32 -1.0, %v3725_v3 }
 0x264   : > { %v1640_v16 = vsel %vm1630_vm7, %v1628_v8, %v3502_v4 }
 0x265   : > { %v1641_v17 = vsel %vm1631_vm8, %v1629_v9, %v3503_v15  ;;  %1642 = vst.msk [vmem:[#allocation3 + $0x10] sm:$0xff] %vm19_vm0, %v1640_v16 }
 0x266   : > { %1643 = vst.msk [vmem:[#allocation3 + $0x18] sm:$0xff] %vm19_vm0, %v1641_v17 }
 0x26c   : > { %v1646_v20 = vld [vmem:[#allocation3 + $0x10] sm:$0xff]  ;;  %853 = sbr.rel (!%p851_p1) target bundleno = 319 (0x13f), region = 129 }
 0x26d   : > { %v1647_v21 = vld [vmem:[#allocation3 + $0x18] sm:$0xff]  ;;  %v1656_v22 = vadd.f32 %v1652_v18, %v1646_v20 }
 0x26e   : > { %v1657_v23 = vadd.f32 %v1653_v19, %v1647_v21 }
 0x26f   : > { %1660 = vst.msk [vmem:[%s4166_s29 + $0x10] sm:$0xff] %vm19_vm0, %v1656_v22 }
 0x270   : > { %1661 = vst.msk [vmem:[%s4166_s29 + $0x18] sm:$0xff] %vm19_vm0, %v1657_v23 }
 0x271 LB: > { %v3507_v0 = vld [vmem:[%s4556_s3 + $0x4] sm:$0xf]  ;;  %v1698_v28 = vld [vmem:[%s4556_s3] sm:$0xf]  ;;  %v3514_v29 = vld [vmem:[%s4556_s3 + $0x8] sm:$0xf]  ;;  %s3776_s18 = sphi %s4229_s18, %s1683_s18  }
 0x272   : > { %3662 = vmatpush.msk.msra.mxu2 %vm67_vm1, %v3507_v0  ;;  %3663 = vmatpush.msk.msra.mxu3 %vm67_vm1, %v1698_v28  ;;  %v3518_v30 = vld [vmem:[%s4556_s3 + $0xc] sm:$0xf]  ;;  %v3522_v31 = vld [vmem:[%s4556_s3 + $0x10] sm:$0xf]  ;;  %s3505_s29 = sadd.s32 4294967295, %s3776_s18  ;;  %s3581_s4 = sshll.u32 %s3776_s18, 5 }
 0x273   : > { %v3526_v32 = vld [vmem:[%s4556_s3 + $0x14] sm:$0xf]  ;;  %s3506_s2 = sshll.u32 %s3505_s29, 5  ;;  %3508 = vmatpush.msk.msra.mxu0 %vm67_vm1, %v3507_v0  ;;  %3511 = vmatpush.msk.msra.mxu1 %vm67_vm1, %v1698_v28  ;;  %v3530_v36 = vld [vmem:[%s4556_s3 + $0x18] sm:$0xf]  ;;  %s4370_s8 = scalar_lea.vmem %s4554_s1, %s3581_s4 }
 0x274   : > { %3515 = vmatpush.msk.msrb.mxu2 %vm67_vm1, %v3514_v29  ;;  %3519 = vmatpush.msk.msrb.mxu3 %vm67_vm1, %v3518_v30  ;;  %s1686_s7 = scalar_lea.vmem %s4557_s5, %s3506_s2  ;;  %v3534_v37 = vld [vmem:[%s4556_s3 + $0x1c] sm:$0xf]  ;;  %v3538_v40 = vld [vmem:[%s4556_s3 + $0x20] sm:$0xf]  ;;  %v3544_v45 = vld [vmem:[%s4556_s3 + $0x4] sm:$0xf]  ;;  %s4377_s13 = scalar_lea.vmem %s4557_s5, %s3581_s4 }
 0x275   : > { %3523 = vmatpush.msk.msrb.mxu0 %vm67_vm1, %v3522_v31  ;;  %3527 = vmatpush.msk.msrb.mxu1 %vm67_vm1, %v3526_v32  ;;  %v1687_v33 = vld [vmem:[%s1686_s7] sm:$0xff]  ;;  %v1688_v34 = vld [vmem:[%s1686_s7 + $0x8] sm:$0xff]  ;;  %v1689_v35 = vld [vmem:[%s1686_s7 + $0x10] sm:$0xff]  ;;  %s1683_s18 = sadd.s32 1, %s3776_s18  }
 0x276   : > { %1691 = vst.msk [vmem:[#allocation4 + $0x8] sm:$0xff] %vm19_vm0, %v1687_v33  ;;  %v1690_v48 = vld [vmem:[%s1686_s7 + $0x18] sm:$0xff]  ;;  %v2094_v51 = vld [vmem:[%s4556_s3] sm:$0xf]  ;;  %v3551_v52 = vld [vmem:[%s4556_s3 + $0x8] sm:$0xf] }
 0x277   : > { %1692 = vst.msk [vmem:[#allocation4 + $0x10] sm:$0xff] %vm19_vm0, %v1688_v34  ;;  %v3555_v41 = vld [vmem:[%s4556_s3 + $0xc] sm:$0xf]  ;;  %v3559_v42 = vld [vmem:[%s4556_s3 + $0x10] sm:$0xf]  ;;  %p1680_p2 = scmp.ge.s32.totalorder %s1683_s18, 16  }
 0x278   : > { %1694 = vst.msk [vmem:[#allocation4 + $0x28] sm:$0xff] %vm19_vm0, %v1689_v35  ;;  %v3563_v61 = vld [vmem:[%s4556_s3 + $0x14] sm:$0xf]  ;;  %v3567_v62 = vld [vmem:[%s4556_s3 + $0x18] sm:$0xf]  ;;  %s4394_s14 = smov (%p1680_p2), 0  }
 0x279   : > { %1695 = vst.msk [vmem:[#allocation4 + $0x30] sm:$0xff] %vm19_vm0, %v1690_v48  ;;  %v3571_v63 = vld [vmem:[%s4556_s3 + $0x1c] sm:$0xf]  ;;  %v3575_v1 = vld [vmem:[%s4556_s3 + $0x20] sm:$0xf] }
 0x27d   : > { %v1699_v38 = vld [vmem:[#allocation4 + $0x5] sm:$0xff] }
 0x27e   : > { %v1696_v39 = vld [vmem:[#allocation4 + $0x4] sm:$0xff]  ;;  %v1700_v43 = vld [vmem:[#allocation4 + $0xd] sm:$0xff]  ;;  %3509 = vmatmul.msk.f32.vlgmr.msra.gmra.mxu0 %vm19_vm0, %v1699_v38 }
 0x27f   : > { %v1697_v44 = vld [vmem:[#allocation4 + $0xc] sm:$0xff]  ;;  %3512 = vmatmul.msk.f32.vlgmr.msra.gmra.mxu1 %vm19_vm0, %v1696_v39  ;;  %3510 = vmatmul.msk.f32.vlgmr.msra.gmra.mxu2 %vm19_vm0, %v1700_v43  ;;  %v1997_v2 = vld [vmem:[#allocation4 + $0x14] sm:$0xff]  ;;  %v2092_v10 = vld [vmem:[#allocation4 + $0x24] sm:$0xff] }
 0x280   : > { %3513 = vmatmul.msk.f32.vlgmr.msra.gmra.mxu3 %vm19_vm0, %v1697_v44  ;;  %3531 = vmatpush.msk.msra.mxu2 %vm67_vm1, %v3530_v36  ;;  %v1844_v46 = vld [vmem:[#allocation4 + $0x8] sm:$0xff]  ;;  %v1845_v53 = vld [vmem:[#allocation4 + $0x10] sm:$0xff] }
 0x281   : > { %3535 = vmatpush.msk.msra.mxu3 %vm67_vm1, %v3534_v37  ;;  %3539 = vmatpush.msk.msra.mxu0 %vm67_vm1, %v3538_v40  ;;  %v1882_v47 = vld [vmem:[#allocation4 + $0x9] sm:$0xff]  ;;  %v1883_v54 = vld [vmem:[#allocation4 + $0x11] sm:$0xff] }
 0x282   : > { %3545 = vmatpush.msk.msra.mxu1 %vm67_vm1, %v3544_v45  ;;  %v1768_v49 = vld [vmem:[#allocation4 + $0x6] sm:$0xff]  ;;  %v1769_v55 = vld [vmem:[#allocation4 + $0xe] sm:$0xff] }
 0x283   : > { %v1806_v50 = vld [vmem:[#allocation4 + $0x7] sm:$0xff]  ;;  %v1807_v56 = vld [vmem:[#allocation4 + $0xf] sm:$0xff] }
 0x284   : > { %v2095_v57 = vld [vmem:[#allocation4 + $0x25] sm:$0xff]  ;;  %v2096_v5 = vld [vmem:[#allocation4 + $0x2d] sm:$0xff] }
 0x285   : > { %v1920_v59 = vld [vmem:[#allocation4 + $0xa] sm:$0xff]  ;;  %v1921_v6 = vld [vmem:[#allocation4 + $0x12] sm:$0xff] }
 0x286   : > { %3524 = vmatmul.msk.f32.vlgmr.msrb.gmra.mxu0 %vm19_vm0, %v1844_v46  ;;  %v1958_v60 = vld [vmem:[#allocation4 + $0xb] sm:$0xff]  ;;  %v1959_v7 = vld [vmem:[#allocation4 + $0x13] sm:$0xff] }
 0x287   : > { %3528 = vmatmul.msk.f32.vlgmr.msrb.gmra.mxu1 %vm19_vm0, %v1882_v47  ;;  %3516 = vmatmul.msk.f32.vlgmr.msrb.gmra.mxu2 %vm19_vm0, %v1768_v49  ;;  %v2199_v8 = vld [vmem:[#allocation4 + $0x27] sm:$0xff]  ;;  %v2200_v12 = vld [vmem:[#allocation4 + $0x2f] sm:$0xff] }
 0x288   : > { %3520 = vmatmul.msk.f32.vlgmr.msrb.gmra.mxu3 %vm19_vm0, %v1806_v50  ;;  %3548 = vmatpush.msk.msrb.mxu2 %vm67_vm1, %v2094_v51  ;;  %v2236_v9 = vld [vmem:[#allocation4 + $0x28] sm:$0xff]  ;;  %v2237_v13 = vld [vmem:[#allocation4 + $0x30] sm:$0xff] }
 0x289   : > { %3552 = vmatpush.msk.msrb.mxu3 %vm67_vm1, %v3551_v52  ;;  %3556 = vmatpush.msk.msrb.mxu0 %vm67_vm1, %v3555_v41  ;;  %v2162_v11 = vld [vmem:[#allocation4 + $0x26] sm:$0xff]  ;;  %v2163_v3 = vld [vmem:[#allocation4 + $0x2e] sm:$0xff] }
 0x28a   : > { %3560 = vmatpush.msk.msrb.mxu1 %vm67_vm1, %v3559_v42  ;;  %v2093_v14 = vld [vmem:[#allocation4 + $0x2c] sm:$0xff]  ;;  %v2385_v18 = vld [vmem:[#allocation4 + $0x34] sm:$0xff] }
 0x28b   : > { %v2347_v4 = vld [vmem:[#allocation4 + $0x2b] sm:$0xff]  ;;  %v2348_v17 = vld [vmem:[#allocation4 + $0x33] sm:$0xff] }
 0x28c   : > { %v2273_v15 = vld [vmem:[#allocation4 + $0x29] sm:$0xff]  ;;  %v2274_v19 = vld [vmem:[#allocation4 + $0x31] sm:$0xff] }
 0x28d   : > { %v2310_v16 = vld [vmem:[#allocation4 + $0x2a] sm:$0xff]  ;;  %v2311_v20 = vld [vmem:[#allocation4 + $0x32] sm:$0xff] }
 0x28e   : > { %3525 = vmatmul.msk.f32.gmra.mxu0 %vm19_vm0, %v1845_v53 }
 0x28f   : > { %3529 = vmatmul.msk.f32.gmra.mxu1 %vm19_vm0, %v1883_v54  ;;  %3517 = vmatmul.msk.f32.gmra.mxu2 %vm19_vm0, %v1769_v55 }
 0x290   : > { %3521 = vmatmul.msk.f32.gmra.mxu3 %vm19_vm0, %v1807_v56 }
 0x296   : > { %3540 = vmatmul.msk.f32.vlgmr.msra.gmra.mxu0 %vm19_vm0, %v1697_v44 }
 0x297   : > { %3546 = vmatmul.msk.f32.vlgmr.msra.gmra.mxu1 %vm19_vm0, %v2095_v57  ;;  %3532 = vmatmul.msk.f32.vlgmr.msra.gmra.mxu2 %vm19_vm0, %v1920_v59 }
 0x298   : > { %3536 = vmatmul.msk.f32.vlgmr.msra.gmra.mxu3 %vm19_vm0, %v1958_v60  ;;  %3564 = vmatpush.msk.msra.mxu2 %vm67_vm1, %v3563_v61 }
 0x299   : > { %3568 = vmatpush.msk.msra.mxu3 %vm67_vm1, %v3567_v62  ;;  %3572 = vmatpush.msk.msra.mxu0 %vm67_vm1, %v3571_v63 }
 0x29a   : > { %3576 = vmatpush.msk.msra.mxu1 %vm67_vm1, %v3575_v1 }
 0x29e   : > { %3541 = vmatmul.msk.f32.gmra.mxu0 %vm19_vm0, %v1997_v2 }
 0x29f   : > { %3547 = vmatmul.msk.f32.gmra.mxu1 %vm19_vm0, %v2096_v5  ;;  %3533 = vmatmul.msk.f32.gmra.mxu2 %vm19_vm0, %v1921_v6 }
 0x2a0   : > { %3537 = vmatmul.msk.f32.gmra.mxu3 %vm19_vm0, %v1959_v7 }
 0x2a6   : > { %3557 = vmatmul.msk.f32.vlgmr.msrb.gmra.mxu0 %vm19_vm0, %v2199_v8 }
 0x2a7   : > { %3561 = vmatmul.msk.f32.vlgmr.msrb.gmra.mxu1 %vm19_vm0, %v2236_v9  ;;  %3549 = vmatmul.msk.f32.vlgmr.msrb.gmra.mxu2 %vm19_vm0, %v2092_v10 }
 0x2a8   : > { %3553 = vmatmul.msk.f32.vlgmr.msrb.gmra.mxu3 %vm19_vm0, %v2162_v11 }
 0x2ae   : > { %3558 = vmatmul.msk.f32.gmra.mxu0 %vm19_vm0, %v2200_v12 }
 0x2af   : > { %3562 = vmatmul.msk.f32.gmra.mxu1 %vm19_vm0, %v2237_v13  ;;  %3550 = vmatmul.msk.f32.gmra.mxu2 %vm19_vm0, %v2093_v14 }
 0x2b0   : > { %3554 = vmatmul.msk.f32.gmra.mxu3 %vm19_vm0, %v2163_v3 }
 0x2b6   : > { %3573 = vmatmul.msk.f32.vlgmr.msra.gmra.mxu0 %vm19_vm0, %v2347_v4 }
 0x2b7   : > { %3577 = vmatmul.msk.f32.vlgmr.msra.gmra.mxu1 %vm19_vm0, %v2093_v14  ;;  %3565 = vmatmul.msk.f32.vlgmr.msra.gmra.mxu2 %vm19_vm0, %v2273_v15 }
 0x2b8   : > { %3569 = vmatmul.msk.f32.vlgmr.msra.gmra.mxu3 %vm19_vm0, %v2310_v16 }
 0x2be   : > { %3574 = vmatmul.msk.f32.gmra.mxu0 %vm19_vm0, %v2348_v17 }
 0x2bf   : > { %3578 = vmatmul.msk.f32.gmra.mxu1 %vm19_vm0, %v2385_v18  ;;  %3566 = vmatmul.msk.f32.gmra.mxu2 %vm19_vm0, %v2274_v19 }
 0x2c0   : > { %3570 = vmatmul.msk.f32.gmra.mxu3 %vm19_vm0, %v2311_v20 }
 0x2fb   : > { %v1730_v21 = vpop.f32.mrf.mxu0 }
 0x2fc   : > { %v1762_v22 = vpop.f32.mrf.mxu1 }
 0x2fd   : > { %v1763_v30 = vadd.f32 %v1762_v22, %v1730_v21 }
 0x302   : > { %v1733_v23 = vpop.f32.mrf.mxu2 }
 0x303   : > { %v1765_v24 = vpop.f32.mrf.mxu3  ;;  %v1874_v25 = vpop.f32.mrf.mxu0 }
 0x304   : > { %v1912_v26 = vpop.f32.mrf.mxu1  ;;  %v1766_v34 = vadd.f32 %v1765_v24, %v1733_v23 }
 0x30a   : > { %v1798_v27 = vpop.f32.mrf.mxu2 }
 0x30b   : > { %v1836_v0 = vpop.f32.mrf.mxu3  ;;  %v1877_v28 = vpop.f32.mrf.mxu0  ;;  %v1804_v31 = vadd.f32 %v1798_v27, %v1763_v30 }
 0x30c   : > { %v1915_v29 = vpop.f32.mrf.mxu1 }
 0x30d   : > { %v1842_v35 = vadd.f32 %v1836_v0, %v1804_v31 }
 0x30f   : > { %v1880_v39 = vadd.f32 %v1874_v25, %v1842_v35 }
 0x311   : > { %v1918_v45 = vadd.f32 %v1912_v26, %v1880_v39 }
 0x312   : > { %v1801_v32 = vpop.f32.mrf.mxu2 }
 0x313   : > { %v1839_v33 = vpop.f32.mrf.mxu3  ;;  %v2026_v36 = vpop.f32.mrf.mxu0  ;;  %v1805_v38 = vadd.f32 %v1801_v32, %v1766_v34 }
 0x314   : > { %v2124_v37 = vpop.f32.mrf.mxu1 }
 0x315   : > { %v1843_v40 = vadd.f32 %v1839_v33, %v1805_v38 }
 0x317   : > { %v1881_v47 = vadd.f32 %v1877_v28, %v1843_v40 }
 0x319   : > { %v1919_v50 = vadd.f32 %v1915_v29, %v1881_v47 }
 0x31a   : > { %v1950_v43 = vpop.f32.mrf.mxu2 }
 0x31b   : > { %v1988_v44 = vpop.f32.mrf.mxu3  ;;  %v2029_v46 = vpop.f32.mrf.mxu0  ;;  %v1956_v48 = vadd.f32 %v1950_v43, %v1918_v45 }
 0x31c   : > { %v2127_v49 = vpop.f32.mrf.mxu1 }
 0x31d   : > { %v1994_v51 = vadd.f32 %v1988_v44, %v1956_v48 }
 0x31f   : > { %v2032_v53 = vadd.f32 %v2026_v36, %v1994_v51 }
 0x321   : > { %v2034_v59 = vsel %vm19_vm0, %v2032_v53, 0.0 }
 0x322   : > { %v1953_v52 = vpop.f32.mrf.mxu2 }
 0x323   : > { %v1991_v41 = vpop.f32.mrf.mxu3  ;;  %v1957_v42 = vadd.f32 %v1953_v52, %v1919_v50  ;;  %v2228_v55 = vpop.f32.mrf.mxu0 }
 0x324   : > { %v2265_v57 = vpop.f32.mrf.mxu1 }
 0x325   : > { %v1995_v54 = vadd.f32 %v1991_v41, %v1957_v42 }
 0x327   : > { %v2033_v56 = vadd.f32 %v2029_v46, %v1995_v54 }
 0x329   : > { %v2035_v60 = vsel %vm19_vm0, %v2033_v56, 0.0 }
 0x32a   : > { %v2036_v61 = vadd.f32 %v2035_v60, %v2034_v59  ;;  %v2156_v62 = vpop.f32.mrf.mxu2 }
 0x32b   : > { %v2191_v63 = vpop.f32.mrf.mxu3  ;;  %v2157_v2 = vadd.f32 %v2156_v62, %v2124_v37  ;;  %v2231_v6 = vpop.f32.mrf.mxu0 }
 0x32c   : > { %v2037_v1 = vrot.slane %v2036_v61, 4  ;;  %v2268_v9 = vpop.f32.mrf.mxu1 }
 0x32d   : > { %v2197_v8 = vadd.f32 %v2191_v63, %v2157_v2 }
 0x32e   : > { %v2038_v5 = vadd.f32 %v2037_v1, %v2036_v61 }
 0x32f   : > { %v2234_v14 = vadd.f32 %v2228_v55, %v2197_v8 }
 0x330   : > { %v2039_v7 = vrot.slane %v2038_v5, 2 }
 0x331   : > { %v2271_v16 = vadd.f32 %v2265_v57, %v2234_v14 }
 0x332   : > { %v2040_v10 = vadd.f32 %v2039_v7, %v2038_v5  ;;  %v2159_v11 = vpop.f32.mrf.mxu2 }
 0x333   : > { %v2194_v12 = vpop.f32.mrf.mxu3  ;;  %v2160_v3 = vadd.f32 %v2159_v11, %v2127_v49  ;;  %v2376_v18 = vpop.f32.mrf.mxu0 }
 0x334   : > { %v2041_v13 = vrot.slane %v2040_v10, 1  ;;  %v2413_v26 = vpop.f32.mrf.mxu1 }
 0x335   : > { %v2198_v17 = vadd.f32 %v2194_v12, %v2160_v3 }
 0x336   : > { %v2042_v4 = vadd.f32 %v2041_v13, %v2040_v10 }
 0x337   : > { %v2235_v27 = vadd.f32 %v2231_v6, %v2198_v17 }
 0x338   : > { %v2050_v15 = vmul.f32 %v2042_v4, %v3983_v58 }
 0x339   : > { %v2272_v32 = vadd.f32 %v2268_v9, %v2235_v27 }
 0x33a   : > { %v2051_v19 = vsub.f32 %v2032_v53, %v2050_v15  ;;  %v2052_v20 = vsub.f32 %v2033_v56, %v2050_v15  ;;  %v2302_v21 = vpop.f32.mrf.mxu2 }
 0x33b   : > { %v2339_v22 = vpop.f32.mrf.mxu3  ;;  %v2308_v23 = vadd.f32 %v2302_v21, %v2271_v16  ;;  %v2379_v38 = vpop.f32.mrf.mxu0 }
 0x33c   : > { %v2053_v24 = vmul.f32 %v2051_v19, %v2051_v19  ;;  %v2054_v25 = vmul.f32 %v2052_v20, %v2052_v20  ;;  %v2416_v43 = vpop.f32.mrf.mxu1 }
 0x33d   : > { %v2345_v30 = vadd.f32 %v2339_v22, %v2308_v23 }
 0x33e   : > { %v2055_v0 = vsel %vm19_vm0, %v2053_v24, 0.0  ;;  %v2056_v28 = vsel %vm19_vm0, %v2054_v25, 0.0 }
 0x33f   : > { %v2057_v29 = vadd.f32 %v2056_v28, %v2055_v0  ;;  %v2382_v36 = vadd.f32 %v2376_v18, %v2345_v30 }
 0x341   : > { %v2058_v31 = vrot.slane %v2057_v29, 4  ;;  %v2419_v45 = vadd.f32 %v2413_v26, %v2382_v36 }
 0x342   : > { %v2305_v33 = vpop.f32.mrf.mxu2 }
 0x343   : > { %v2342_v34 = vpop.f32.mrf.mxu3  ;;  %v2059_v35 = vadd.f32 %v2058_v31, %v2057_v29  ;;  %v2309_v37 = vadd.f32 %v2305_v33, %v2272_v32  ;;  %v2421_v50 = vsel %vm19_vm0, %v2419_v45, 0.0  ;;  %v2478_v31 = vld [vmem:[%s4370_s8] sm:$0xff]  ;;  %v2479_v32 = vld [vmem:[%s4370_s8 + $0x8] sm:$0xff] }
 0x345   : > { %v2060_v39 = vrot.slane %v2059_v35, 2  ;;  %v2346_v40 = vadd.f32 %v2342_v34, %v2309_v37 }
 0x347   : > { %v2061_v44 = vadd.f32 %v2060_v39, %v2059_v35  ;;  %v2383_v46 = vadd.f32 %v2379_v38, %v2346_v40 }
 0x349   : > { %v2062_v47 = vrot.slane %v2061_v44, 1  ;;  %v2420_v48 = vadd.f32 %v2416_v43, %v2383_v46 }
 0x34b   : > { %v2063_v49 = vadd.f32 %v2062_v47, %v2061_v44  ;;  %v2422_v51 = vsel %vm19_vm0, %v2420_v48, 0.0 }
 0x34c   : > { %v2423_v52 = vadd.f32 %v2422_v51, %v2421_v50 }
 0x34d   : > { %v2064_v41 = vmul.f32 %v2063_v49, %v3983_v58 }
 0x34e   : > { %v2424_v42 = vrot.slane %v2423_v52, 4 }
 0x34f   : > { %v2065_v53 = vadd.f32 1e-05, %v2064_v41 }
 0x350   : > { %v2425_v54 = vadd.f32 %v2424_v42, %v2423_v52 }
 0x351   : > { %3726 = vrsqrt.f32 %v2065_v53  ;;  %vm2072_vm10 = vweird.f32 %v2065_v53 }
 0x352   : > { %v2426_v55 = vrot.slane %v2425_v54, 2 }
 0x354   : > { %v2427_v56 = vadd.f32 %v2426_v55, %v2425_v54 }
 0x356   : > { %v2428_v57 = vrot.slane %v2427_v56, 1 }
 0x357   : > { %v3727_v59 = vpop.eup %3726 }
 0x358   : > { %v2067_v60 = vmul.f32 %v3727_v59, %v2065_v53  ;;  %v2429_v61 = vadd.f32 %v2428_v57, %v2427_v56  ;;  %vm2073_vm9 = vweird.f32 %v3727_v59  ;;  %v2480_v56 = vld [vmem:[%s4370_s8 + $0x10] sm:$0xff]  ;;  %v2481_v57 = vld [vmem:[%s4370_s8 + $0x18] sm:$0xff] }
 0x359   : > { %vm2074_vm11 = vmor %vm2072_vm10, %vm2073_vm9 }
 0x35a   : > { %v2068_v62 = vmul.f32 %v3727_v59, %v2067_v60  ;;  %v2430_v63 = vmul.f32 %v2429_v61, %v3983_v58 }
 0x35c   : > { %v2069_v1 = vmul.f32 0.5, %v2068_v62  ;;  %v2431_v2 = vsub.f32 %v2419_v45, %v2430_v63  ;;  %v2432_v5 = vsub.f32 %v2420_v48, %v2430_v63 }
 0x35e   : > { %v2070_v6 = vsub.f32 1.5, %v2069_v1  ;;  %v2433_v7 = vmul.f32 %v2431_v2, %v2431_v2  ;;  %v2434_v8 = vmul.f32 %v2432_v5, %v2432_v5 }
 0x360   : > { %v2071_v9 = vmul.f32 %v3727_v59, %v2070_v6  ;;  %v2435_v10 = vsel %vm19_vm0, %v2433_v7, 0.0  ;;  %v2436_v11 = vsel %vm19_vm0, %v2434_v8, 0.0 }
 0x361   : > { %v2437_v12 = vadd.f32 %v2436_v11, %v2435_v10 }
 0x362   : > { %v2075_v13 = vsel %vm2074_vm11, %v3727_v59, %v2071_v9 }
 0x363   : > { %v2076_v14 = vmul.f32 %v2075_v13, %v2051_v19  ;;  %v2077_v3 = vmul.f32 %v2075_v13, %v2052_v20  ;;  %v2438_v4 = vrot.slane %v2437_v12, 4 }
 0x365   : > { %v2080_v15 = vmin.f32 %v2076_v14, 0.0  ;;  %v2081_v16 = vmin.f32 %v2077_v3, 0.0  ;;  %v2439_v17 = vadd.f32 %v2438_v4, %v2437_v12  ;;  %vm2078_vm12 = vcmp.gt.f32.partialorder %v2076_v14, 0.0 }
 0x366   : > { %vm2079_vm13 = vcmp.gt.f32.partialorder %v2077_v3, 0.0 }
 0x367   : > { %v2082_v18 = vmul.f32 1.442695, %v2080_v15  ;;  %v2084_v21 = vmul.f32 1.442695, %v2081_v16  ;;  %v2440_v22 = vrot.slane %v2439_v17, 2 }
 0x369   : > { %3728 = vpow2.f32 %v2082_v18  ;;  %v2441_v23 = vadd.f32 %v2440_v22, %v2439_v17 }
 0x36a   : > { %3730 = vpow2.f32 %v2084_v21 }
 0x36b   : > { %v2442_v24 = vrot.slane %v2441_v23, 1 }
 0x36d   : > { %v2443_v25 = vadd.f32 %v2442_v24, %v2441_v23 }
 0x36f   : > { %v3729_v26 = vpop.eup %3728  ;;  %v2444_v28 = vmul.f32 %v2443_v25, %v3983_v58 }
 0x370   : > { %v3731_v27 = vpop.eup %3730  ;;  %v3542_v0 = vadd.f32 -1.0, %v3729_v26 }
 0x371   : > { %v3543_v19 = vadd.f32 -1.0, %v3731_v27  ;;  %v2445_v29 = vadd.f32 1e-05, %v2444_v28 }
 0x372   : > { %v2088_v20 = vsel %vm2078_vm12, %v2076_v14, %v3542_v0 }
 0x373   : > { %v2089_v30 = vsel %vm2079_vm13, %v2077_v3, %v3543_v19  ;;  %2090 = vst.msk [vmem:[#allocation5] sm:$0xff] %vm19_vm0, %v2088_v20  ;;  %3732 = vrsqrt.f32 %v2445_v29  ;;  %vm2452_vm15 = vweird.f32 %v2445_v29 }
 0x374   : > { %2091 = vst.msk [vmem:[#allocation5 + $0x8] sm:$0xff] %vm19_vm0, %v2089_v30 }
 0x379   : > { %v3733_v33 = vpop.eup %3732 }
 0x37a   : > { %v2472_v34 = vld [vmem:[#allocation5] sm:$0xff]  ;;  %v2447_v37 = vmul.f32 %v3733_v33, %v2445_v29  ;;  %vm2453_vm14 = vweird.f32 %v3733_v33 }
 0x37b   : > { %v2473_v35 = vld [vmem:[#allocation5 + $0x8] sm:$0xff]  ;;  %v2482_v36 = vadd.f32 %v2478_v31, %v2472_v34  ;;  %vm2454_vm2 = vmor %vm2452_vm15, %vm2453_vm14 }
 0x37c   : > { %v2483_v38 = vadd.f32 %v2479_v32, %v2473_v35  ;;  %v2448_v39 = vmul.f32 %v3733_v33, %v2447_v37 }
 0x37d   : > { %2487 = vst.msk [vmem:[%s4377_s13] sm:$0xff] %vm19_vm0, %v2482_v36 }
 0x37e   : > { %2488 = vst.msk [vmem:[%s4377_s13 + $0x8] sm:$0xff] %vm19_vm0, %v2483_v38  ;;  %v2449_v40 = vmul.f32 0.5, %v2448_v39 }
 0x380   : > { %v2450_v43 = vsub.f32 1.5, %v2449_v40 }
 0x382   : > { %v2451_v44 = vmul.f32 %v3733_v33, %v2450_v43 }
 0x384   : > { %v2455_v45 = vsel %vm2454_vm2, %v3733_v33, %v2451_v44 }
 0x385   : > { %v2456_v46 = vmul.f32 %v2455_v45, %v2431_v2  ;;  %v2457_v47 = vmul.f32 %v2455_v45, %v2432_v5 }
 0x387   : > { %v2460_v48 = vmin.f32 %v2456_v46, 0.0  ;;  %v2461_v49 = vmin.f32 %v2457_v47, 0.0  ;;  %vm2458_vm3 = vcmp.gt.f32.partialorder %v2456_v46, 0.0  ;;  %vm2459_vm4 = vcmp.gt.f32.partialorder %v2457_v47, 0.0 }
 0x389   : > { %v2462_v50 = vmul.f32 1.442695, %v2460_v48  ;;  %v2464_v51 = vmul.f32 1.442695, %v2461_v49 }
 0x38b   : > { %3734 = vpow2.f32 %v2462_v50 }
 0x38c   : > { %3736 = vpow2.f32 %v2464_v51 }
 0x391   : > { %v3735_v52 = vpop.eup %3734 }
 0x392   : > { %v3737_v41 = vpop.eup %3736  ;;  %v3579_v42 = vadd.f32 -1.0, %v3735_v52 }
 0x393   : > { %v3580_v53 = vadd.f32 -1.0, %v3737_v41 }
 0x394   : > { %v2468_v54 = vsel %vm2458_vm3, %v2456_v46, %v3579_v42 }
 0x395   : > { %v2469_v55 = vsel %vm2459_vm4, %v2457_v47, %v3580_v53  ;;  %2470 = vst.msk [vmem:[#allocation5 + $0x10] sm:$0xff] %vm19_vm0, %v2468_v54 }
 0x396   : > { %2471 = vst.msk [vmem:[#allocation5 + $0x18] sm:$0xff] %vm19_vm0, %v2469_v55 }
 0x39c   : > { %v2474_v59 = vld [vmem:[#allocation5 + $0x10] sm:$0xff]  ;;  %1682 = sbr.rel (!%p1680_p2) target bundleno = 625 (0x271), region = 140 }
 0x39d   : > { %v2475_v60 = vld [vmem:[#allocation5 + $0x18] sm:$0xff]  ;;  %v2484_v61 = vadd.f32 %v2480_v56, %v2474_v59 }
 0x39e   : > { %v2485_v62 = vadd.f32 %v2481_v57, %v2475_v60 }
 0x39f   : > { %2489 = vst.msk [vmem:[%s4377_s13 + $0x10] sm:$0xff] %vm19_vm0, %v2484_v61 }
 0x3a0   : > { %2490 = vst.msk [vmem:[%s4377_s13 + $0x18] sm:$0xff] %vm19_vm0, %v2485_v62 }
 0x3a1 LB: > { %v3583_v63 = vld [vmem:[%s4556_s3 + $0x4] sm:$0xf]  ;;  %v2512_v1 = vld [vmem:[%s4556_s3] sm:$0xf]  ;;  %v3590_v2 = vld [vmem:[%s4556_s3 + $0x8] sm:$0xf]  ;;  %s3780_s14 = sphi %s4394_s14, %s2496_s14  }
 0x3a2   : > { %3664 = vmatpush.msk.msra.mxu2 %vm67_vm1, %v3583_v63  ;;  %3665 = vmatpush.msk.msra.mxu3 %vm67_vm1, %v2512_v1  ;;  %v3594_v5 = vld [vmem:[%s4556_s3 + $0xc] sm:$0xf]  ;;  %v3598_v6 = vld [vmem:[%s4556_s3 + $0x10] sm:$0xf]  ;;  %s2498_s22 = ssub.s32 15, %s3780_s14 }
 0x3a3   : > { %v3602_v7 = vld [vmem:[%s4556_s3 + $0x14] sm:$0xf]  ;;  %s3582_s25 = sshll.u32 %s2498_s22, 5  ;;  %3584 = vmatpush.msk.msra.mxu0 %vm67_vm1, %v3583_v63  ;;  %3587 = vmatpush.msk.msra.mxu1 %vm67_vm1, %v2512_v1  ;;  %v3606_v11 = vld [vmem:[%s4556_s3 + $0x18] sm:$0xf] }
 0x3a4   : > { %3591 = vmatpush.msk.msrb.mxu2 %vm67_vm1, %v3590_v2  ;;  %3595 = vmatpush.msk.msrb.mxu3 %vm67_vm1, %v3594_v5  ;;  %s2500_s28 = scalar_lea.vmem %s4557_s5, %s3582_s25  ;;  %v3610_v12 = vld [vmem:[%s4556_s3 + $0x1c] sm:$0xf]  ;;  %v3614_v3 = vld [vmem:[%s4556_s3 + $0x20] sm:$0xf]  ;;  %v3620_v16 = vld [vmem:[%s4556_s3 + $0x4] sm:$0xf] }
 0x3a5   : > { %3599 = vmatpush.msk.msrb.mxu0 %vm67_vm1, %v3598_v6  ;;  %3603 = vmatpush.msk.msrb.mxu1 %vm67_vm1, %v3602_v7  ;;  %v2908_v24 = vld [vmem:[%s4556_s3] sm:$0xf]  ;;  %v3627_v25 = vld [vmem:[%s4556_s3 + $0x8] sm:$0xf]  ;;  %v3631_v26 = vld [vmem:[%s4556_s3 + $0xc] sm:$0xf] }
 0x3a6   : > { %v3635_v27 = vld [vmem:[%s4556_s3 + $0x10] sm:$0xf]  ;;  %v3639_v32 = vld [vmem:[%s4556_s3 + $0x14] sm:$0xf]  ;;  %v3643_v33 = vld [vmem:[%s4556_s3 + $0x18] sm:$0xf] }
 0x3a7   : > { %v2501_v8 = vld [vmem:[%s2500_s28] sm:$0xff]  ;;  %v2502_v9 = vld [vmem:[%s2500_s28 + $0x8] sm:$0xff]  ;;  %v2503_v10 = vld [vmem:[%s2500_s28 + $0x10] sm:$0xff]  ;;  %s2497_s25 = ssub.s32 14, %s3780_s14  ;;  %s2496_s14 = sadd.s32 1, %s3780_s14  }
 0x3a8   : > { %2505 = vst.msk [vmem:[#allocation4 + $0x8] sm:$0xff] %vm19_vm0, %v2501_v8  ;;  %v2504_v21 = vld [vmem:[%s2500_s28 + $0x18] sm:$0xff]  ;;  %v3651_v35 = vld [vmem:[%s4556_s3 + $0x20] sm:$0xf]  ;;  %s3657_s26 = sshll.u32 %s2497_s25, 5  ;;  %p2493_p3 = scmp.ge.s32.totalorder %s2496_s14, 15  }
 0x3a9   : > { %2506 = vst.msk [vmem:[#allocation4 + $0x10] sm:$0xff] %vm19_vm0, %v2502_v9  ;;  %v3647_v34 = vld [vmem:[%s4556_s3 + $0x1c] sm:$0xf]  ;;  %s4535_s29 = scalar_lea.vmem %s4557_s5, %s3657_s26 }
 0x3aa   : > { %2508 = vst.msk [vmem:[#allocation4 + $0x28] sm:$0xff] %vm19_vm0, %v2503_v10 }
 0x3ab   : > { %2509 = vst.msk [vmem:[#allocation4 + $0x30] sm:$0xff] %vm19_vm0, %v2504_v21 }
 0x3af   : > { %v2513_v13 = vld [vmem:[#allocation4 + $0x5] sm:$0xff] }
 0x3b0   : > { %v2510_v14 = vld [vmem:[#allocation4 + $0x4] sm:$0xff]  ;;  %v2514_v4 = vld [vmem:[#allocation4 + $0xd] sm:$0xff]  ;;  %3585 = vmatmul.msk.f32.vlgmr.msra.gmra.mxu0 %vm19_vm0, %v2513_v13 }
 0x3b1   : > { %v2511_v15 = vld [vmem:[#allocation4 + $0xc] sm:$0xff]  ;;  %3588 = vmatmul.msk.f32.vlgmr.msra.gmra.mxu1 %vm19_vm0, %v2510_v14  ;;  %3586 = vmatmul.msk.f32.vlgmr.msra.gmra.mxu2 %vm19_vm0, %v2514_v4  ;;  %v2811_v36 = vld [vmem:[#allocation4 + $0x14] sm:$0xff]  ;;  %v2906_v44 = vld [vmem:[#allocation4 + $0x24] sm:$0xff] }
 0x3b2   : > { %3589 = vmatmul.msk.f32.vlgmr.msra.gmra.mxu3 %vm19_vm0, %v2511_v15  ;;  %3607 = vmatpush.msk.msra.mxu2 %vm67_vm1, %v3606_v11  ;;  %v2658_v17 = vld [vmem:[#allocation4 + $0x8] sm:$0xff]  ;;  %v2659_v0 = vld [vmem:[#allocation4 + $0x10] sm:$0xff] }
 0x3b3   : > { %3611 = vmatpush.msk.msra.mxu3 %vm67_vm1, %v3610_v12  ;;  %3615 = vmatpush.msk.msra.mxu0 %vm67_vm1, %v3614_v3  ;;  %v2696_v18 = vld [vmem:[#allocation4 + $0x9] sm:$0xff]  ;;  %v2697_v28 = vld [vmem:[#allocation4 + $0x11] sm:$0xff] }
 0x3b4   : > { %3621 = vmatpush.msk.msra.mxu1 %vm67_vm1, %v3620_v16  ;;  %v2582_v22 = vld [vmem:[#allocation4 + $0x6] sm:$0xff]  ;;  %v2583_v19 = vld [vmem:[#allocation4 + $0xe] sm:$0xff] }
 0x3b5   : > { %v2620_v23 = vld [vmem:[#allocation4 + $0x7] sm:$0xff]  ;;  %v2621_v20 = vld [vmem:[#allocation4 + $0xf] sm:$0xff] }
 0x3b6   : > { %v2909_v29 = vld [vmem:[#allocation4 + $0x25] sm:$0xff]  ;;  %v2910_v37 = vld [vmem:[#allocation4 + $0x2d] sm:$0xff] }
 0x3b7   : > { %v2734_v30 = vld [vmem:[#allocation4 + $0xa] sm:$0xff]  ;;  %v2735_v38 = vld [vmem:[#allocation4 + $0x12] sm:$0xff] }
 0x3b8   : > { %3600 = vmatmul.msk.f32.vlgmr.msrb.gmra.mxu0 %vm19_vm0, %v2658_v17  ;;  %v2772_v31 = vld [vmem:[#allocation4 + $0xb] sm:$0xff]  ;;  %v2773_v39 = vld [vmem:[#allocation4 + $0x13] sm:$0xff] }
 0x3b9   : > { %3604 = vmatmul.msk.f32.vlgmr.msrb.gmra.mxu1 %vm19_vm0, %v2696_v18  ;;  %3592 = vmatmul.msk.f32.vlgmr.msrb.gmra.mxu2 %vm19_vm0, %v2582_v22  ;;  %v3013_v40 = vld [vmem:[#allocation4 + $0x27] sm:$0xff]  ;;  %v3014_v46 = vld [vmem:[#allocation4 + $0x2f] sm:$0xff] }
 0x3ba   : > { %3596 = vmatmul.msk.f32.vlgmr.msrb.gmra.mxu3 %vm19_vm0, %v2620_v23  ;;  %3624 = vmatpush.msk.msrb.mxu2 %vm67_vm1, %v2908_v24  ;;  %v3050_v43 = vld [vmem:[#allocation4 + $0x28] sm:$0xff]  ;;  %v3051_v47 = vld [vmem:[#allocation4 + $0x30] sm:$0xff] }
 0x3bb   : > { %3628 = vmatpush.msk.msrb.mxu3 %vm67_vm1, %v3627_v25  ;;  %3632 = vmatpush.msk.msrb.mxu0 %vm67_vm1, %v3631_v26  ;;  %v2976_v45 = vld [vmem:[#allocation4 + $0x26] sm:$0xff]  ;;  %v2977_v49 = vld [vmem:[#allocation4 + $0x2e] sm:$0xff] }
 0x3bc   : > { %3636 = vmatpush.msk.msrb.mxu1 %vm67_vm1, %v3635_v27  ;;  %v2907_v48 = vld [vmem:[#allocation4 + $0x2c] sm:$0xff]  ;;  %v3199_v42 = vld [vmem:[#allocation4 + $0x34] sm:$0xff] }
 0x3bd   : > { %v3161_v50 = vld [vmem:[#allocation4 + $0x2b] sm:$0xff]  ;;  %v3162_v41 = vld [vmem:[#allocation4 + $0x33] sm:$0xff] }
 0x3be   : > { %v3087_v51 = vld [vmem:[#allocation4 + $0x29] sm:$0xff]  ;;  %v3088_v53 = vld [vmem:[#allocation4 + $0x31] sm:$0xff] }
 0x3bf   : > { %v3124_v52 = vld [vmem:[#allocation4 + $0x2a] sm:$0xff]  ;;  %v3125_v54 = vld [vmem:[#allocation4 + $0x32] sm:$0xff] }
 0x3c0   : > { %3601 = vmatmul.msk.f32.gmra.mxu0 %vm19_vm0, %v2659_v0 }
 0x3c1   : > { %3605 = vmatmul.msk.f32.gmra.mxu1 %vm19_vm0, %v2697_v28  ;;  %3593 = vmatmul.msk.f32.gmra.mxu2 %vm19_vm0, %v2583_v19 }
 0x3c2   : > { %3597 = vmatmul.msk.f32.gmra.mxu3 %vm19_vm0, %v2621_v20 }
 0x3c8   : > { %3616 = vmatmul.msk.f32.vlgmr.msra.gmra.mxu0 %vm19_vm0, %v2511_v15 }
 0x3c9   : > { %3622 = vmatmul.msk.f32.vlgmr.msra.gmra.mxu1 %vm19_vm0, %v2909_v29  ;;  %3608 = vmatmul.msk.f32.vlgmr.msra.gmra.mxu2 %vm19_vm0, %v2734_v30 }
 0x3ca   : > { %3612 = vmatmul.msk.f32.vlgmr.msra.gmra.mxu3 %vm19_vm0, %v2772_v31  ;;  %3640 = vmatpush.msk.msra.mxu2 %vm67_vm1, %v3639_v32 }
 0x3cb   : > { %3644 = vmatpush.msk.msra.mxu3 %vm67_vm1, %v3643_v33  ;;  %3648 = vmatpush.msk.msra.mxu0 %vm67_vm1, %v3647_v34 }
 0x3cc   : > { %3652 = vmatpush.msk.msra.mxu1 %vm67_vm1, %v3651_v35 }
 0x3d0   : > { %3617 = vmatmul.msk.f32.gmra.mxu0 %vm19_vm0, %v2811_v36 }
 0x3d1   : > { %3623 = vmatmul.msk.f32.gmra.mxu1 %vm19_vm0, %v2910_v37  ;;  %3609 = vmatmul.msk.f32.gmra.mxu2 %vm19_vm0, %v2735_v38 }
 0x3d2   : > { %3613 = vmatmul.msk.f32.gmra.mxu3 %vm19_vm0, %v2773_v39 }
 0x3d8   : > { %3633 = vmatmul.msk.f32.vlgmr.msrb.gmra.mxu0 %vm19_vm0, %v3013_v40 }
 0x3d9   : > { %3637 = vmatmul.msk.f32.vlgmr.msrb.gmra.mxu1 %vm19_vm0, %v3050_v43  ;;  %3625 = vmatmul.msk.f32.vlgmr.msrb.gmra.mxu2 %vm19_vm0, %v2906_v44 }
 0x3da   : > { %3629 = vmatmul.msk.f32.vlgmr.msrb.gmra.mxu3 %vm19_vm0, %v2976_v45 }
 0x3e0   : > { %3634 = vmatmul.msk.f32.gmra.mxu0 %vm19_vm0, %v3014_v46 }
 0x3e1   : > { %3638 = vmatmul.msk.f32.gmra.mxu1 %vm19_vm0, %v3051_v47  ;;  %3626 = vmatmul.msk.f32.gmra.mxu2 %vm19_vm0, %v2907_v48 }
 0x3e2   : > { %3630 = vmatmul.msk.f32.gmra.mxu3 %vm19_vm0, %v2977_v49 }
 0x3e8   : > { %3649 = vmatmul.msk.f32.vlgmr.msra.gmra.mxu0 %vm19_vm0, %v3161_v50 }
 0x3e9   : > { %3653 = vmatmul.msk.f32.vlgmr.msra.gmra.mxu1 %vm19_vm0, %v2907_v48  ;;  %3641 = vmatmul.msk.f32.vlgmr.msra.gmra.mxu2 %vm19_vm0, %v3087_v51 }
 0x3ea   : > { %3645 = vmatmul.msk.f32.vlgmr.msra.gmra.mxu3 %vm19_vm0, %v3124_v52 }
 0x3f0   : > { %3650 = vmatmul.msk.f32.gmra.mxu0 %vm19_vm0, %v3162_v41 }
 0x3f1   : > { %3654 = vmatmul.msk.f32.gmra.mxu1 %vm19_vm0, %v3199_v42  ;;  %3642 = vmatmul.msk.f32.gmra.mxu2 %vm19_vm0, %v3088_v53 }
 0x3f2   : > { %3646 = vmatmul.msk.f32.gmra.mxu3 %vm19_vm0, %v3125_v54 }
 0x42d   : > { %v2544_v55 = vpop.f32.mrf.mxu0 }
 0x42e   : > { %v2576_v56 = vpop.f32.mrf.mxu1 }
 0x42f   : > { %v2577_v5 = vadd.f32 %v2576_v56, %v2544_v55 }
 0x434   : > { %v2547_v57 = vpop.f32.mrf.mxu2 }
 0x435   : > { %v2579_v59 = vpop.f32.mrf.mxu3  ;;  %v2688_v60 = vpop.f32.mrf.mxu0 }
 0x436   : > { %v2726_v61 = vpop.f32.mrf.mxu1  ;;  %v2580_v9 = vadd.f32 %v2579_v59, %v2547_v57 }
 0x43c   : > { %v2612_v62 = vpop.f32.mrf.mxu2 }
 0x43d   : > { %v2650_v63 = vpop.f32.mrf.mxu3  ;;  %v2691_v1 = vpop.f32.mrf.mxu0  ;;  %v2618_v6 = vadd.f32 %v2612_v62, %v2577_v5 }
 0x43e   : > { %v2729_v2 = vpop.f32.mrf.mxu1 }
 0x43f   : > { %v2656_v10 = vadd.f32 %v2650_v63, %v2618_v6 }
 0x441   : > { %v2694_v14 = vadd.f32 %v2688_v60, %v2656_v10 }
 0x443   : > { %v2732_v16 = vadd.f32 %v2726_v61, %v2694_v14 }
 0x444   : > { %v2615_v7 = vpop.f32.mrf.mxu2 }
 0x445   : > { %v2653_v8 = vpop.f32.mrf.mxu3  ;;  %v2840_v11 = vpop.f32.mrf.mxu0  ;;  %v2619_v13 = vadd.f32 %v2615_v7, %v2580_v9 }
 0x446   : > { %v2938_v12 = vpop.f32.mrf.mxu1 }
 0x447   : > { %v2657_v3 = vadd.f32 %v2653_v8, %v2619_v13 }
 0x449   : > { %v2695_v18 = vadd.f32 %v2691_v1, %v2657_v3 }
 0x44b   : > { %v2733_v23 = vadd.f32 %v2729_v2, %v2695_v18 }
 0x44c   : > { %v2764_v4 = vpop.f32.mrf.mxu2 }
 0x44d   : > { %v2802_v15 = vpop.f32.mrf.mxu3  ;;  %v2843_v17 = vpop.f32.mrf.mxu0  ;;  %v2770_v21 = vadd.f32 %v2764_v4, %v2732_v16 }
 0x44e   : > { %v2941_v22 = vpop.f32.mrf.mxu1 }
 0x44f   : > { %v2808_v24 = vadd.f32 %v2802_v15, %v2770_v21 }
 0x451   : > { %v2846_v0 = vadd.f32 %v2840_v11, %v2808_v24 }
 0x453   : > { %v2848_v30 = vsel %vm19_vm0, %v2846_v0, 0.0 }
 0x454   : > { %v2767_v25 = vpop.f32.mrf.mxu2 }
 0x455   : > { %v2805_v26 = vpop.f32.mrf.mxu3  ;;  %v2771_v27 = vadd.f32 %v2767_v25, %v2733_v23  ;;  %v3042_v19 = vpop.f32.mrf.mxu0 }
 0x456   : > { %v3079_v29 = vpop.f32.mrf.mxu1 }
 0x457   : > { %v2809_v28 = vadd.f32 %v2805_v26, %v2771_v27 }
 0x459   : > { %v2847_v20 = vadd.f32 %v2843_v17, %v2809_v28 }
 0x45b   : > { %v2849_v31 = vsel %vm19_vm0, %v2847_v20, 0.0 }
 0x45c   : > { %v2850_v32 = vadd.f32 %v2849_v31, %v2848_v30  ;;  %v2970_v33 = vpop.f32.mrf.mxu2 }
 0x45d   : > { %v3005_v34 = vpop.f32.mrf.mxu3  ;;  %v2971_v36 = vadd.f32 %v2970_v33, %v2938_v12  ;;  %v3045_v38 = vpop.f32.mrf.mxu0 }
 0x45e   : > { %v2851_v35 = vrot.slane %v2850_v32, 4  ;;  %v3082_v43 = vpop.f32.mrf.mxu1 }
 0x45f   : > { %v3011_v40 = vadd.f32 %v3005_v34, %v2971_v36 }
 0x460   : > { %v2852_v37 = vadd.f32 %v2851_v35, %v2850_v32 }
 0x461   : > { %v3048_v48 = vadd.f32 %v3042_v19, %v3011_v40 }
 0x462   : > { %v2853_v39 = vrot.slane %v2852_v37, 2 }
 0x463   : > { %v3085_v52 = vadd.f32 %v3079_v29, %v3048_v48 }
 0x464   : > { %v2854_v44 = vadd.f32 %v2853_v39, %v2852_v37  ;;  %v2973_v45 = vpop.f32.mrf.mxu2 }
 0x465   : > { %v3008_v46 = vpop.f32.mrf.mxu3  ;;  %v2974_v49 = vadd.f32 %v2973_v45, %v2941_v22  ;;  %v3190_v42 = vpop.f32.mrf.mxu0 }
 0x466   : > { %v2855_v47 = vrot.slane %v2854_v44, 1  ;;  %v3227_v61 = vpop.f32.mrf.mxu1 }
 0x467   : > { %v3012_v41 = vadd.f32 %v3008_v46, %v2974_v49 }
 0x468   : > { %v2856_v50 = vadd.f32 %v2855_v47, %v2854_v44 }
 0x469   : > { %v3049_v62 = vadd.f32 %v3045_v38, %v3012_v41 }
 0x46a   : > { %v2864_v51 = vmul.f32 %v2856_v50, %v3983_v58 }
 0x46b   : > { %v3086_v7 = vadd.f32 %v3082_v43, %v3049_v62 }
 0x46c   : > { %v2865_v53 = vsub.f32 %v2846_v0, %v2864_v51  ;;  %v2866_v54 = vsub.f32 %v2847_v20, %v2864_v51  ;;  %v3116_v55 = vpop.f32.mrf.mxu2 }
 0x46d   : > { %v3153_v56 = vpop.f32.mrf.mxu3  ;;  %v3122_v57 = vadd.f32 %v3116_v55, %v3085_v52  ;;  %v3193_v13 = vpop.f32.mrf.mxu0 }
 0x46e   : > { %v2867_v59 = vmul.f32 %v2865_v53, %v2865_v53  ;;  %v2868_v60 = vmul.f32 %v2866_v54, %v2866_v54  ;;  %v3230_v4 = vpop.f32.mrf.mxu1 }
 0x46f   : > { %v3159_v5 = vadd.f32 %v3153_v56, %v3122_v57 }
 0x470   : > { %v2869_v63 = vsel %vm19_vm0, %v2867_v59, 0.0  ;;  %v2870_v1 = vsel %vm19_vm0, %v2868_v60, 0.0 }
 0x471   : > { %v2871_v2 = vadd.f32 %v2870_v1, %v2869_v63  ;;  %v3196_v11 = vadd.f32 %v3190_v42, %v3159_v5 }
 0x473   : > { %v2872_v6 = vrot.slane %v2871_v2, 4  ;;  %v3233_v16 = vadd.f32 %v3227_v61, %v3196_v11 }
 0x474   : > { %v3119_v8 = vpop.f32.mrf.mxu2 }
 0x475   : > { %v3156_v9 = vpop.f32.mrf.mxu3  ;;  %v2873_v10 = vadd.f32 %v2872_v6, %v2871_v2  ;;  %v3123_v12 = vadd.f32 %v3119_v8, %v3086_v7  ;;  %v3235_v23 = vsel %vm19_vm0, %v3233_v16, 0.0  ;;  %v3292_v6 = vld [vmem:[%s4535_s29] sm:$0xff]  ;;  %v3293_v7 = vld [vmem:[%s4535_s29 + $0x8] sm:$0xff] }
 0x477   : > { %v2874_v14 = vrot.slane %v2873_v10, 2  ;;  %v3160_v3 = vadd.f32 %v3156_v9, %v3123_v12 }
 0x479   : > { %v2875_v15 = vadd.f32 %v2874_v14, %v2873_v10  ;;  %v3197_v17 = vadd.f32 %v3193_v13, %v3160_v3 }
 0x47b   : > { %v2876_v18 = vrot.slane %v2875_v15, 1  ;;  %v3234_v21 = vadd.f32 %v3230_v4, %v3197_v17 }
 0x47d   : > { %v2877_v22 = vadd.f32 %v2876_v18, %v2875_v15  ;;  %v3236_v24 = vsel %vm19_vm0, %v3234_v21, 0.0 }
 0x47e   : > { %v3237_v25 = vadd.f32 %v3236_v24, %v3235_v23 }
 0x47f   : > { %v2878_v26 = vmul.f32 %v2877_v22, %v3983_v58 }
 0x480   : > { %v3238_v27 = vrot.slane %v3237_v25, 4 }
 0x481   : > { %v2879_v0 = vadd.f32 1e-05, %v2878_v26 }
 0x482   : > { %v3239_v28 = vadd.f32 %v3238_v27, %v3237_v25 }
 0x483   : > { %3738 = vrsqrt.f32 %v2879_v0  ;;  %vm2886_vm6 = vweird.f32 %v2879_v0 }
 0x484   : > { %v3240_v19 = vrot.slane %v3239_v28, 2 }
 0x486   : > { %v3241_v20 = vadd.f32 %v3240_v19, %v3239_v28 }
 0x488   : > { %v3242_v29 = vrot.slane %v3241_v20, 1 }
 0x489   : > { %v3739_v30 = vpop.eup %3738 }
 0x48a   : > { %v2881_v31 = vmul.f32 %v3739_v30, %v2879_v0  ;;  %v3243_v32 = vadd.f32 %v3242_v29, %v3241_v20  ;;  %vm2887_vm5 = vweird.f32 %v3739_v30  ;;  %v3294_v20 = vld [vmem:[%s4535_s29 + $0x10] sm:$0xff]  ;;  %v3295_v29 = vld [vmem:[%s4535_s29 + $0x18] sm:$0xff] }
 0x48b   : > { %vm2888_vm7 = vmor %vm2886_vm6, %vm2887_vm5 }
 0x48c   : > { %v2882_v33 = vmul.f32 %v3739_v30, %v2881_v31  ;;  %v3244_v34 = vmul.f32 %v3243_v32, %v3983_v58 }
 0x48e   : > { %v2883_v35 = vmul.f32 0.5, %v2882_v33  ;;  %v3245_v36 = vsub.f32 %v3233_v16, %v3244_v34  ;;  %v3246_v37 = vsub.f32 %v3234_v21, %v3244_v34 }
 0x490   : > { %v2884_v38 = vsub.f32 1.5, %v2883_v35  ;;  %v3247_v39 = vmul.f32 %v3245_v36, %v3245_v36  ;;  %v3248_v40 = vmul.f32 %v3246_v37, %v3246_v37 }
 0x492   : > { %v2885_v43 = vmul.f32 %v3739_v30, %v2884_v38  ;;  %v3249_v44 = vsel %vm19_vm0, %v3247_v39, 0.0  ;;  %v3250_v45 = vsel %vm19_vm0, %v3248_v40, 0.0 }
 0x493   : > { %v3251_v46 = vadd.f32 %v3250_v45, %v3249_v44 }
 0x494   : > { %v2889_v47 = vsel %vm2888_vm7, %v3739_v30, %v2885_v43 }
 0x495   : > { %v2890_v48 = vmul.f32 %v2889_v47, %v2865_v53  ;;  %v2891_v49 = vmul.f32 %v2889_v47, %v2866_v54  ;;  %v3252_v50 = vrot.slane %v3251_v46, 4 }
 0x497   : > { %v2894_v51 = vmin.f32 %v2890_v48, 0.0  ;;  %v2895_v52 = vmin.f32 %v2891_v49, 0.0  ;;  %v3253_v41 = vadd.f32 %v3252_v50, %v3251_v46  ;;  %vm2892_vm8 = vcmp.gt.f32.partialorder %v2890_v48, 0.0 }
 0x498   : > { %vm2893_vm9 = vcmp.gt.f32.partialorder %v2891_v49, 0.0 }
 0x499   : > { %v2896_v42 = vmul.f32 1.442695, %v2894_v51  ;;  %v2898_v55 = vmul.f32 1.442695, %v2895_v52  ;;  %v3254_v56 = vrot.slane %v3253_v41, 2 }
 0x49b   : > { %3740 = vpow2.f32 %v2896_v42  ;;  %v3255_v57 = vadd.f32 %v3254_v56, %v3253_v41 }
 0x49c   : > { %3742 = vpow2.f32 %v2898_v55 }
 0x49d   : > { %v3256_v59 = vrot.slane %v3255_v57, 1 }
 0x49f   : > { %v3257_v60 = vadd.f32 %v3256_v59, %v3255_v57 }
 0x4a1   : > { %v3741_v61 = vpop.eup %3740  ;;  %v3258_v1 = vmul.f32 %v3257_v60, %v3983_v58 }
 0x4a2   : > { %v3743_v62 = vpop.eup %3742  ;;  %v3618_v63 = vadd.f32 -1.0, %v3741_v61 }
 0x4a3   : > { %v3619_v53 = vadd.f32 -1.0, %v3743_v62  ;;  %v3259_v2 = vadd.f32 1e-05, %v3258_v1 }
 0x4a4   : > { %v2902_v54 = vsel %vm2892_vm8, %v2890_v48, %v3618_v63 }
 0x4a5   : > { %v2903_v5 = vsel %vm2893_vm9, %v2891_v49, %v3619_v53  ;;  %2904 = vst.msk [vmem:[#allocation5] sm:$0xff] %vm19_vm0, %v2902_v54  ;;  %3744 = vrsqrt.f32 %v3259_v2  ;;  %vm3266_vm11 = vweird.f32 %v3259_v2 }
 0x4a6   : > { %2905 = vst.msk [vmem:[#allocation5 + $0x8] sm:$0xff] %vm19_vm0, %v2903_v5 }
 0x4ab   : > { %v3745_v8 = vpop.eup %3744 }
 0x4ac   : > { %v3286_v9 = vld [vmem:[#allocation5] sm:$0xff]  ;;  %v3261_v12 = vmul.f32 %v3745_v8, %v3259_v2  ;;  %vm3267_vm10 = vweird.f32 %v3745_v8 }
 0x4ad   : > { %v3287_v10 = vld [vmem:[#allocation5 + $0x8] sm:$0xff]  ;;  %v3296_v11 = vadd.f32 %v3292_v6, %v3286_v9  ;;  %vm3268_vm12 = vmor %vm3266_vm11, %vm3267_vm10 }
 0x4ae   : > { %v3297_v13 = vadd.f32 %v3293_v7, %v3287_v10  ;;  %v3262_v14 = vmul.f32 %v3745_v8, %v3261_v12 }
 0x4af   : > { %3300 = vst.msk [vmem:[%s4535_s29] sm:$0xff] %vm19_vm0, %v3296_v11 }
 0x4b0   : > { %3301 = vst.msk [vmem:[%s4535_s29 + $0x8] sm:$0xff] %vm19_vm0, %v3297_v13  ;;  %v3263_v3 = vmul.f32 0.5, %v3262_v14 }
 0x4b2   : > { %v3264_v4 = vsub.f32 1.5, %v3263_v3 }
 0x4b4   : > { %v3265_v15 = vmul.f32 %v3745_v8, %v3264_v4 }
 0x4b6   : > { %v3269_v16 = vsel %vm3268_vm12, %v3745_v8, %v3265_v15 }
 0x4b7   : > { %v3270_v17 = vmul.f32 %v3269_v16, %v3245_v36  ;;  %v3271_v18 = vmul.f32 %v3269_v16, %v3246_v37 }
 0x4b9   : > { %v3274_v21 = vmin.f32 %v3270_v17, 0.0  ;;  %v3275_v22 = vmin.f32 %v3271_v18, 0.0  ;;  %vm3272_vm13 = vcmp.gt.f32.partialorder %v3270_v17, 0.0  ;;  %vm3273_vm14 = vcmp.gt.f32.partialorder %v3271_v18, 0.0 }
 0x4bb   : > { %v3276_v23 = vmul.f32 1.442695, %v3274_v21  ;;  %v3278_v24 = vmul.f32 1.442695, %v3275_v22 }
 0x4bd   : > { %3746 = vpow2.f32 %v3276_v23 }
 0x4be   : > { %3748 = vpow2.f32 %v3278_v24 }
 0x4c3   : > { %v3747_v25 = vpop.eup %3746 }
 0x4c4   : > { %v3749_v26 = vpop.eup %3748  ;;  %v3655_v27 = vadd.f32 -1.0, %v3747_v25 }
 0x4c5   : > { %v3656_v0 = vadd.f32 -1.0, %v3749_v26 }
 0x4c6   : > { %v3282_v28 = vsel %vm3272_vm13, %v3270_v17, %v3655_v27 }
 0x4c7   : > { %v3283_v19 = vsel %vm3273_vm14, %v3271_v18, %v3656_v0  ;;  %3284 = vst.msk [vmem:[#allocation5 + $0x10] sm:$0xff] %vm19_vm0, %v3282_v28 }
 0x4c8   : > { %3285 = vst.msk [vmem:[#allocation5 + $0x18] sm:$0xff] %vm19_vm0, %v3283_v19 }
 0x4ce   : > { %v3288_v30 = vld [vmem:[#allocation5 + $0x10] sm:$0xff]  ;;  %2495 = sbr.rel (!%p2493_p3) target bundleno = 929 (0x3a1), region = 151 }
 0x4cf   : > { %v3289_v31 = vld [vmem:[#allocation5 + $0x18] sm:$0xff]  ;;  %v3298_v32 = vadd.f32 %v3294_v20, %v3288_v30 }
 0x4d0   : > { %v3299_v33 = vadd.f32 %v3295_v29, %v3289_v31 }
 0x4d1   : > { %3302 = vst.msk [vmem:[%s4535_s29 + $0x10] sm:$0xff] %vm19_vm0, %v3298_v32 }
 0x4d2   : > { %3303 = vst.msk [vmem:[%s4535_s29 + $0x18] sm:$0xff] %vm19_vm0, %v3299_v33 }

</bundles_post_ra>
